<compile_context>
chip_gen: v7x
topology: tpu7x:2x2x1
jax: 0.10.0
libtpu: 0.0.40
codegen_flags: <defaults>
</compile_context>

<pallas_src>
import json

import jax
import jax.numpy as jnp
from jax.experimental import pallas as pl
from jax.experimental.pallas import tpu as pltpu


def _round_up(x, m):
    return ((x + m - 1) // m) * m


def _imgs_per_step(n):
    """Images folded into the lane axis of one grid step.

    v7x has 2 TensorCores/chip -> keep a 2-way 'parallel' grid so each core
    takes half the batch; single-TC chips (v5e/v6e) fold the whole batch into
    one fat step (no per-step overhead, wider MXU N-dimension).
    """
    try:
        kind = jax.devices()[0].device_kind.lower()
    except Exception:
        kind = ""
    if "7" in kind and n >= 2 and n % 2 == 0:
        return n // 2
    return n


# ----------------------------------------------------------------------------
# Fused conv-stack Pallas kernel (im2col-in-VMEM, one matmul per layer)
# ----------------------------------------------------------------------------
def _make_fused_kernel(cfgs, H, W, g_in, g_act, nb):
    M = H * W
    L = len(cfgs)
    seg_in = M + 2 * g_in
    seg_act = M + 2 * g_act

    # horizontal tap shifts that need a column mask (the center column never does)
    shifts = sorted({dj - c["pad"] for c in cfgs for dj in range(c["k"])} - {0})

    def kernel(*refs):
        x_ref = refs[0]
        wb = refs[1:1 + 2 * L]                 # (w0, b0, w1, b1, ...)
        o_ref = refs[1 + 2 * L]
        scratch = refs[2 + 2 * L:]
        slab_refs = scratch[:L]                # per-layer im2col slabs
        act_refs = scratch[L:]                 # guarded intermediate activations

        # column-in-row index of each flattened spatial position (hoisted once;
        # identical for every image because M is a multiple of W).
        idx = jax.lax.broadcasted_iota(jnp.int32, (1, M), 1)
        if W & (W - 1) == 0:
            col = jnp.bitwise_and(idx, W - 1)
        else:
            col = jax.lax.rem(idx, W)
        masks = {s: (col + s >= 0) & (col + s < W) for s in shifts}

        src_ref, src_guard, src_seg = x_ref, g_in, seg_in
        for li, cfg in enumerate(cfgs):
            k, p, cb = cfg["k"], cfg["pad"], cfg["cin_pad"]
            w_ref, b_ref = wb[2 * li], wb[2 * li + 1]
            slab = slab_refs[li]

            # ---- build the im2col slab (k*k*cb, nb*M) bf16: one copy per
            #      (tap, image); horizontal zero padding is masked into the
            #      bf16 window here, vertical padding comes from the guards.
            for b in range(nb):
                sb = b * src_seg + src_guard
                db = b * M
                for di in range(k):
                    for dj in range(k):
                        off = (di - p) * W + (dj - p)
                        win = src_ref[:, sb + off:sb + off + M]     # (cb, M)
                        s = dj - p
                        if s != 0:
                            win = jnp.where(masks[s], win, jnp.zeros_like(win))
                        r0 = (di * k + dj) * cb
                        slab[r0:r0 + cb, db:db + M] = win

            # ---- one large-K MXU matmul per layer; bias + ReLU fused.
            acc = jnp.dot(w_ref[...], slab[...],
                          preferred_element_type=jnp.float32)       # (coutP, nb*M)
            acc = acc + b_ref[...]                                   # (coutP,1) bcast
            if cfg["relu"]:
                acc = jnp.maximum(acc, 0.0)

            if li == L - 1:
                o_ref[...] = acc            # lane-dense (coutP, nb*M) f32 store
            else:
                a_ref = act_refs[li]
                y = acc.astype(a_ref.dtype)
                zg = jnp.zeros((a_ref.shape[0], g_act), a_ref.dtype)
                for b in range(nb):
                    base = b * seg_act
                    # zero only the guard columns; interior is fully overwritten
                    a_ref[:, base:base + g_act] = zg
                    a_ref[:, base + g_act + M:base + seg_act] = zg
                    a_ref[:, base + g_act:base + g_act + M] = y[:, b * M:(b + 1) * M]
                src_ref, src_guard, src_seg = a_ref, g_act, seg_act

    return kernel


def fused_conv_stack(cfgs, weights, biases, x):
    """Run a stride-1 'same'-padded conv(+ReLU) chain in ONE pallas_call.

    x: (N, Cin, H, W) float32 NCHW.  Returns (N, Cout_last, H, W) float32.
    """
    N, cin, H, W = x.shape
    M = H * W
    max_off = max(c["pad"] * W + c["pad"] for c in cfgs)
    # small guard on the (load-only) input slab; 128-lane guard on the
    # activation scratch so its interior stores stay lane-aligned.
    g_in = _round_up(max(cfgs[0]["pad"] * W + cfgs[0]["pad"], 1), 8)
    g_act = 128
    assert g_in >= cfgs[0]["pad"] * W + cfgs[0]["pad"] and g_act >= max_off

    nb = _imgs_per_step(N)                      # images folded per grid step
    steps = N // nb
    seg_in = M + 2 * g_in

    c0p = cfgs[0]["cin_pad"]
    coutP = cfgs[-1]["cout_pad"]
    cout_last = cfgs[-1]["cout"]

    # NCHW f32 -> (steps, Cin_pad, nb*(g+M+g)) bf16 with per-image guard zeros.
    xf = x.reshape(steps, nb, cin, M).transpose(0, 2, 1, 3).astype(jnp.bfloat16)
    xf = jnp.pad(xf, ((0, 0), (0, c0p - cin), (0, 0), (g_in, g_in)))
    xf = xf.reshape(steps, c0p, nb * seg_in)

    in_specs = [pl.BlockSpec((None, c0p, nb * seg_in), lambda i: (i, 0, 0))]
    args = [xf]
    for wt, bs in zip(weights, biases):
        in_specs.append(pl.BlockSpec(wt.shape, lambda i: (0, 0)))   # resident weights
        in_specs.append(pl.BlockSpec(bs.shape, lambda i: (0, 0)))
        args += [wt, bs]

    scratch = [pltpu.VMEM((c["k"] * c["k"] * c["cin_pad"], nb * M), jnp.bfloat16)
               for c in cfgs]                                       # im2col slabs
    scratch += [pltpu.VMEM((c["cout_pad"], nb * (M + 2 * g_act)), jnp.bfloat16)
                for c in cfgs[:-1]]                                 # guarded activations

    out = pl.pallas_call(
        _make_fused_kernel(cfgs, H, W, g_in, g_act, nb),
        out_shape=jax.ShapeDtypeStruct((steps, coutP, nb * M), jnp.float32),
        grid_spec=pltpu.PrefetchScalarGridSpec(
            num_scalar_prefetch=0,
            grid=(steps,),
            in_specs=in_specs,
            out_specs=pl.BlockSpec((None, coutP, nb * M), lambda i: (i, 0, 0)),
            scratch_shapes=scratch),
        compiler_params=pltpu.CompilerParams(
            dimension_semantics=("parallel",)),
    )(*args)

    out = out.reshape(steps, coutP, nb, M).transpose(0, 2, 1, 3)
    return out.reshape(N, coutP, H, W)[:, :cout_last]


# ----------------------------------------------------------------------------
# JAX glue (weight repack, pixel shuffle, graph executor)
# ----------------------------------------------------------------------------
def _prep_conv_weight(w, cin_pad, cout_pad):
    # torch (Cout, Cin, kh, kw) -> im2col-matched (Cout_pad, kh*kw*Cin_pad) bf16
    cout, cin, kh, kw = w.shape
    wt = jnp.transpose(w, (0, 2, 3, 1))                      # (Cout, kh, kw, Cin)
    wt = jnp.pad(wt, ((0, cout_pad - cout), (0, 0), (0, 0), (0, cin_pad - cin)))
    return wt.reshape(cout_pad, kh * kw * cin_pad).astype(jnp.bfloat16)


def _prep_bias(b, cout_pad):
    return jnp.pad(b, (0, cout_pad - b.shape[0])).reshape(-1, 1).astype(jnp.float32)


def pixel_shuffle(x, r):
    # PyTorch nn.PixelShuffle: (N, C*r^2, H, W) -> (N, C, H*r, W*r)
    n, c_r2, h, w = x.shape
    c = c_r2 // (r * r)
    x = x.reshape(n, c, r, r, h, w)
    x = x.transpose(0, 1, 4, 2, 5, 3)
    return x.reshape(n, c, h * r, w * r)


def model_forward(params, arch, details, *X):
    # Mirrors Model.forward semantics (input-count check, layer graph, output
    # selection) for the in-script architecture.
    if len(X) != details["num_inputs"]:
        raise RuntimeError(
            f"Expected {details['num_inputs']} inputs, got {len(X)}.")
    x = X[0]

    relu_after = {n["inputs"][0] for n in arch if n["kind"] == "relu"}
    cfgs, weights, biases = [], [], []
    shuffle_r = None
    prev_cout_pad = None
    for n in arch:
        if n["kind"] == "conv":
            cin_pad = (_round_up(n["cin"], 16) if prev_cout_pad is None
                       else prev_cout_pad)
            cout_pad = _round_up(n["cout"], 16)
            cfgs.append({"k": n["k"], "pad": n["padding"], "cin_pad": cin_pad,
                         "cout": n["cout"], "cout_pad": cout_pad,
                         "relu": n["code"] in relu_after})
            p = params[n["code"]]
            weights.append(_prep_conv_weight(p["w"], cin_pad, cout_pad))
            biases.append(_prep_bias(p["b"], cout_pad))
            prev_cout_pad = cout_pad
        elif n["kind"] == "pixel_shuffle":
            shuffle_r = n["r"]

    y = fused_conv_stack(cfgs, weights, biases, x)            # NCHW
    out = pixel_shuffle(y, shuffle_r) if shuffle_r is not None else y
    outs = details["outputs"]
    # TODO(synk): the original Model eval()s arbitrary layer strings from
    # arch.json and supports multi-input cat nodes plus fit()/find_size()
    # training utilities; this executor is specialized to the fixed
    # conv->ReLU chain + PixelShuffle architecture embedded below.
    return out if len(outs) == 1 else [out]


# ----------------------------------------------------------------------------
# In-script "arch.json" (ESPCN-style subpixel upscaler, r = 2)
# ----------------------------------------------------------------------------
_ARCH_JSON = json.dumps({
    "details": {"num_inputs": 1, "outputs": [5]},
    "arch": [
        {"code": 0, "kind": "conv", "inputs": [-1],
         "cin": 3, "cout": 32, "k": 5, "padding": 2},
        {"code": 1, "kind": "relu", "inputs": [0]},
        {"code": 2, "kind": "conv", "inputs": [1],
         "cin": 32, "cout": 32, "k": 3, "padding": 1},
        {"code": 3, "kind": "relu", "inputs": [2]},
        {"code": 4, "kind": "conv", "inputs": [3],
         "cin": 32, "cout": 12, "k": 3, "padding": 1},   # 3 * r^2, r = 2
        {"code": 5, "kind": "pixel_shuffle", "inputs": [4], "r": 2},
    ],
})


def init_params(key, arch):
    params = {}
    for node in arch:
        if node["kind"] != "conv":
            continue
        key, kw_, kb_ = jax.random.split(key, 3)
        cin, cout, k = node["cin"], node["cout"], node["k"]
        fan_in = cin * k * k
        scale = 1.0 / jnp.sqrt(jnp.float32(fan_in))
        params[node["code"]] = {
            "w": jax.random.uniform(kw_, (cout, cin, k, k), jnp.float32,
                                    -scale, scale),
            "b": jax.random.uniform(kb_, (cout,), jnp.float32, -scale, scale),
        }
    return params


# pure-JAX reference (matched bf16-in / f32-accumulate precision)
def _reference_forward(params, arch, details, x):
    outputs = []
    for node in arch:
        j = node["inputs"][0]
        src = outputs[j] if j >= 0 else x
        if node["kind"] == "conv":
            p = params[node["code"]]
            y = jax.lax.conv_general_dilated(
                src.astype(jnp.bfloat16), p["w"].astype(jnp.bfloat16),
                (1, 1), [(node["padding"], node["padding"])] * 2,
                dimension_numbers=("NCHW", "OIHW", "NCHW"),
                preferred_element_type=jnp.float32)
            y = y + p["b"][None, :, None, None]
        elif node["kind"] == "relu":
            y = jnp.maximum(src, 0.0)
        else:
            y = pixel_shuffle(src, node["r"])
        outputs.append(y)
    return outputs[details["outputs"][0]]


if __name__ == "__main__":
    spec = json.loads(_ARCH_JSON)
    details, arch = spec["details"], spec["arch"]

    key = jax.random.PRNGKey(0)
    kp, kx = jax.random.split(key)
    params = init_params(kp, arch)
    x = jax.random.normal(kx, (2, 3, 16, 16), jnp.float32)

    fwd = jax.jit(lambda p, inp: model_forward(p, arch, details, inp))
    out = jax.block_until_ready(fwd(params, x))
    assert out.shape == (2, 3, 32, 32), out.shape

    ref = jax.block_until_ready(_reference_forward(params, arch, details, x))
    err = float(jnp.max(jnp.abs(out - ref)))
    assert jnp.allclose(out, ref, atol=1e-2, rtol=1e-2), err

    print("KERNEL_OK")
</pallas_src>

<mosaic_0001>
module attributes {stable_mosaic.version = 11 : i64} {
  func.func @kernel(%arg0: i32, %arg1: memref<1x16x672xbf16, #tpu.memory_space<vmem>>, %arg2: memref<32x400xbf16, #tpu.memory_space<vmem>>, %arg3: memref<32x1xf32, #tpu.memory_space<vmem>>, %arg4: memref<32x288xbf16, #tpu.memory_space<vmem>>, %arg5: memref<32x1xf32, #tpu.memory_space<vmem>>, %arg6: memref<16x288xbf16, #tpu.memory_space<vmem>>, %arg7: memref<16x1xf32, #tpu.memory_space<vmem>>, %arg8: memref<1x16x512xf32, #tpu.memory_space<vmem>>, %arg9: memref<400x512xbf16, #tpu.memory_space<vmem>>, %arg10: memref<288x512xbf16, #tpu.memory_space<vmem>>, %arg11: memref<288x512xbf16, #tpu.memory_space<vmem>>, %arg12: memref<32x1024xbf16, #tpu.memory_space<vmem>>, %arg13: memref<32x1024xbf16, #tpu.memory_space<vmem>>) attributes {dimension_semantics = [#tpu.dimension_semantics<parallel>], iteration_bounds = array<i64: 1>, scalar_prefetch = 0 : i64, scratch_operands = 5 : i64, tpu.core_type = #tpu.core_type<tc>, window_params = [{transform_indices = @transform_0, window_bounds = array<i64: 1, 16, 672>}, {pipeline_mode = #tpu.pipeline_mode<synchronous>, transform_indices = @transform_1, window_bounds = array<i64: 32, 400>}, {pipeline_mode = #tpu.pipeline_mode<synchronous>, transform_indices = @transform_2, window_bounds = array<i64: 32, 1>}, {pipeline_mode = #tpu.pipeline_mode<synchronous>, transform_indices = @transform_3, window_bounds = array<i64: 32, 288>}, {pipeline_mode = #tpu.pipeline_mode<synchronous>, transform_indices = @transform_4, window_bounds = array<i64: 32, 1>}, {pipeline_mode = #tpu.pipeline_mode<synchronous>, transform_indices = @transform_5, window_bounds = array<i64: 16, 288>}, {pipeline_mode = #tpu.pipeline_mode<synchronous>, transform_indices = @transform_6, window_bounds = array<i64: 16, 1>}, {transform_indices = @transform_7, window_bounds = array<i64: 1, 16, 512>}]} {
    %0 = tpu.iota {dimensions = array<i32: 1>} : vector<1x256xi32>
    %c15_i32 = arith.constant 15 : i32
    %1 = vector.broadcast %c15_i32 : i32 to vector<1x256xi32>
    %2 = arith.andi %0, %1 : vector<1x256xi32>
    %c-2_i32 = arith.constant -2 : i32
    %3 = vector.broadcast %c-2_i32 : i32 to vector<1x256xi32>
    %4 = arith.addi %2, %3 : vector<1x256xi32>
    %c0_i32 = arith.constant 0 : i32
    %5 = vector.broadcast %c0_i32 : i32 to vector<1x256xi32>
    %6 = arith.cmpi sge, %4, %5 : vector<1x256xi32>
    %c-2_i32_0 = arith.constant -2 : i32
    %7 = vector.broadcast %c-2_i32_0 : i32 to vector<1x256xi32>
    %8 = arith.addi %2, %7 : vector<1x256xi32>
    %c16_i32 = arith.constant 16 : i32
    %9 = vector.broadcast %c16_i32 : i32 to vector<1x256xi32>
    %10 = arith.cmpi slt, %8, %9 : vector<1x256xi32>
    %11 = arith.andi %6, %10 : vector<1x256xi1>
    %c-1_i32 = arith.constant -1 : i32
    %12 = vector.broadcast %c-1_i32 : i32 to vector<1x256xi32>
    %13 = arith.addi %2, %12 : vector<1x256xi32>
    %c0_i32_1 = arith.constant 0 : i32
    %14 = vector.broadcast %c0_i32_1 : i32 to vector<1x256xi32>
    %15 = arith.cmpi sge, %13, %14 : vector<1x256xi32>
    %c-1_i32_2 = arith.constant -1 : i32
    %16 = vector.broadcast %c-1_i32_2 : i32 to vector<1x256xi32>
    %17 = arith.addi %2, %16 : vector<1x256xi32>
    %c16_i32_3 = arith.constant 16 : i32
    %18 = vector.broadcast %c16_i32_3 : i32 to vector<1x256xi32>
    %19 = arith.cmpi slt, %17, %18 : vector<1x256xi32>
    %20 = arith.andi %15, %19 : vector<1x256xi1>
    %c1_i32 = arith.constant 1 : i32
    %21 = vector.broadcast %c1_i32 : i32 to vector<1x256xi32>
    %22 = arith.addi %2, %21 : vector<1x256xi32>
    %c0_i32_4 = arith.constant 0 : i32
    %23 = vector.broadcast %c0_i32_4 : i32 to vector<1x256xi32>
    %24 = arith.cmpi sge, %22, %23 : vector<1x256xi32>
    %c1_i32_5 = arith.constant 1 : i32
    %25 = vector.broadcast %c1_i32_5 : i32 to vector<1x256xi32>
    %26 = arith.addi %2, %25 : vector<1x256xi32>
    %c16_i32_6 = arith.constant 16 : i32
    %27 = vector.broadcast %c16_i32_6 : i32 to vector<1x256xi32>
    %28 = arith.cmpi slt, %26, %27 : vector<1x256xi32>
    %29 = arith.andi %24, %28 : vector<1x256xi1>
    %c2_i32 = arith.constant 2 : i32
    %30 = vector.broadcast %c2_i32 : i32 to vector<1x256xi32>
    %31 = arith.addi %2, %30 : vector<1x256xi32>
    %c0_i32_7 = arith.constant 0 : i32
    %32 = vector.broadcast %c0_i32_7 : i32 to vector<1x256xi32>
    %33 = arith.cmpi sge, %31, %32 : vector<1x256xi32>
    %c2_i32_8 = arith.constant 2 : i32
    %34 = vector.broadcast %c2_i32_8 : i32 to vector<1x256xi32>
    %35 = arith.addi %2, %34 : vector<1x256xi32>
    %c16_i32_9 = arith.constant 16 : i32
    %36 = vector.broadcast %c16_i32_9 : i32 to vector<1x256xi32>
    %37 = arith.cmpi slt, %35, %36 : vector<1x256xi32>
    %38 = arith.andi %33, %37 : vector<1x256xi1>
    %c0 = arith.constant 0 : index
    %c0_10 = arith.constant 0 : index
    %c6 = arith.constant 6 : index
    %39 = vector.load %arg1[%c0, %c0_10, %c6] : memref<1x16x672xbf16, #tpu.memory_space<vmem>>, vector<1x16x256xbf16>
    %40 = vector.shape_cast %39 : vector<1x16x256xbf16> to vector<16x256xbf16>
    %cst = arith.constant 0.000000e+00 : bf16
    %41 = vector.broadcast %cst : bf16 to vector<16x256xbf16>
    %42 = vector.shape_cast %11 : vector<1x256xi1> to vector<1x256xi1>
    %43 = vector.broadcast %42 : vector<1x256xi1> to vector<16x256xi1>
    %44 = arith.select %43, %40, %41 : vector<16x256xi1>, vector<16x256xbf16>
    %c0_11 = arith.constant 0 : index
    %c0_12 = arith.constant 0 : index
    %45 = vector.load %arg9[%c0_11, %c0_12] : memref<400x512xbf16, #tpu.memory_space<vmem>>, vector<16x256xbf16>
    tpu.vector_store %arg9[%c0_11, %c0_12], %44 {strides = array<i32>} : memref<400x512xbf16, #tpu.memory_space<vmem>>, vector<16x256xbf16>,
    %c0_13 = arith.constant 0 : index
    %c0_14 = arith.constant 0 : index
    %c7 = arith.constant 7 : index
    %46 = vector.load %arg1[%c0_13, %c0_14, %c7] : memref<1x16x672xbf16, #tpu.memory_space<vmem>>, vector<1x16x256xbf16>
    %47 = vector.shape_cast %46 : vector<1x16x256xbf16> to vector<16x256xbf16>
    %cst_15 = arith.constant 0.000000e+00 : bf16
    %48 = vector.broadcast %cst_15 : bf16 to vector<16x256xbf16>
    %49 = vector.shape_cast %20 : vector<1x256xi1> to vector<1x256xi1>
    %50 = vector.broadcast %49 : vector<1x256xi1> to vector<16x256xi1>
    %51 = arith.select %50, %47, %48 : vector<16x256xi1>, vector<16x256xbf16>
    %c16 = arith.constant 16 : index
    %c0_16 = arith.constant 0 : index
    %52 = vector.load %arg9[%c16, %c0_16] : memref<400x512xbf16, #tpu.memory_space<vmem>>, vector<16x256xbf16>
    tpu.vector_store %arg9[%c16, %c0_16], %51 {strides = array<i32>} : memref<400x512xbf16, #tpu.memory_space<vmem>>, vector<16x256xbf16>,
    %c0_17 = arith.constant 0 : index
    %c0_18 = arith.constant 0 : index
    %c8 = arith.constant 8 : index
    %53 = vector.load %arg1[%c0_17, %c0_18, %c8] : memref<1x16x672xbf16, #tpu.memory_space<vmem>>, vector<1x16x256xbf16>
    %54 = vector.shape_cast %53 : vector<1x16x256xbf16> to vector<16x256xbf16>
    %c32 = arith.constant 32 : index
    %c0_19 = arith.constant 0 : index
    %55 = vector.load %arg9[%c32, %c0_19] : memref<400x512xbf16, #tpu.memory_space<vmem>>, vector<16x256xbf16>
    tpu.vector_store %arg9[%c32, %c0_19], %54 {strides = array<i32>} : memref<400x512xbf16, #tpu.memory_space<vmem>>, vector<16x256xbf16>,
    %c0_20 = arith.constant 0 : index
    %c0_21 = arith.constant 0 : index
    %c9 = arith.constant 9 : index
    %56 = vector.load %arg1[%c0_20, %c0_21, %c9] : memref<1x16x672xbf16, #tpu.memory_space<vmem>>, vector<1x16x256xbf16>
    %57 = vector.shape_cast %56 : vector<1x16x256xbf16> to vector<16x256xbf16>
    %cst_22 = arith.constant 0.000000e+00 : bf16
    %58 = vector.broadcast %cst_22 : bf16 to vector<16x256xbf16>
    %59 = vector.shape_cast %29 : vector<1x256xi1> to vector<1x256xi1>
    %60 = vector.broadcast %59 : vector<1x256xi1> to vector<16x256xi1>
    %61 = arith.select %60, %57, %58 : vector<16x256xi1>, vector<16x256xbf16>
    %c48 = arith.constant 48 : index
    %c0_23 = arith.constant 0 : index
    %62 = vector.load %arg9[%c48, %c0_23] : memref<400x512xbf16, #tpu.memory_space<vmem>>, vector<16x256xbf16>
    tpu.vector_store %arg9[%c48, %c0_23], %61 {strides = array<i32>} : memref<400x512xbf16, #tpu.memory_space<vmem>>, vector<16x256xbf16>,
    %c0_24 = arith.constant 0 : index
    %c0_25 = arith.constant 0 : index
    %c10 = arith.constant 10 : index
    %63 = vector.load %arg1[%c0_24, %c0_25, %c10] : memref<1x16x672xbf16, #tpu.memory_space<vmem>>, vector<1x16x256xbf16>
    %64 = vector.shape_cast %63 : vector<1x16x256xbf16> to vector<16x256xbf16>
    %cst_26 = arith.constant 0.000000e+00 : bf16
    %65 = vector.broadcast %cst_26 : bf16 to vector<16x256xbf16>
    %66 = vector.shape_cast %38 : vector<1x256xi1> to vector<1x256xi1>
    %67 = vector.broadcast %66 : vector<1x256xi1> to vector<16x256xi1>
    %68 = arith.select %67, %64, %65 : vector<16x256xi1>, vector<16x256xbf16>
    %c64 = arith.constant 64 : index
    %c0_27 = arith.constant 0 : index
    %69 = vector.load %arg9[%c64, %c0_27] : memref<400x512xbf16, #tpu.memory_space<vmem>>, vector<16x256xbf16>
    tpu.vector_store %arg9[%c64, %c0_27], %68 {strides = array<i32>} : memref<400x512xbf16, #tpu.memory_space<vmem>>, vector<16x256xbf16>,
    %c0_28 = arith.constant 0 : index
    %c0_29 = arith.constant 0 : index
    %c22 = arith.constant 22 : index
    %70 = vector.load %arg1[%c0_28, %c0_29, %c22] : memref<1x16x672xbf16, #tpu.memory_space<vmem>>, vector<1x16x256xbf16>
    %71 = vector.shape_cast %70 : vector<1x16x256xbf16> to vector<16x256xbf16>
    %cst_30 = arith.constant 0.000000e+00 : bf16
    %72 = vector.broadcast %cst_30 : bf16 to vector<16x256xbf16>
    %73 = vector.shape_cast %11 : vector<1x256xi1> to vector<1x256xi1>
    %74 = vector.broadcast %73 : vector<1x256xi1> to vector<16x256xi1>
    %75 = arith.select %74, %71, %72 : vector<16x256xi1>, vector<16x256xbf16>
    %c80 = arith.constant 80 : index
    %c0_31 = arith.constant 0 : index
    %76 = vector.load %arg9[%c80, %c0_31] : memref<400x512xbf16, #tpu.memory_space<vmem>>, vector<16x256xbf16>
    tpu.vector_store %arg9[%c80, %c0_31], %75 {strides = array<i32>} : memref<400x512xbf16, #tpu.memory_space<vmem>>, vector<16x256xbf16>,
    %c0_32 = arith.constant 0 : index
    %c0_33 = arith.constant 0 : index
    %c23 = arith.constant 23 : index
    %77 = vector.load %arg1[%c0_32, %c0_33, %c23] : memref<1x16x672xbf16, #tpu.memory_space<vmem>>, vector<1x16x256xbf16>
    %78 = vector.shape_cast %77 : vector<1x16x256xbf16> to vector<16x256xbf16>
    %cst_34 = arith.constant 0.000000e+00 : bf16
    %79 = vector.broadcast %cst_34 : bf16 to vector<16x256xbf16>
    %80 = vector.shape_cast %20 : vector<1x256xi1> to vector<1x256xi1>
    %81 = vector.broadcast %80 : vector<1x256xi1> to vector<16x256xi1>
    %82 = arith.select %81, %78, %79 : vector<16x256xi1>, vector<16x256xbf16>
    %c96 = arith.constant 96 : index
    %c0_35 = arith.constant 0 : index
    %83 = vector.load %arg9[%c96, %c0_35] : memref<400x512xbf16, #tpu.memory_space<vmem>>, vector<16x256xbf16>
    tpu.vector_store %arg9[%c96, %c0_35], %82 {strides = array<i32>} : memref<400x512xbf16, #tpu.memory_space<vmem>>, vector<16x256xbf16>,
    %c0_36 = arith.constant 0 : index
    %c0_37 = arith.constant 0 : index
    %c24 = arith.constant 24 : index
    %84 = vector.load %arg1[%c0_36, %c0_37, %c24] : memref<1x16x672xbf16, #tpu.memory_space<vmem>>, vector<1x16x256xbf16>
    %85 = vector.shape_cast %84 : vector<1x16x256xbf16> to vector<16x256xbf16>
    %c112 = arith.constant 112 : index
    %c0_38 = arith.constant 0 : index
    %86 = vector.load %arg9[%c112, %c0_38] : memref<400x512xbf16, #tpu.memory_space<vmem>>, vector<16x256xbf16>
    tpu.vector_store %arg9[%c112, %c0_38], %85 {strides = array<i32>} : memref<400x512xbf16, #tpu.memory_space<vmem>>, vector<16x256xbf16>,
    %c0_39 = arith.constant 0 : index
    %c0_40 = arith.constant 0 : index
    %c25 = arith.constant 25 : index
    %87 = vector.load %arg1[%c0_39, %c0_40, %c25] : memref<1x16x672xbf16, #tpu.memory_space<vmem>>, vector<1x16x256xbf16>
    %88 = vector.shape_cast %87 : vector<1x16x256xbf16> to vector<16x256xbf16>
    %cst_41 = arith.constant 0.000000e+00 : bf16
    %89 = vector.broadcast %cst_41 : bf16 to vector<16x256xbf16>
    %90 = vector.shape_cast %29 : vector<1x256xi1> to vector<1x256xi1>
    %91 = vector.broadcast %90 : vector<1x256xi1> to vector<16x256xi1>
    %92 = arith.select %91, %88, %89 : vector<16x256xi1>, vector<16x256xbf16>
    %c128 = arith.constant 128 : index
    %c0_42 = arith.constant 0 : index
    %93 = vector.load %arg9[%c128, %c0_42] : memref<400x512xbf16, #tpu.memory_space<vmem>>, vector<16x256xbf16>
    tpu.vector_store %arg9[%c128, %c0_42], %92 {strides = array<i32>} : memref<400x512xbf16, #tpu.memory_space<vmem>>, vector<16x256xbf16>,
    %c0_43 = arith.constant 0 : index
    %c0_44 = arith.constant 0 : index
    %c26 = arith.constant 26 : index
    %94 = vector.load %arg1[%c0_43, %c0_44, %c26] : memref<1x16x672xbf16, #tpu.memory_space<vmem>>, vector<1x16x256xbf16>
    %95 = vector.shape_cast %94 : vector<1x16x256xbf16> to vector<16x256xbf16>
    %cst_45 = arith.constant 0.000000e+00 : bf16
    %96 = vector.broadcast %cst_45 : bf16 to vector<16x256xbf16>
    %97 = vector.shape_cast %38 : vector<1x256xi1> to vector<1x256xi1>
    %98 = vector.broadcast %97 : vector<1x256xi1> to vector<16x256xi1>
    %99 = arith.select %98, %95, %96 : vector<16x256xi1>, vector<16x256xbf16>
    %c144 = arith.constant 144 : index
    %c0_46 = arith.constant 0 : index
    %100 = vector.load %arg9[%c144, %c0_46] : memref<400x512xbf16, #tpu.memory_space<vmem>>, vector<16x256xbf16>
    tpu.vector_store %arg9[%c144, %c0_46], %99 {strides = array<i32>} : memref<400x512xbf16, #tpu.memory_space<vmem>>, vector<16x256xbf16>,
    %c0_47 = arith.constant 0 : index
    %c0_48 = arith.constant 0 : index
    %c38 = arith.constant 38 : index
    %101 = vector.load %arg1[%c0_47, %c0_48, %c38] : memref<1x16x672xbf16, #tpu.memory_space<vmem>>, vector<1x16x256xbf16>
    %102 = vector.shape_cast %101 : vector<1x16x256xbf16> to vector<16x256xbf16>
    %cst_49 = arith.constant 0.000000e+00 : bf16
    %103 = vector.broadcast %cst_49 : bf16 to vector<16x256xbf16>
    %104 = vector.shape_cast %11 : vector<1x256xi1> to vector<1x256xi1>
    %105 = vector.broadcast %104 : vector<1x256xi1> to vector<16x256xi1>
    %106 = arith.select %105, %102, %103 : vector<16x256xi1>, vector<16x256xbf16>
    %c160 = arith.constant 160 : index
    %c0_50 = arith.constant 0 : index
    %107 = vector.load %arg9[%c160, %c0_50] : memref<400x512xbf16, #tpu.memory_space<vmem>>, vector<16x256xbf16>
    tpu.vector_store %arg9[%c160, %c0_50], %106 {strides = array<i32>} : memref<400x512xbf16, #tpu.memory_space<vmem>>, vector<16x256xbf16>,
    %c0_51 = arith.constant 0 : index
    %c0_52 = arith.constant 0 : index
    %c39 = arith.constant 39 : index
    %108 = vector.load %arg1[%c0_51, %c0_52, %c39] : memref<1x16x672xbf16, #tpu.memory_space<vmem>>, vector<1x16x256xbf16>
    %109 = vector.shape_cast %108 : vector<1x16x256xbf16> to vector<16x256xbf16>
    %cst_53 = arith.constant 0.000000e+00 : bf16
    %110 = vector.broadcast %cst_53 : bf16 to vector<16x256xbf16>
    %111 = vector.shape_cast %20 : vector<1x256xi1> to vector<1x256xi1>
    %112 = vector.broadcast %111 : vector<1x256xi1> to vector<16x256xi1>
    %113 = arith.select %112, %109, %110 : vector<16x256xi1>, vector<16x256xbf16>
    %c176 = arith.constant 176 : index
    %c0_54 = arith.constant 0 : index
    %114 = vector.load %arg9[%c176, %c0_54] : memref<400x512xbf16, #tpu.memory_space<vmem>>, vector<16x256xbf16>
    tpu.vector_store %arg9[%c176, %c0_54], %113 {strides = array<i32>} : memref<400x512xbf16, #tpu.memory_space<vmem>>, vector<16x256xbf16>,
    %c0_55 = arith.constant 0 : index
    %c0_56 = arith.constant 0 : index
    %c40 = arith.constant 40 : index
    %115 = vector.load %arg1[%c0_55, %c0_56, %c40] : memref<1x16x672xbf16, #tpu.memory_space<vmem>>, vector<1x16x256xbf16>
    %116 = vector.shape_cast %115 : vector<1x16x256xbf16> to vector<16x256xbf16>
    %c192 = arith.constant 192 : index
    %c0_57 = arith.constant 0 : index
    %117 = vector.load %arg9[%c192, %c0_57] : memref<400x512xbf16, #tpu.memory_space<vmem>>, vector<16x256xbf16>
    tpu.vector_store %arg9[%c192, %c0_57], %116 {strides = array<i32>} : memref<400x512xbf16, #tpu.memory_space<vmem>>, vector<16x256xbf16>,
    %c0_58 = arith.constant 0 : index
    %c0_59 = arith.constant 0 : index
    %c41 = arith.constant 41 : index
    %118 = vector.load %arg1[%c0_58, %c0_59, %c41] : memref<1x16x672xbf16, #tpu.memory_space<vmem>>, vector<1x16x256xbf16>
    %119 = vector.shape_cast %118 : vector<1x16x256xbf16> to vector<16x256xbf16>
    %cst_60 = arith.constant 0.000000e+00 : bf16
    %120 = vector.broadcast %cst_60 : bf16 to vector<16x256xbf16>
    %121 = vector.shape_cast %29 : vector<1x256xi1> to vector<1x256xi1>
    %122 = vector.broadcast %121 : vector<1x256xi1> to vector<16x256xi1>
    %123 = arith.select %122, %119, %120 : vector<16x256xi1>, vector<16x256xbf16>
    %c208 = arith.constant 208 : index
    %c0_61 = arith.constant 0 : index
    %124 = vector.load %arg9[%c208, %c0_61] : memref<400x512xbf16, #tpu.memory_space<vmem>>, vector<16x256xbf16>
    tpu.vector_store %arg9[%c208, %c0_61], %123 {strides = array<i32>} : memref<400x512xbf16, #tpu.memory_space<vmem>>, vector<16x256xbf16>,
    %c0_62 = arith.constant 0 : index
    %c0_63 = arith.constant 0 : index
    %c42 = arith.constant 42 : index
    %125 = vector.load %arg1[%c0_62, %c0_63, %c42] : memref<1x16x672xbf16, #tpu.memory_space<vmem>>, vector<1x16x256xbf16>
    %126 = vector.shape_cast %125 : vector<1x16x256xbf16> to vector<16x256xbf16>
    %cst_64 = arith.constant 0.000000e+00 : bf16
    %127 = vector.broadcast %cst_64 : bf16 to vector<16x256xbf16>
    %128 = vector.shape_cast %38 : vector<1x256xi1> to vector<1x256xi1>
    %129 = vector.broadcast %128 : vector<1x256xi1> to vector<16x256xi1>
    %130 = arith.select %129, %126, %127 : vector<16x256xi1>, vector<16x256xbf16>
    %c224 = arith.constant 224 : index
    %c0_65 = arith.constant 0 : index
    %131 = vector.load %arg9[%c224, %c0_65] : memref<400x512xbf16, #tpu.memory_space<vmem>>, vector<16x256xbf16>
    tpu.vector_store %arg9[%c224, %c0_65], %130 {strides = array<i32>} : memref<400x512xbf16, #tpu.memory_space<vmem>>, vector<16x256xbf16>,
    %c0_66 = arith.constant 0 : index
    %c0_67 = arith.constant 0 : index
    %c54 = arith.constant 54 : index
    %132 = vector.load %arg1[%c0_66, %c0_67, %c54] : memref<1x16x672xbf16, #tpu.memory_space<vmem>>, vector<1x16x256xbf16>
    %133 = vector.shape_cast %132 : vector<1x16x256xbf16> to vector<16x256xbf16>
    %cst_68 = arith.constant 0.000000e+00 : bf16
    %134 = vector.broadcast %cst_68 : bf16 to vector<16x256xbf16>
    %135 = vector.shape_cast %11 : vector<1x256xi1> to vector<1x256xi1>
    %136 = vector.broadcast %135 : vector<1x256xi1> to vector<16x256xi1>
    %137 = arith.select %136, %133, %134 : vector<16x256xi1>, vector<16x256xbf16>
    %c240 = arith.constant 240 : index
    %c0_69 = arith.constant 0 : index
    %138 = vector.load %arg9[%c240, %c0_69] : memref<400x512xbf16, #tpu.memory_space<vmem>>, vector<16x256xbf16>
    tpu.vector_store %arg9[%c240, %c0_69], %137 {strides = array<i32>} : memref<400x512xbf16, #tpu.memory_space<vmem>>, vector<16x256xbf16>,
    %c0_70 = arith.constant 0 : index
    %c0_71 = arith.constant 0 : index
    %c55 = arith.constant 55 : index
    %139 = vector.load %arg1[%c0_70, %c0_71, %c55] : memref<1x16x672xbf16, #tpu.memory_space<vmem>>, vector<1x16x256xbf16>
    %140 = vector.shape_cast %139 : vector<1x16x256xbf16> to vector<16x256xbf16>
    %cst_72 = arith.constant 0.000000e+00 : bf16
    %141 = vector.broadcast %cst_72 : bf16 to vector<16x256xbf16>
    %142 = vector.shape_cast %20 : vector<1x256xi1> to vector<1x256xi1>
    %143 = vector.broadcast %142 : vector<1x256xi1> to vector<16x256xi1>
    %144 = arith.select %143, %140, %141 : vector<16x256xi1>, vector<16x256xbf16>
    %c256 = arith.constant 256 : index
    %c0_73 = arith.constant 0 : index
    %145 = vector.load %arg9[%c256, %c0_73] : memref<400x512xbf16, #tpu.memory_space<vmem>>, vector<16x256xbf16>
    tpu.vector_store %arg9[%c256, %c0_73], %144 {strides = array<i32>} : memref<400x512xbf16, #tpu.memory_space<vmem>>, vector<16x256xbf16>,
    %c0_74 = arith.constant 0 : index
    %c0_75 = arith.constant 0 : index
    %c56 = arith.constant 56 : index
    %146 = vector.load %arg1[%c0_74, %c0_75, %c56] : memref<1x16x672xbf16, #tpu.memory_space<vmem>>, vector<1x16x256xbf16>
    %147 = vector.shape_cast %146 : vector<1x16x256xbf16> to vector<16x256xbf16>
    %c272 = arith.constant 272 : index
    %c0_76 = arith.constant 0 : index
    %148 = vector.load %arg9[%c272, %c0_76] : memref<400x512xbf16, #tpu.memory_space<vmem>>, vector<16x256xbf16>
    tpu.vector_store %arg9[%c272, %c0_76], %147 {strides = array<i32>} : memref<400x512xbf16, #tpu.memory_space<vmem>>, vector<16x256xbf16>,
    %c0_77 = arith.constant 0 : index
    %c0_78 = arith.constant 0 : index
    %c57 = arith.constant 57 : index
    %149 = vector.load %arg1[%c0_77, %c0_78, %c57] : memref<1x16x672xbf16, #tpu.memory_space<vmem>>, vector<1x16x256xbf16>
    %150 = vector.shape_cast %149 : vector<1x16x256xbf16> to vector<16x256xbf16>
    %cst_79 = arith.constant 0.000000e+00 : bf16
    %151 = vector.broadcast %cst_79 : bf16 to vector<16x256xbf16>
    %152 = vector.shape_cast %29 : vector<1x256xi1> to vector<1x256xi1>
    %153 = vector.broadcast %152 : vector<1x256xi1> to vector<16x256xi1>
    %154 = arith.select %153, %150, %151 : vector<16x256xi1>, vector<16x256xbf16>
    %c288 = arith.constant 288 : index
    %c0_80 = arith.constant 0 : index
    %155 = vector.load %arg9[%c288, %c0_80] : memref<400x512xbf16, #tpu.memory_space<vmem>>, vector<16x256xbf16>
    tpu.vector_store %arg9[%c288, %c0_80], %154 {strides = array<i32>} : memref<400x512xbf16, #tpu.memory_space<vmem>>, vector<16x256xbf16>,
    %c0_81 = arith.constant 0 : index
    %c0_82 = arith.constant 0 : index
    %c58 = arith.constant 58 : index
    %156 = vector.load %arg1[%c0_81, %c0_82, %c58] : memref<1x16x672xbf16, #tpu.memory_space<vmem>>, vector<1x16x256xbf16>
    %157 = vector.shape_cast %156 : vector<1x16x256xbf16> to vector<16x256xbf16>
    %cst_83 = arith.constant 0.000000e+00 : bf16
    %158 = vector.broadcast %cst_83 : bf16 to vector<16x256xbf16>
    %159 = vector.shape_cast %38 : vector<1x256xi1> to vector<1x256xi1>
    %160 = vector.broadcast %159 : vector<1x256xi1> to vector<16x256xi1>
    %161 = arith.select %160, %157, %158 : vector<16x256xi1>, vector<16x256xbf16>
    %c304 = arith.constant 304 : index
    %c0_84 = arith.constant 0 : index
    %162 = vector.load %arg9[%c304, %c0_84] : memref<400x512xbf16, #tpu.memory_space<vmem>>, vector<16x256xbf16>
    tpu.vector_store %arg9[%c304, %c0_84], %161 {strides = array<i32>} : memref<400x512xbf16, #tpu.memory_space<vmem>>, vector<16x256xbf16>,
    %c0_85 = arith.constant 0 : index
    %c0_86 = arith.constant 0 : index
    %c70 = arith.constant 70 : index
    %163 = vector.load %arg1[%c0_85, %c0_86, %c70] : memref<1x16x672xbf16, #tpu.memory_space<vmem>>, vector<1x16x256xbf16>
    %164 = vector.shape_cast %163 : vector<1x16x256xbf16> to vector<16x256xbf16>
    %cst_87 = arith.constant 0.000000e+00 : bf16
    %165 = vector.broadcast %cst_87 : bf16 to vector<16x256xbf16>
    %166 = vector.shape_cast %11 : vector<1x256xi1> to vector<1x256xi1>
    %167 = vector.broadcast %166 : vector<1x256xi1> to vector<16x256xi1>
    %168 = arith.select %167, %164, %165 : vector<16x256xi1>, vector<16x256xbf16>
    %c320 = arith.constant 320 : index
    %c0_88 = arith.constant 0 : index
    %169 = vector.load %arg9[%c320, %c0_88] : memref<400x512xbf16, #tpu.memory_space<vmem>>, vector<16x256xbf16>
    tpu.vector_store %arg9[%c320, %c0_88], %168 {strides = array<i32>} : memref<400x512xbf16, #tpu.memory_space<vmem>>, vector<16x256xbf16>,
    %c0_89 = arith.constant 0 : index
    %c0_90 = arith.constant 0 : index
    %c71 = arith.constant 71 : index
    %170 = vector.load %arg1[%c0_89, %c0_90, %c71] : memref<1x16x672xbf16, #tpu.memory_space<vmem>>, vector<1x16x256xbf16>
    %171 = vector.shape_cast %170 : vector<1x16x256xbf16> to vector<16x256xbf16>
    %cst_91 = arith.constant 0.000000e+00 : bf16
    %172 = vector.broadcast %cst_91 : bf16 to vector<16x256xbf16>
    %173 = vector.shape_cast %20 : vector<1x256xi1> to vector<1x256xi1>
    %174 = vector.broadcast %173 : vector<1x256xi1> to vector<16x256xi1>
    %175 = arith.select %174, %171, %172 : vector<16x256xi1>, vector<16x256xbf16>
    %c336 = arith.constant 336 : index
    %c0_92 = arith.constant 0 : index
    %176 = vector.load %arg9[%c336, %c0_92] : memref<400x512xbf16, #tpu.memory_space<vmem>>, vector<16x256xbf16>
    tpu.vector_store %arg9[%c336, %c0_92], %175 {strides = array<i32>} : memref<400x512xbf16, #tpu.memory_space<vmem>>, vector<16x256xbf16>,
    %c0_93 = arith.constant 0 : index
    %c0_94 = arith.constant 0 : index
    %c72 = arith.constant 72 : index
    %177 = vector.load %arg1[%c0_93, %c0_94, %c72] : memref<1x16x672xbf16, #tpu.memory_space<vmem>>, vector<1x16x256xbf16>
    %178 = vector.shape_cast %177 : vector<1x16x256xbf16> to vector<16x256xbf16>
    %c352 = arith.constant 352 : index
    %c0_95 = arith.constant 0 : index
    %179 = vector.load %arg9[%c352, %c0_95] : memref<400x512xbf16, #tpu.memory_space<vmem>>, vector<16x256xbf16>
    tpu.vector_store %arg9[%c352, %c0_95], %178 {strides = array<i32>} : memref<400x512xbf16, #tpu.memory_space<vmem>>, vector<16x256xbf16>,
    %c0_96 = arith.constant 0 : index
    %c0_97 = arith.constant 0 : index
    %c73 = arith.constant 73 : index
    %180 = vector.load %arg1[%c0_96, %c0_97, %c73] : memref<1x16x672xbf16, #tpu.memory_space<vmem>>, vector<1x16x256xbf16>
    %181 = vector.shape_cast %180 : vector<1x16x256xbf16> to vector<16x256xbf16>
    %cst_98 = arith.constant 0.000000e+00 : bf16
    %182 = vector.broadcast %cst_98 : bf16 to vector<16x256xbf16>
    %183 = vector.shape_cast %29 : vector<1x256xi1> to vector<1x256xi1>
    %184 = vector.broadcast %183 : vector<1x256xi1> to vector<16x256xi1>
    %185 = arith.select %184, %181, %182 : vector<16x256xi1>, vector<16x256xbf16>
    %c368 = arith.constant 368 : index
    %c0_99 = arith.constant 0 : index
    %186 = vector.load %arg9[%c368, %c0_99] : memref<400x512xbf16, #tpu.memory_space<vmem>>, vector<16x256xbf16>
    tpu.vector_store %arg9[%c368, %c0_99], %185 {strides = array<i32>} : memref<400x512xbf16, #tpu.memory_space<vmem>>, vector<16x256xbf16>,
    %c0_100 = arith.constant 0 : index
    %c0_101 = arith.constant 0 : index
    %c74 = arith.constant 74 : index
    %187 = vector.load %arg1[%c0_100, %c0_101, %c74] : memref<1x16x672xbf16, #tpu.memory_space<vmem>>, vector<1x16x256xbf16>
    %188 = vector.shape_cast %187 : vector<1x16x256xbf16> to vector<16x256xbf16>
    %cst_102 = arith.constant 0.000000e+00 : bf16
    %189 = vector.broadcast %cst_102 : bf16 to vector<16x256xbf16>
    %190 = vector.shape_cast %38 : vector<1x256xi1> to vector<1x256xi1>
    %191 = vector.broadcast %190 : vector<1x256xi1> to vector<16x256xi1>
    %192 = arith.select %191, %188, %189 : vector<16x256xi1>, vector<16x256xbf16>
    %c384 = arith.constant 384 : index
    %c0_103 = arith.constant 0 : index
    %193 = vector.load %arg9[%c384, %c0_103] : memref<400x512xbf16, #tpu.memory_space<vmem>>, vector<16x256xbf16>
    tpu.vector_store %arg9[%c384, %c0_103], %192 {strides = array<i32>} : memref<400x512xbf16, #tpu.memory_space<vmem>>, vector<16x256xbf16>,
    %c0_104 = arith.constant 0 : index
    %c0_105 = arith.constant 0 : index
    %c342 = arith.constant 342 : index
    %194 = vector.load %arg1[%c0_104, %c0_105, %c342] : memref<1x16x672xbf16, #tpu.memory_space<vmem>>, vector<1x16x256xbf16>
    %195 = vector.shape_cast %194 : vector<1x16x256xbf16> to vector<16x256xbf16>
    %cst_106 = arith.constant 0.000000e+00 : bf16
    %196 = vector.broadcast %cst_106 : bf16 to vector<16x256xbf16>
    %197 = vector.shape_cast %11 : vector<1x256xi1> to vector<1x256xi1>
    %198 = vector.broadcast %197 : vector<1x256xi1> to vector<16x256xi1>
    %199 = arith.select %198, %195, %196 : vector<16x256xi1>, vector<16x256xbf16>
    %c0_107 = arith.constant 0 : index
    %c256_108 = arith.constant 256 : index
    %200 = vector.load %arg9[%c0_107, %c256_108] : memref<400x512xbf16, #tpu.memory_space<vmem>>, vector<16x256xbf16>
    tpu.vector_store %arg9[%c0_107, %c256_108], %199 {strides = array<i32>} : memref<400x512xbf16, #tpu.memory_space<vmem>>, vector<16x256xbf16>,
    %c0_109 = arith.constant 0 : index
    %c0_110 = arith.constant 0 : index
    %c343 = arith.constant 343 : index
    %201 = vector.load %arg1[%c0_109, %c0_110, %c343] : memref<1x16x672xbf16, #tpu.memory_space<vmem>>, vector<1x16x256xbf16>
    %202 = vector.shape_cast %201 : vector<1x16x256xbf16> to vector<16x256xbf16>
    %cst_111 = arith.constant 0.000000e+00 : bf16
    %203 = vector.broadcast %cst_111 : bf16 to vector<16x256xbf16>
    %204 = vector.shape_cast %20 : vector<1x256xi1> to vector<1x256xi1>
    %205 = vector.broadcast %204 : vector<1x256xi1> to vector<16x256xi1>
    %206 = arith.select %205, %202, %203 : vector<16x256xi1>, vector<16x256xbf16>
    %c16_112 = arith.constant 16 : index
    %c256_113 = arith.constant 256 : index
    %207 = vector.load %arg9[%c16_112, %c256_113] : memref<400x512xbf16, #tpu.memory_space<vmem>>, vector<16x256xbf16>
    tpu.vector_store %arg9[%c16_112, %c256_113], %206 {strides = array<i32>} : memref<400x512xbf16, #tpu.memory_space<vmem>>, vector<16x256xbf16>,
    %c0_114 = arith.constant 0 : index
    %c0_115 = arith.constant 0 : index
    %c344 = arith.constant 344 : index
    %208 = vector.load %arg1[%c0_114, %c0_115, %c344] : memref<1x16x672xbf16, #tpu.memory_space<vmem>>, vector<1x16x256xbf16>
    %209 = vector.shape_cast %208 : vector<1x16x256xbf16> to vector<16x256xbf16>
    %c32_116 = arith.constant 32 : index
    %c256_117 = arith.constant 256 : index
    %210 = vector.load %arg9[%c32_116, %c256_117] : memref<400x512xbf16, #tpu.memory_space<vmem>>, vector<16x256xbf16>
    tpu.vector_store %arg9[%c32_116, %c256_117], %209 {strides = array<i32>} : memref<400x512xbf16, #tpu.memory_space<vmem>>, vector<16x256xbf16>,
    %c0_118 = arith.constant 0 : index
    %c0_119 = arith.constant 0 : index
    %c345 = arith.constant 345 : index
    %211 = vector.load %arg1[%c0_118, %c0_119, %c345] : memref<1x16x672xbf16, #tpu.memory_space<vmem>>, vector<1x16x256xbf16>
    %212 = vector.shape_cast %211 : vector<1x16x256xbf16> to vector<16x256xbf16>
    %cst_120 = arith.constant 0.000000e+00 : bf16
    %213 = vector.broadcast %cst_120 : bf16 to vector<16x256xbf16>
    %214 = vector.shape_cast %29 : vector<1x256xi1> to vector<1x256xi1>
    %215 = vector.broadcast %214 : vector<1x256xi1> to vector<16x256xi1>
    %216 = arith.select %215, %212, %213 : vector<16x256xi1>, vector<16x256xbf16>
    %c48_121 = arith.constant 48 : index
    %c256_122 = arith.constant 256 : index
    %217 = vector.load %arg9[%c48_121, %c256_122] : memref<400x512xbf16, #tpu.memory_space<vmem>>, vector<16x256xbf16>
    tpu.vector_store %arg9[%c48_121, %c256_122], %216 {strides = array<i32>} : memref<400x512xbf16, #tpu.memory_space<vmem>>, vector<16x256xbf16>,
    %c0_123 = arith.constant 0 : index
    %c0_124 = arith.constant 0 : index
    %c346 = arith.constant 346 : index
    %218 = vector.load %arg1[%c0_123, %c0_124, %c346] : memref<1x16x672xbf16, #tpu.memory_space<vmem>>, vector<1x16x256xbf16>
    %219 = vector.shape_cast %218 : vector<1x16x256xbf16> to vector<16x256xbf16>
    %cst_125 = arith.constant 0.000000e+00 : bf16
    %220 = vector.broadcast %cst_125 : bf16 to vector<16x256xbf16>
    %221 = vector.shape_cast %38 : vector<1x256xi1> to vector<1x256xi1>
    %222 = vector.broadcast %221 : vector<1x256xi1> to vector<16x256xi1>
    %223 = arith.select %222, %219, %220 : vector<16x256xi1>, vector<16x256xbf16>
    %c64_126 = arith.constant 64 : index
    %c256_127 = arith.constant 256 : index
    %224 = vector.load %arg9[%c64_126, %c256_127] : memref<400x512xbf16, #tpu.memory_space<vmem>>, vector<16x256xbf16>
    tpu.vector_store %arg9[%c64_126, %c256_127], %223 {strides = array<i32>} : memref<400x512xbf16, #tpu.memory_space<vmem>>, vector<16x256xbf16>,
    %c0_128 = arith.constant 0 : index
    %c0_129 = arith.constant 0 : index
    %c358 = arith.constant 358 : index
    %225 = vector.load %arg1[%c0_128, %c0_129, %c358] : memref<1x16x672xbf16, #tpu.memory_space<vmem>>, vector<1x16x256xbf16>
    %226 = vector.shape_cast %225 : vector<1x16x256xbf16> to vector<16x256xbf16>
    %cst_130 = arith.constant 0.000000e+00 : bf16
    %227 = vector.broadcast %cst_130 : bf16 to vector<16x256xbf16>
    %228 = vector.shape_cast %11 : vector<1x256xi1> to vector<1x256xi1>
    %229 = vector.broadcast %228 : vector<1x256xi1> to vector<16x256xi1>
    %230 = arith.select %229, %226, %227 : vector<16x256xi1>, vector<16x256xbf16>
    %c80_131 = arith.constant 80 : index
    %c256_132 = arith.constant 256 : index
    %231 = vector.load %arg9[%c80_131, %c256_132] : memref<400x512xbf16, #tpu.memory_space<vmem>>, vector<16x256xbf16>
    tpu.vector_store %arg9[%c80_131, %c256_132], %230 {strides = array<i32>} : memref<400x512xbf16, #tpu.memory_space<vmem>>, vector<16x256xbf16>,
    %c0_133 = arith.constant 0 : index
    %c0_134 = arith.constant 0 : index
    %c359 = arith.constant 359 : index
    %232 = vector.load %arg1[%c0_133, %c0_134, %c359] : memref<1x16x672xbf16, #tpu.memory_space<vmem>>, vector<1x16x256xbf16>
    %233 = vector.shape_cast %232 : vector<1x16x256xbf16> to vector<16x256xbf16>
    %cst_135 = arith.constant 0.000000e+00 : bf16
    %234 = vector.broadcast %cst_135 : bf16 to vector<16x256xbf16>
    %235 = vector.shape_cast %20 : vector<1x256xi1> to vector<1x256xi1>
    %236 = vector.broadcast %235 : vector<1x256xi1> to vector<16x256xi1>
    %237 = arith.select %236, %233, %234 : vector<16x256xi1>, vector<16x256xbf16>
    %c96_136 = arith.constant 96 : index
    %c256_137 = arith.constant 256 : index
    %238 = vector.load %arg9[%c96_136, %c256_137] : memref<400x512xbf16, #tpu.memory_space<vmem>>, vector<16x256xbf16>
    tpu.vector_store %arg9[%c96_136, %c256_137], %237 {strides = array<i32>} : memref<400x512xbf16, #tpu.memory_space<vmem>>, vector<16x256xbf16>,
    %c0_138 = arith.constant 0 : index
    %c0_139 = arith.constant 0 : index
    %c360 = arith.constant 360 : index
    %239 = vector.load %arg1[%c0_138, %c0_139, %c360] : memref<1x16x672xbf16, #tpu.memory_space<vmem>>, vector<1x16x256xbf16>
    %240 = vector.shape_cast %239 : vector<1x16x256xbf16> to vector<16x256xbf16>
    %c112_140 = arith.constant 112 : index
    %c256_141 = arith.constant 256 : index
    %241 = vector.load %arg9[%c112_140, %c256_141] : memref<400x512xbf16, #tpu.memory_space<vmem>>, vector<16x256xbf16>
    tpu.vector_store %arg9[%c112_140, %c256_141], %240 {strides = array<i32>} : memref<400x512xbf16, #tpu.memory_space<vmem>>, vector<16x256xbf16>,
    %c0_142 = arith.constant 0 : index
    %c0_143 = arith.constant 0 : index
    %c361 = arith.constant 361 : index
    %242 = vector.load %arg1[%c0_142, %c0_143, %c361] : memref<1x16x672xbf16, #tpu.memory_space<vmem>>, vector<1x16x256xbf16>
    %243 = vector.shape_cast %242 : vector<1x16x256xbf16> to vector<16x256xbf16>
    %cst_144 = arith.constant 0.000000e+00 : bf16
    %244 = vector.broadcast %cst_144 : bf16 to vector<16x256xbf16>
    %245 = vector.shape_cast %29 : vector<1x256xi1> to vector<1x256xi1>
    %246 = vector.broadcast %245 : vector<1x256xi1> to vector<16x256xi1>
    %247 = arith.select %246, %243, %244 : vector<16x256xi1>, vector<16x256xbf16>
    %c128_145 = arith.constant 128 : index
    %c256_146 = arith.constant 256 : index
    %248 = vector.load %arg9[%c128_145, %c256_146] : memref<400x512xbf16, #tpu.memory_space<vmem>>, vector<16x256xbf16>
    tpu.vector_store %arg9[%c128_145, %c256_146], %247 {strides = array<i32>} : memref<400x512xbf16, #tpu.memory_space<vmem>>, vector<16x256xbf16>,
    %c0_147 = arith.constant 0 : index
    %c0_148 = arith.constant 0 : index
    %c362 = arith.constant 362 : index
    %249 = vector.load %arg1[%c0_147, %c0_148, %c362] : memref<1x16x672xbf16, #tpu.memory_space<vmem>>, vector<1x16x256xbf16>
    %250 = vector.shape_cast %249 : vector<1x16x256xbf16> to vector<16x256xbf16>
    %cst_149 = arith.constant 0.000000e+00 : bf16
    %251 = vector.broadcast %cst_149 : bf16 to vector<16x256xbf16>
    %252 = vector.shape_cast %38 : vector<1x256xi1> to vector<1x256xi1>
    %253 = vector.broadcast %252 : vector<1x256xi1> to vector<16x256xi1>
    %254 = arith.select %253, %250, %251 : vector<16x256xi1>, vector<16x256xbf16>
    %c144_150 = arith.constant 144 : index
    %c256_151 = arith.constant 256 : index
    %255 = vector.load %arg9[%c144_150, %c256_151] : memref<400x512xbf16, #tpu.memory_space<vmem>>, vector<16x256xbf16>
    tpu.vector_store %arg9[%c144_150, %c256_151], %254 {strides = array<i32>} : memref<400x512xbf16, #tpu.memory_space<vmem>>, vector<16x256xbf16>,
    %c0_152 = arith.constant 0 : index
    %c0_153 = arith.constant 0 : index
    %c374 = arith.constant 374 : index
    %256 = vector.load %arg1[%c0_152, %c0_153, %c374] : memref<1x16x672xbf16, #tpu.memory_space<vmem>>, vector<1x16x256xbf16>
    %257 = vector.shape_cast %256 : vector<1x16x256xbf16> to vector<16x256xbf16>
    %cst_154 = arith.constant 0.000000e+00 : bf16
    %258 = vector.broadcast %cst_154 : bf16 to vector<16x256xbf16>
    %259 = vector.shape_cast %11 : vector<1x256xi1> to vector<1x256xi1>
    %260 = vector.broadcast %259 : vector<1x256xi1> to vector<16x256xi1>
    %261 = arith.select %260, %257, %258 : vector<16x256xi1>, vector<16x256xbf16>
    %c160_155 = arith.constant 160 : index
    %c256_156 = arith.constant 256 : index
    %262 = vector.load %arg9[%c160_155, %c256_156] : memref<400x512xbf16, #tpu.memory_space<vmem>>, vector<16x256xbf16>
    tpu.vector_store %arg9[%c160_155, %c256_156], %261 {strides = array<i32>} : memref<400x512xbf16, #tpu.memory_space<vmem>>, vector<16x256xbf16>,
    %c0_157 = arith.constant 0 : index
    %c0_158 = arith.constant 0 : index
    %c375 = arith.constant 375 : index
    %263 = vector.load %arg1[%c0_157, %c0_158, %c375] : memref<1x16x672xbf16, #tpu.memory_space<vmem>>, vector<1x16x256xbf16>
    %264 = vector.shape_cast %263 : vector<1x16x256xbf16> to vector<16x256xbf16>
    %cst_159 = arith.constant 0.000000e+00 : bf16
    %265 = vector.broadcast %cst_159 : bf16 to vector<16x256xbf16>
    %266 = vector.shape_cast %20 : vector<1x256xi1> to vector<1x256xi1>
    %267 = vector.broadcast %266 : vector<1x256xi1> to vector<16x256xi1>
    %268 = arith.select %267, %264, %265 : vector<16x256xi1>, vector<16x256xbf16>
    %c176_160 = arith.constant 176 : index
    %c256_161 = arith.constant 256 : index
    %269 = vector.load %arg9[%c176_160, %c256_161] : memref<400x512xbf16, #tpu.memory_space<vmem>>, vector<16x256xbf16>
    tpu.vector_store %arg9[%c176_160, %c256_161], %268 {strides = array<i32>} : memref<400x512xbf16, #tpu.memory_space<vmem>>, vector<16x256xbf16>,
    %c0_162 = arith.constant 0 : index
    %c0_163 = arith.constant 0 : index
    %c376 = arith.constant 376 : index
    %270 = vector.load %arg1[%c0_162, %c0_163, %c376] : memref<1x16x672xbf16, #tpu.memory_space<vmem>>, vector<1x16x256xbf16>
    %271 = vector.shape_cast %270 : vector<1x16x256xbf16> to vector<16x256xbf16>
    %c192_164 = arith.constant 192 : index
    %c256_165 = arith.constant 256 : index
    %272 = vector.load %arg9[%c192_164, %c256_165] : memref<400x512xbf16, #tpu.memory_space<vmem>>, vector<16x256xbf16>
    tpu.vector_store %arg9[%c192_164, %c256_165], %271 {strides = array<i32>} : memref<400x512xbf16, #tpu.memory_space<vmem>>, vector<16x256xbf16>,
    %c0_166 = arith.constant 0 : index
    %c0_167 = arith.constant 0 : index
    %c377 = arith.constant 377 : index
    %273 = vector.load %arg1[%c0_166, %c0_167, %c377] : memref<1x16x672xbf16, #tpu.memory_space<vmem>>, vector<1x16x256xbf16>
    %274 = vector.shape_cast %273 : vector<1x16x256xbf16> to vector<16x256xbf16>
    %cst_168 = arith.constant 0.000000e+00 : bf16
    %275 = vector.broadcast %cst_168 : bf16 to vector<16x256xbf16>
    %276 = vector.shape_cast %29 : vector<1x256xi1> to vector<1x256xi1>
    %277 = vector.broadcast %276 : vector<1x256xi1> to vector<16x256xi1>
    %278 = arith.select %277, %274, %275 : vector<16x256xi1>, vector<16x256xbf16>
    %c208_169 = arith.constant 208 : index
    %c256_170 = arith.constant 256 : index
    %279 = vector.load %arg9[%c208_169, %c256_170] : memref<400x512xbf16, #tpu.memory_space<vmem>>, vector<16x256xbf16>
    tpu.vector_store %arg9[%c208_169, %c256_170], %278 {strides = array<i32>} : memref<400x512xbf16, #tpu.memory_space<vmem>>, vector<16x256xbf16>,
    %c0_171 = arith.constant 0 : index
    %c0_172 = arith.constant 0 : index
    %c378 = arith.constant 378 : index
    %280 = vector.load %arg1[%c0_171, %c0_172, %c378] : memref<1x16x672xbf16, #tpu.memory_space<vmem>>, vector<1x16x256xbf16>
    %281 = vector.shape_cast %280 : vector<1x16x256xbf16> to vector<16x256xbf16>
    %cst_173 = arith.constant 0.000000e+00 : bf16
    %282 = vector.broadcast %cst_173 : bf16 to vector<16x256xbf16>
    %283 = vector.shape_cast %38 : vector<1x256xi1> to vector<1x256xi1>
    %284 = vector.broadcast %283 : vector<1x256xi1> to vector<16x256xi1>
    %285 = arith.select %284, %281, %282 : vector<16x256xi1>, vector<16x256xbf16>
    %c224_174 = arith.constant 224 : index
    %c256_175 = arith.constant 256 : index
    %286 = vector.load %arg9[%c224_174, %c256_175] : memref<400x512xbf16, #tpu.memory_space<vmem>>, vector<16x256xbf16>
    tpu.vector_store %arg9[%c224_174, %c256_175], %285 {strides = array<i32>} : memref<400x512xbf16, #tpu.memory_space<vmem>>, vector<16x256xbf16>,
    %c0_176 = arith.constant 0 : index
    %c0_177 = arith.constant 0 : index
    %c390 = arith.constant 390 : index
    %287 = vector.load %arg1[%c0_176, %c0_177, %c390] : memref<1x16x672xbf16, #tpu.memory_space<vmem>>, vector<1x16x256xbf16>
    %288 = vector.shape_cast %287 : vector<1x16x256xbf16> to vector<16x256xbf16>
    %cst_178 = arith.constant 0.000000e+00 : bf16
    %289 = vector.broadcast %cst_178 : bf16 to vector<16x256xbf16>
    %290 = vector.shape_cast %11 : vector<1x256xi1> to vector<1x256xi1>
    %291 = vector.broadcast %290 : vector<1x256xi1> to vector<16x256xi1>
    %292 = arith.select %291, %288, %289 : vector<16x256xi1>, vector<16x256xbf16>
    %c240_179 = arith.constant 240 : index
    %c256_180 = arith.constant 256 : index
    %293 = vector.load %arg9[%c240_179, %c256_180] : memref<400x512xbf16, #tpu.memory_space<vmem>>, vector<16x256xbf16>
    tpu.vector_store %arg9[%c240_179, %c256_180], %292 {strides = array<i32>} : memref<400x512xbf16, #tpu.memory_space<vmem>>, vector<16x256xbf16>,
    %c0_181 = arith.constant 0 : index
    %c0_182 = arith.constant 0 : index
    %c391 = arith.constant 391 : index
    %294 = vector.load %arg1[%c0_181, %c0_182, %c391] : memref<1x16x672xbf16, #tpu.memory_space<vmem>>, vector<1x16x256xbf16>
    %295 = vector.shape_cast %294 : vector<1x16x256xbf16> to vector<16x256xbf16>
    %cst_183 = arith.constant 0.000000e+00 : bf16
    %296 = vector.broadcast %cst_183 : bf16 to vector<16x256xbf16>
    %297 = vector.shape_cast %20 : vector<1x256xi1> to vector<1x256xi1>
    %298 = vector.broadcast %297 : vector<1x256xi1> to vector<16x256xi1>
    %299 = arith.select %298, %295, %296 : vector<16x256xi1>, vector<16x256xbf16>
    %c256_184 = arith.constant 256 : index
    %c256_185 = arith.constant 256 : index
    %300 = vector.load %arg9[%c256_184, %c256_185] : memref<400x512xbf16, #tpu.memory_space<vmem>>, vector<16x256xbf16>
    tpu.vector_store %arg9[%c256_184, %c256_185], %299 {strides = array<i32>} : memref<400x512xbf16, #tpu.memory_space<vmem>>, vector<16x256xbf16>,
    %c0_186 = arith.constant 0 : index
    %c0_187 = arith.constant 0 : index
    %c392 = arith.constant 392 : index
    %301 = vector.load %arg1[%c0_186, %c0_187, %c392] : memref<1x16x672xbf16, #tpu.memory_space<vmem>>, vector<1x16x256xbf16>
    %302 = vector.shape_cast %301 : vector<1x16x256xbf16> to vector<16x256xbf16>
    %c272_188 = arith.constant 272 : index
    %c256_189 = arith.constant 256 : index
    %303 = vector.load %arg9[%c272_188, %c256_189] : memref<400x512xbf16, #tpu.memory_space<vmem>>, vector<16x256xbf16>
    tpu.vector_store %arg9[%c272_188, %c256_189], %302 {strides = array<i32>} : memref<400x512xbf16, #tpu.memory_space<vmem>>, vector<16x256xbf16>,
    %c0_190 = arith.constant 0 : index
    %c0_191 = arith.constant 0 : index
    %c393 = arith.constant 393 : index
    %304 = vector.load %arg1[%c0_190, %c0_191, %c393] : memref<1x16x672xbf16, #tpu.memory_space<vmem>>, vector<1x16x256xbf16>
    %305 = vector.shape_cast %304 : vector<1x16x256xbf16> to vector<16x256xbf16>
    %cst_192 = arith.constant 0.000000e+00 : bf16
    %306 = vector.broadcast %cst_192 : bf16 to vector<16x256xbf16>
    %307 = vector.shape_cast %29 : vector<1x256xi1> to vector<1x256xi1>
    %308 = vector.broadcast %307 : vector<1x256xi1> to vector<16x256xi1>
    %309 = arith.select %308, %305, %306 : vector<16x256xi1>, vector<16x256xbf16>
    %c288_193 = arith.constant 288 : index
    %c256_194 = arith.constant 256 : index
    %310 = vector.load %arg9[%c288_193, %c256_194] : memref<400x512xbf16, #tpu.memory_space<vmem>>, vector<16x256xbf16>
    tpu.vector_store %arg9[%c288_193, %c256_194], %309 {strides = array<i32>} : memref<400x512xbf16, #tpu.memory_space<vmem>>, vector<16x256xbf16>,
    %c0_195 = arith.constant 0 : index
    %c0_196 = arith.constant 0 : index
    %c394 = arith.constant 394 : index
    %311 = vector.load %arg1[%c0_195, %c0_196, %c394] : memref<1x16x672xbf16, #tpu.memory_space<vmem>>, vector<1x16x256xbf16>
    %312 = vector.shape_cast %311 : vector<1x16x256xbf16> to vector<16x256xbf16>
    %cst_197 = arith.constant 0.000000e+00 : bf16
    %313 = vector.broadcast %cst_197 : bf16 to vector<16x256xbf16>
    %314 = vector.shape_cast %38 : vector<1x256xi1> to vector<1x256xi1>
    %315 = vector.broadcast %314 : vector<1x256xi1> to vector<16x256xi1>
    %316 = arith.select %315, %312, %313 : vector<16x256xi1>, vector<16x256xbf16>
    %c304_198 = arith.constant 304 : index
    %c256_199 = arith.constant 256 : index
    %317 = vector.load %arg9[%c304_198, %c256_199] : memref<400x512xbf16, #tpu.memory_space<vmem>>, vector<16x256xbf16>
    tpu.vector_store %arg9[%c304_198, %c256_199], %316 {strides = array<i32>} : memref<400x512xbf16, #tpu.memory_space<vmem>>, vector<16x256xbf16>,
    %c0_200 = arith.constant 0 : index
    %c0_201 = arith.constant 0 : index
    %c406 = arith.constant 406 : index
    %318 = vector.load %arg1[%c0_200, %c0_201, %c406] : memref<1x16x672xbf16, #tpu.memory_space<vmem>>, vector<1x16x256xbf16>
    %319 = vector.shape_cast %318 : vector<1x16x256xbf16> to vector<16x256xbf16>
    %cst_202 = arith.constant 0.000000e+00 : bf16
    %320 = vector.broadcast %cst_202 : bf16 to vector<16x256xbf16>
    %321 = vector.shape_cast %11 : vector<1x256xi1> to vector<1x256xi1>
    %322 = vector.broadcast %321 : vector<1x256xi1> to vector<16x256xi1>
    %323 = arith.select %322, %319, %320 : vector<16x256xi1>, vector<16x256xbf16>
    %c320_203 = arith.constant 320 : index
    %c256_204 = arith.constant 256 : index
    %324 = vector.load %arg9[%c320_203, %c256_204] : memref<400x512xbf16, #tpu.memory_space<vmem>>, vector<16x256xbf16>
    tpu.vector_store %arg9[%c320_203, %c256_204], %323 {strides = array<i32>} : memref<400x512xbf16, #tpu.memory_space<vmem>>, vector<16x256xbf16>,
    %c0_205 = arith.constant 0 : index
    %c0_206 = arith.constant 0 : index
    %c407 = arith.constant 407 : index
    %325 = vector.load %arg1[%c0_205, %c0_206, %c407] : memref<1x16x672xbf16, #tpu.memory_space<vmem>>, vector<1x16x256xbf16>
    %326 = vector.shape_cast %325 : vector<1x16x256xbf16> to vector<16x256xbf16>
    %cst_207 = arith.constant 0.000000e+00 : bf16
    %327 = vector.broadcast %cst_207 : bf16 to vector<16x256xbf16>
    %328 = vector.shape_cast %20 : vector<1x256xi1> to vector<1x256xi1>
    %329 = vector.broadcast %328 : vector<1x256xi1> to vector<16x256xi1>
    %330 = arith.select %329, %326, %327 : vector<16x256xi1>, vector<16x256xbf16>
    %c336_208 = arith.constant 336 : index
    %c256_209 = arith.constant 256 : index
    %331 = vector.load %arg9[%c336_208, %c256_209] : memref<400x512xbf16, #tpu.memory_space<vmem>>, vector<16x256xbf16>
    tpu.vector_store %arg9[%c336_208, %c256_209], %330 {strides = array<i32>} : memref<400x512xbf16, #tpu.memory_space<vmem>>, vector<16x256xbf16>,
    %c0_210 = arith.constant 0 : index
    %c0_211 = arith.constant 0 : index
    %c408 = arith.constant 408 : index
    %332 = vector.load %arg1[%c0_210, %c0_211, %c408] : memref<1x16x672xbf16, #tpu.memory_space<vmem>>, vector<1x16x256xbf16>
    %333 = vector.shape_cast %332 : vector<1x16x256xbf16> to vector<16x256xbf16>
    %c352_212 = arith.constant 352 : index
    %c256_213 = arith.constant 256 : index
    %334 = vector.load %arg9[%c352_212, %c256_213] : memref<400x512xbf16, #tpu.memory_space<vmem>>, vector<16x256xbf16>
    tpu.vector_store %arg9[%c352_212, %c256_213], %333 {strides = array<i32>} : memref<400x512xbf16, #tpu.memory_space<vmem>>, vector<16x256xbf16>,
    %c0_214 = arith.constant 0 : index
    %c0_215 = arith.constant 0 : index
    %c409 = arith.constant 409 : index
    %335 = vector.load %arg1[%c0_214, %c0_215, %c409] : memref<1x16x672xbf16, #tpu.memory_space<vmem>>, vector<1x16x256xbf16>
    %336 = vector.shape_cast %335 : vector<1x16x256xbf16> to vector<16x256xbf16>
    %cst_216 = arith.constant 0.000000e+00 : bf16
    %337 = vector.broadcast %cst_216 : bf16 to vector<16x256xbf16>
    %338 = vector.shape_cast %29 : vector<1x256xi1> to vector<1x256xi1>
    %339 = vector.broadcast %338 : vector<1x256xi1> to vector<16x256xi1>
    %340 = arith.select %339, %336, %337 : vector<16x256xi1>, vector<16x256xbf16>
    %c368_217 = arith.constant 368 : index
    %c256_218 = arith.constant 256 : index
    %341 = vector.load %arg9[%c368_217, %c256_218] : memref<400x512xbf16, #tpu.memory_space<vmem>>, vector<16x256xbf16>
    tpu.vector_store %arg9[%c368_217, %c256_218], %340 {strides = array<i32>} : memref<400x512xbf16, #tpu.memory_space<vmem>>, vector<16x256xbf16>,
    %c0_219 = arith.constant 0 : index
    %c0_220 = arith.constant 0 : index
    %c410 = arith.constant 410 : index
    %342 = vector.load %arg1[%c0_219, %c0_220, %c410] : memref<1x16x672xbf16, #tpu.memory_space<vmem>>, vector<1x16x256xbf16>
    %343 = vector.shape_cast %342 : vector<1x16x256xbf16> to vector<16x256xbf16>
    %cst_221 = arith.constant 0.000000e+00 : bf16
    %344 = vector.broadcast %cst_221 : bf16 to vector<16x256xbf16>
    %345 = vector.shape_cast %38 : vector<1x256xi1> to vector<1x256xi1>
    %346 = vector.broadcast %345 : vector<1x256xi1> to vector<16x256xi1>
    %347 = arith.select %346, %343, %344 : vector<16x256xi1>, vector<16x256xbf16>
    %c384_222 = arith.constant 384 : index
    %c256_223 = arith.constant 256 : index
    %348 = vector.load %arg9[%c384_222, %c256_223] : memref<400x512xbf16, #tpu.memory_space<vmem>>, vector<16x256xbf16>
    tpu.vector_store %arg9[%c384_222, %c256_223], %347 {strides = array<i32>} : memref<400x512xbf16, #tpu.memory_space<vmem>>, vector<16x256xbf16>,
    %c0_224 = arith.constant 0 : index
    %c0_225 = arith.constant 0 : index
    %349 = vector.load %arg2[%c0_224, %c0_225] : memref<32x400xbf16, #tpu.memory_space<vmem>>, vector<32x400xbf16>
    %c0_226 = arith.constant 0 : index
    %c0_227 = arith.constant 0 : index
    %350 = vector.load %arg9[%c0_226, %c0_227] : memref<400x512xbf16, #tpu.memory_space<vmem>>, vector<400x512xbf16>
    %cst_228 = arith.constant dense<0.000000e+00> : vector<32x512xf32>
    %351 = tpu.matmul %349, %350, %cst_228 {dimension_numbers = #tpu.dot_dimension_numbers<[1], [0], [0], [1], [0, 0, 1, 1], [], []>} : vector<32x400xbf16>, vector<400x512xbf16>, vector<32x512xf32> -> vector<32x512xf32>
    %c0_229 = arith.constant 0 : index
    %c0_230 = arith.constant 0 : index
    %352 = vector.load %arg3[%c0_229, %c0_230] : memref<32x1xf32, #tpu.memory_space<vmem>>, vector<32x1xf32>
    %353 = vector.broadcast %352 : vector<32x1xf32> to vector<32x512xf32>
    %354 = arith.addf %351, %353 : vector<32x512xf32>
    %cst_231 = arith.constant 0.000000e+00 : f32
    %355 = vector.broadcast %cst_231 : f32 to vector<32x512xf32>
    %356 = arith.maximumf %354, %355 : vector<32x512xf32>
    %357 = arith.truncf %356 : vector<32x512xf32> to vector<32x512xbf16>
    %cst_232 = arith.constant 0.000000e+00 : bf16
    %358 = vector.broadcast %cst_232 : bf16 to vector<32x128xbf16>
    %c0_233 = arith.constant 0 : index
    %c0_234 = arith.constant 0 : index
    %359 = vector.load %arg12[%c0_233, %c0_234] : memref<32x1024xbf16, #tpu.memory_space<vmem>>, vector<32x128xbf16>
    tpu.vector_store %arg12[%c0_233, %c0_234], %358 {strides = array<i32>} : memref<32x1024xbf16, #tpu.memory_space<vmem>>, vector<32x128xbf16>,
    %c0_235 = arith.constant 0 : index
    %c384_236 = arith.constant 384 : index
    %360 = vector.load %arg12[%c0_235, %c384_236] : memref<32x1024xbf16, #tpu.memory_space<vmem>>, vector<32x128xbf16>
    tpu.vector_store %arg12[%c0_235, %c384_236], %358 {strides = array<i32>} : memref<32x1024xbf16, #tpu.memory_space<vmem>>, vector<32x128xbf16>,
    %361 = vector.extract_strided_slice %357 {offsets = [0, 0], sizes = [32, 256], strides = [1, 1]} : vector<32x512xbf16> to vector<32x256xbf16>
    %c0_237 = arith.constant 0 : index
    %c128_238 = arith.constant 128 : index
    %362 = vector.load %arg12[%c0_237, %c128_238] : memref<32x1024xbf16, #tpu.memory_space<vmem>>, vector<32x256xbf16>
    tpu.vector_store %arg12[%c0_237, %c128_238], %361 {strides = array<i32>} : memref<32x1024xbf16, #tpu.memory_space<vmem>>, vector<32x256xbf16>,
    %c0_239 = arith.constant 0 : index
    %c512 = arith.constant 512 : index
    %363 = vector.load %arg12[%c0_239, %c512] : memref<32x1024xbf16, #tpu.memory_space<vmem>>, vector<32x128xbf16>
    tpu.vector_store %arg12[%c0_239, %c512], %358 {strides = array<i32>} : memref<32x1024xbf16, #tpu.memory_space<vmem>>, vector<32x128xbf16>,
    %c0_240 = arith.constant 0 : index
    %c896 = arith.constant 896 : index
    %364 = vector.load %arg12[%c0_240, %c896] : memref<32x1024xbf16, #tpu.memory_space<vmem>>, vector<32x128xbf16>
    tpu.vector_store %arg12[%c0_240, %c896], %358 {strides = array<i32>} : memref<32x1024xbf16, #tpu.memory_space<vmem>>, vector<32x128xbf16>,
    %365 = vector.extract_strided_slice %357 {offsets = [0, 256], sizes = [32, 256], strides = [1, 1]} : vector<32x512xbf16> to vector<32x256xbf16>
    %c0_241 = arith.constant 0 : index
    %c640 = arith.constant 640 : index
    %366 = vector.load %arg12[%c0_241, %c640] : memref<32x1024xbf16, #tpu.memory_space<vmem>>, vector<32x256xbf16>
    tpu.vector_store %arg12[%c0_241, %c640], %365 {strides = array<i32>} : memref<32x1024xbf16, #tpu.memory_space<vmem>>, vector<32x256xbf16>,
    %c0_242 = arith.constant 0 : index
    %c111 = arith.constant 111 : index
    %367 = vector.load %arg12[%c0_242, %c111] : memref<32x1024xbf16, #tpu.memory_space<vmem>>, vector<32x256xbf16>
    %cst_243 = arith.constant 0.000000e+00 : bf16
    %368 = vector.broadcast %cst_243 : bf16 to vector<32x256xbf16>
    %369 = vector.shape_cast %20 : vector<1x256xi1> to vector<1x256xi1>
    %370 = vector.broadcast %369 : vector<1x256xi1> to vector<32x256xi1>
    %371 = arith.select %370, %367, %368 : vector<32x256xi1>, vector<32x256xbf16>
    %c0_244 = arith.constant 0 : index
    %c0_245 = arith.constant 0 : index
    %372 = vector.load %arg10[%c0_244, %c0_245] : memref<288x512xbf16, #tpu.memory_space<vmem>>, vector<32x256xbf16>
    tpu.vector_store %arg10[%c0_244, %c0_245], %371 {strides = array<i32>} : memref<288x512xbf16, #tpu.memory_space<vmem>>, vector<32x256xbf16>,
    %c0_246 = arith.constant 0 : index
    %c112_247 = arith.constant 112 : index
    %373 = vector.load %arg12[%c0_246, %c112_247] : memref<32x1024xbf16, #tpu.memory_space<vmem>>, vector<32x256xbf16>
    %c32_248 = arith.constant 32 : index
    %c0_249 = arith.constant 0 : index
    %374 = vector.load %arg10[%c32_248, %c0_249] : memref<288x512xbf16, #tpu.memory_space<vmem>>, vector<32x256xbf16>
    tpu.vector_store %arg10[%c32_248, %c0_249], %373 {strides = array<i32>} : memref<288x512xbf16, #tpu.memory_space<vmem>>, vector<32x256xbf16>,
    %c0_250 = arith.constant 0 : index
    %c113 = arith.constant 113 : index
    %375 = vector.load %arg12[%c0_250, %c113] : memref<32x1024xbf16, #tpu.memory_space<vmem>>, vector<32x256xbf16>
    %cst_251 = arith.constant 0.000000e+00 : bf16
    %376 = vector.broadcast %cst_251 : bf16 to vector<32x256xbf16>
    %377 = vector.shape_cast %29 : vector<1x256xi1> to vector<1x256xi1>
    %378 = vector.broadcast %377 : vector<1x256xi1> to vector<32x256xi1>
    %379 = arith.select %378, %375, %376 : vector<32x256xi1>, vector<32x256xbf16>
    %c64_252 = arith.constant 64 : index
    %c0_253 = arith.constant 0 : index
    %380 = vector.load %arg10[%c64_252, %c0_253] : memref<288x512xbf16, #tpu.memory_space<vmem>>, vector<32x256xbf16>
    tpu.vector_store %arg10[%c64_252, %c0_253], %379 {strides = array<i32>} : memref<288x512xbf16, #tpu.memory_space<vmem>>, vector<32x256xbf16>,
    %c0_254 = arith.constant 0 : index
    %c127 = arith.constant 127 : index
    %381 = vector.load %arg12[%c0_254, %c127] : memref<32x1024xbf16, #tpu.memory_space<vmem>>, vector<32x256xbf16>
    %cst_255 = arith.constant 0.000000e+00 : bf16
    %382 = vector.broadcast %cst_255 : bf16 to vector<32x256xbf16>
    %383 = vector.shape_cast %20 : vector<1x256xi1> to vector<1x256xi1>
    %384 = vector.broadcast %383 : vector<1x256xi1> to vector<32x256xi1>
    %385 = arith.select %384, %381, %382 : vector<32x256xi1>, vector<32x256xbf16>
    %c96_256 = arith.constant 96 : index
    %c0_257 = arith.constant 0 : index
    %386 = vector.load %arg10[%c96_256, %c0_257] : memref<288x512xbf16, #tpu.memory_space<vmem>>, vector<32x256xbf16>
    tpu.vector_store %arg10[%c96_256, %c0_257], %385 {strides = array<i32>} : memref<288x512xbf16, #tpu.memory_space<vmem>>, vector<32x256xbf16>,
    %c0_258 = arith.constant 0 : index
    %c128_259 = arith.constant 128 : index
    %387 = vector.load %arg12[%c0_258, %c128_259] : memref<32x1024xbf16, #tpu.memory_space<vmem>>, vector<32x256xbf16>
    %c128_260 = arith.constant 128 : index
    %c0_261 = arith.constant 0 : index
    %388 = vector.load %arg10[%c128_260, %c0_261] : memref<288x512xbf16, #tpu.memory_space<vmem>>, vector<32x256xbf16>
    tpu.vector_store %arg10[%c128_260, %c0_261], %387 {strides = array<i32>} : memref<288x512xbf16, #tpu.memory_space<vmem>>, vector<32x256xbf16>,
    %c0_262 = arith.constant 0 : index
    %c129 = arith.constant 129 : index
    %389 = vector.load %arg12[%c0_262, %c129] : memref<32x1024xbf16, #tpu.memory_space<vmem>>, vector<32x256xbf16>
    %cst_263 = arith.constant 0.000000e+00 : bf16
    %390 = vector.broadcast %cst_263 : bf16 to vector<32x256xbf16>
    %391 = vector.shape_cast %29 : vector<1x256xi1> to vector<1x256xi1>
    %392 = vector.broadcast %391 : vector<1x256xi1> to vector<32x256xi1>
    %393 = arith.select %392, %389, %390 : vector<32x256xi1>, vector<32x256xbf16>
    %c160_264 = arith.constant 160 : index
    %c0_265 = arith.constant 0 : index
    %394 = vector.load %arg10[%c160_264, %c0_265] : memref<288x512xbf16, #tpu.memory_space<vmem>>, vector<32x256xbf16>
    tpu.vector_store %arg10[%c160_264, %c0_265], %393 {strides = array<i32>} : memref<288x512xbf16, #tpu.memory_space<vmem>>, vector<32x256xbf16>,
    %c0_266 = arith.constant 0 : index
    %c143 = arith.constant 143 : index
    %395 = vector.load %arg12[%c0_266, %c143] : memref<32x1024xbf16, #tpu.memory_space<vmem>>, vector<32x256xbf16>
    %cst_267 = arith.constant 0.000000e+00 : bf16
    %396 = vector.broadcast %cst_267 : bf16 to vector<32x256xbf16>
    %397 = vector.shape_cast %20 : vector<1x256xi1> to vector<1x256xi1>
    %398 = vector.broadcast %397 : vector<1x256xi1> to vector<32x256xi1>
    %399 = arith.select %398, %395, %396 : vector<32x256xi1>, vector<32x256xbf16>
    %c192_268 = arith.constant 192 : index
    %c0_269 = arith.constant 0 : index
    %400 = vector.load %arg10[%c192_268, %c0_269] : memref<288x512xbf16, #tpu.memory_space<vmem>>, vector<32x256xbf16>
    tpu.vector_store %arg10[%c192_268, %c0_269], %399 {strides = array<i32>} : memref<288x512xbf16, #tpu.memory_space<vmem>>, vector<32x256xbf16>,
    %c0_270 = arith.constant 0 : index
    %c144_271 = arith.constant 144 : index
    %401 = vector.load %arg12[%c0_270, %c144_271] : memref<32x1024xbf16, #tpu.memory_space<vmem>>, vector<32x256xbf16>
    %c224_272 = arith.constant 224 : index
    %c0_273 = arith.constant 0 : index
    %402 = vector.load %arg10[%c224_272, %c0_273] : memref<288x512xbf16, #tpu.memory_space<vmem>>, vector<32x256xbf16>
    tpu.vector_store %arg10[%c224_272, %c0_273], %401 {strides = array<i32>} : memref<288x512xbf16, #tpu.memory_space<vmem>>, vector<32x256xbf16>,
    %c0_274 = arith.constant 0 : index
    %c145 = arith.constant 145 : index
    %403 = vector.load %arg12[%c0_274, %c145] : memref<32x1024xbf16, #tpu.memory_space<vmem>>, vector<32x256xbf16>
    %cst_275 = arith.constant 0.000000e+00 : bf16
    %404 = vector.broadcast %cst_275 : bf16 to vector<32x256xbf16>
    %405 = vector.shape_cast %29 : vector<1x256xi1> to vector<1x256xi1>
    %406 = vector.broadcast %405 : vector<1x256xi1> to vector<32x256xi1>
    %407 = arith.select %406, %403, %404 : vector<32x256xi1>, vector<32x256xbf16>
    %c256_276 = arith.constant 256 : index
    %c0_277 = arith.constant 0 : index
    %408 = vector.load %arg10[%c256_276, %c0_277] : memref<288x512xbf16, #tpu.memory_space<vmem>>, vector<32x256xbf16>
    tpu.vector_store %arg10[%c256_276, %c0_277], %407 {strides = array<i32>} : memref<288x512xbf16, #tpu.memory_space<vmem>>, vector<32x256xbf16>,
    %c0_278 = arith.constant 0 : index
    %c623 = arith.constant 623 : index
    %409 = vector.load %arg12[%c0_278, %c623] : memref<32x1024xbf16, #tpu.memory_space<vmem>>, vector<32x256xbf16>
    %cst_279 = arith.constant 0.000000e+00 : bf16
    %410 = vector.broadcast %cst_279 : bf16 to vector<32x256xbf16>
    %411 = vector.shape_cast %20 : vector<1x256xi1> to vector<1x256xi1>
    %412 = vector.broadcast %411 : vector<1x256xi1> to vector<32x256xi1>
    %413 = arith.select %412, %409, %410 : vector<32x256xi1>, vector<32x256xbf16>
    %c0_280 = arith.constant 0 : index
    %c256_281 = arith.constant 256 : index
    %414 = vector.load %arg10[%c0_280, %c256_281] : memref<288x512xbf16, #tpu.memory_space<vmem>>, vector<32x256xbf16>
    tpu.vector_store %arg10[%c0_280, %c256_281], %413 {strides = array<i32>} : memref<288x512xbf16, #tpu.memory_space<vmem>>, vector<32x256xbf16>,
    %c0_282 = arith.constant 0 : index
    %c624 = arith.constant 624 : index
    %415 = vector.load %arg12[%c0_282, %c624] : memref<32x1024xbf16, #tpu.memory_space<vmem>>, vector<32x256xbf16>
    %c32_283 = arith.constant 32 : index
    %c256_284 = arith.constant 256 : index
    %416 = vector.load %arg10[%c32_283, %c256_284] : memref<288x512xbf16, #tpu.memory_space<vmem>>, vector<32x256xbf16>
    tpu.vector_store %arg10[%c32_283, %c256_284], %415 {strides = array<i32>} : memref<288x512xbf16, #tpu.memory_space<vmem>>, vector<32x256xbf16>,
    %c0_285 = arith.constant 0 : index
    %c625 = arith.constant 625 : index
    %417 = vector.load %arg12[%c0_285, %c625] : memref<32x1024xbf16, #tpu.memory_space<vmem>>, vector<32x256xbf16>
    %cst_286 = arith.constant 0.000000e+00 : bf16
    %418 = vector.broadcast %cst_286 : bf16 to vector<32x256xbf16>
    %419 = vector.shape_cast %29 : vector<1x256xi1> to vector<1x256xi1>
    %420 = vector.broadcast %419 : vector<1x256xi1> to vector<32x256xi1>
    %421 = arith.select %420, %417, %418 : vector<32x256xi1>, vector<32x256xbf16>
    %c64_287 = arith.constant 64 : index
    %c256_288 = arith.constant 256 : index
    %422 = vector.load %arg10[%c64_287, %c256_288] : memref<288x512xbf16, #tpu.memory_space<vmem>>, vector<32x256xbf16>
    tpu.vector_store %arg10[%c64_287, %c256_288], %421 {strides = array<i32>} : memref<288x512xbf16, #tpu.memory_space<vmem>>, vector<32x256xbf16>,
    %c0_289 = arith.constant 0 : index
    %c639 = arith.constant 639 : index
    %423 = vector.load %arg12[%c0_289, %c639] : memref<32x1024xbf16, #tpu.memory_space<vmem>>, vector<32x256xbf16>
    %cst_290 = arith.constant 0.000000e+00 : bf16
    %424 = vector.broadcast %cst_290 : bf16 to vector<32x256xbf16>
    %425 = vector.shape_cast %20 : vector<1x256xi1> to vector<1x256xi1>
    %426 = vector.broadcast %425 : vector<1x256xi1> to vector<32x256xi1>
    %427 = arith.select %426, %423, %424 : vector<32x256xi1>, vector<32x256xbf16>
    %c96_291 = arith.constant 96 : index
    %c256_292 = arith.constant 256 : index
    %428 = vector.load %arg10[%c96_291, %c256_292] : memref<288x512xbf16, #tpu.memory_space<vmem>>, vector<32x256xbf16>
    tpu.vector_store %arg10[%c96_291, %c256_292], %427 {strides = array<i32>} : memref<288x512xbf16, #tpu.memory_space<vmem>>, vector<32x256xbf16>,
    %c0_293 = arith.constant 0 : index
    %c640_294 = arith.constant 640 : index
    %429 = vector.load %arg12[%c0_293, %c640_294] : memref<32x1024xbf16, #tpu.memory_space<vmem>>, vector<32x256xbf16>
    %c128_295 = arith.constant 128 : index
    %c256_296 = arith.constant 256 : index
    %430 = vector.load %arg10[%c128_295, %c256_296] : memref<288x512xbf16, #tpu.memory_space<vmem>>, vector<32x256xbf16>
    tpu.vector_store %arg10[%c128_295, %c256_296], %429 {strides = array<i32>} : memref<288x512xbf16, #tpu.memory_space<vmem>>, vector<32x256xbf16>,
    %c0_297 = arith.constant 0 : index
    %c641 = arith.constant 641 : index
    %431 = vector.load %arg12[%c0_297, %c641] : memref<32x1024xbf16, #tpu.memory_space<vmem>>, vector<32x256xbf16>
    %cst_298 = arith.constant 0.000000e+00 : bf16
    %432 = vector.broadcast %cst_298 : bf16 to vector<32x256xbf16>
    %433 = vector.shape_cast %29 : vector<1x256xi1> to vector<1x256xi1>
    %434 = vector.broadcast %433 : vector<1x256xi1> to vector<32x256xi1>
    %435 = arith.select %434, %431, %432 : vector<32x256xi1>, vector<32x256xbf16>
    %c160_299 = arith.constant 160 : index
    %c256_300 = arith.constant 256 : index
    %436 = vector.load %arg10[%c160_299, %c256_300] : memref<288x512xbf16, #tpu.memory_space<vmem>>, vector<32x256xbf16>
    tpu.vector_store %arg10[%c160_299, %c256_300], %435 {strides = array<i32>} : memref<288x512xbf16, #tpu.memory_space<vmem>>, vector<32x256xbf16>,
    %c0_301 = arith.constant 0 : index
    %c655 = arith.constant 655 : index
    %437 = vector.load %arg12[%c0_301, %c655] : memref<32x1024xbf16, #tpu.memory_space<vmem>>, vector<32x256xbf16>
    %cst_302 = arith.constant 0.000000e+00 : bf16
    %438 = vector.broadcast %cst_302 : bf16 to vector<32x256xbf16>
    %439 = vector.shape_cast %20 : vector<1x256xi1> to vector<1x256xi1>
    %440 = vector.broadcast %439 : vector<1x256xi1> to vector<32x256xi1>
    %441 = arith.select %440, %437, %438 : vector<32x256xi1>, vector<32x256xbf16>
    %c192_303 = arith.constant 192 : index
    %c256_304 = arith.constant 256 : index
    %442 = vector.load %arg10[%c192_303, %c256_304] : memref<288x512xbf16, #tpu.memory_space<vmem>>, vector<32x256xbf16>
    tpu.vector_store %arg10[%c192_303, %c256_304], %441 {strides = array<i32>} : memref<288x512xbf16, #tpu.memory_space<vmem>>, vector<32x256xbf16>,
    %c0_305 = arith.constant 0 : index
    %c656 = arith.constant 656 : index
    %443 = vector.load %arg12[%c0_305, %c656] : memref<32x1024xbf16, #tpu.memory_space<vmem>>, vector<32x256xbf16>
    %c224_306 = arith.constant 224 : index
    %c256_307 = arith.constant 256 : index
    %444 = vector.load %arg10[%c224_306, %c256_307] : memref<288x512xbf16, #tpu.memory_space<vmem>>, vector<32x256xbf16>
    tpu.vector_store %arg10[%c224_306, %c256_307], %443 {strides = array<i32>} : memref<288x512xbf16, #tpu.memory_space<vmem>>, vector<32x256xbf16>,
    %c0_308 = arith.constant 0 : index
    %c657 = arith.constant 657 : index
    %445 = vector.load %arg12[%c0_308, %c657] : memref<32x1024xbf16, #tpu.memory_space<vmem>>, vector<32x256xbf16>
    %cst_309 = arith.constant 0.000000e+00 : bf16
    %446 = vector.broadcast %cst_309 : bf16 to vector<32x256xbf16>
    %447 = vector.shape_cast %29 : vector<1x256xi1> to vector<1x256xi1>
    %448 = vector.broadcast %447 : vector<1x256xi1> to vector<32x256xi1>
    %449 = arith.select %448, %445, %446 : vector<32x256xi1>, vector<32x256xbf16>
    %c256_310 = arith.constant 256 : index
    %c256_311 = arith.constant 256 : index
    %450 = vector.load %arg10[%c256_310, %c256_311] : memref<288x512xbf16, #tpu.memory_space<vmem>>, vector<32x256xbf16>
    tpu.vector_store %arg10[%c256_310, %c256_311], %449 {strides = array<i32>} : memref<288x512xbf16, #tpu.memory_space<vmem>>, vector<32x256xbf16>,
    %c0_312 = arith.constant 0 : index
    %c0_313 = arith.constant 0 : index
    %451 = vector.load %arg4[%c0_312, %c0_313] : memref<32x288xbf16, #tpu.memory_space<vmem>>, vector<32x288xbf16>
    %c0_314 = arith.constant 0 : index
    %c0_315 = arith.constant 0 : index
    %452 = vector.load %arg10[%c0_314, %c0_315] : memref<288x512xbf16, #tpu.memory_space<vmem>>, vector<288x512xbf16>
    %cst_316 = arith.constant dense<0.000000e+00> : vector<32x512xf32>
    %453 = tpu.matmul %451, %452, %cst_316 {dimension_numbers = #tpu.dot_dimension_numbers<[1], [0], [0], [1], [0, 0, 1, 1], [], []>} : vector<32x288xbf16>, vector<288x512xbf16>, vector<32x512xf32> -> vector<32x512xf32>
    %c0_317 = arith.constant 0 : index
    %c0_318 = arith.constant 0 : index
    %454 = vector.load %arg5[%c0_317, %c0_318] : memref<32x1xf32, #tpu.memory_space<vmem>>, vector<32x1xf32>
    %455 = vector.broadcast %454 : vector<32x1xf32> to vector<32x512xf32>
    %456 = arith.addf %453, %455 : vector<32x512xf32>
    %cst_319 = arith.constant 0.000000e+00 : f32
    %457 = vector.broadcast %cst_319 : f32 to vector<32x512xf32>
    %458 = arith.maximumf %456, %457 : vector<32x512xf32>
    %459 = arith.truncf %458 : vector<32x512xf32> to vector<32x512xbf16>
    %cst_320 = arith.constant 0.000000e+00 : bf16
    %460 = vector.broadcast %cst_320 : bf16 to vector<32x128xbf16>
    %c0_321 = arith.constant 0 : index
    %c0_322 = arith.constant 0 : index
    %461 = vector.load %arg13[%c0_321, %c0_322] : memref<32x1024xbf16, #tpu.memory_space<vmem>>, vector<32x128xbf16>
    tpu.vector_store %arg13[%c0_321, %c0_322], %460 {strides = array<i32>} : memref<32x1024xbf16, #tpu.memory_space<vmem>>, vector<32x128xbf16>,
    %c0_323 = arith.constant 0 : index
    %c384_324 = arith.constant 384 : index
    %462 = vector.load %arg13[%c0_323, %c384_324] : memref<32x1024xbf16, #tpu.memory_space<vmem>>, vector<32x128xbf16>
    tpu.vector_store %arg13[%c0_323, %c384_324], %460 {strides = array<i32>} : memref<32x1024xbf16, #tpu.memory_space<vmem>>, vector<32x128xbf16>,
    %463 = vector.extract_strided_slice %459 {offsets = [0, 0], sizes = [32, 256], strides = [1, 1]} : vector<32x512xbf16> to vector<32x256xbf16>
    %c0_325 = arith.constant 0 : index
    %c128_326 = arith.constant 128 : index
    %464 = vector.load %arg13[%c0_325, %c128_326] : memref<32x1024xbf16, #tpu.memory_space<vmem>>, vector<32x256xbf16>
    tpu.vector_store %arg13[%c0_325, %c128_326], %463 {strides = array<i32>} : memref<32x1024xbf16, #tpu.memory_space<vmem>>, vector<32x256xbf16>,
    %c0_327 = arith.constant 0 : index
    %c512_328 = arith.constant 512 : index
    %465 = vector.load %arg13[%c0_327, %c512_328] : memref<32x1024xbf16, #tpu.memory_space<vmem>>, vector<32x128xbf16>
    tpu.vector_store %arg13[%c0_327, %c512_328], %460 {strides = array<i32>} : memref<32x1024xbf16, #tpu.memory_space<vmem>>, vector<32x128xbf16>,
    %c0_329 = arith.constant 0 : index
    %c896_330 = arith.constant 896 : index
    %466 = vector.load %arg13[%c0_329, %c896_330] : memref<32x1024xbf16, #tpu.memory_space<vmem>>, vector<32x128xbf16>
    tpu.vector_store %arg13[%c0_329, %c896_330], %460 {strides = array<i32>} : memref<32x1024xbf16, #tpu.memory_space<vmem>>, vector<32x128xbf16>,
    %467 = vector.extract_strided_slice %459 {offsets = [0, 256], sizes = [32, 256], strides = [1, 1]} : vector<32x512xbf16> to vector<32x256xbf16>
    %c0_331 = arith.constant 0 : index
    %c640_332 = arith.constant 640 : index
    %468 = vector.load %arg13[%c0_331, %c640_332] : memref<32x1024xbf16, #tpu.memory_space<vmem>>, vector<32x256xbf16>
    tpu.vector_store %arg13[%c0_331, %c640_332], %467 {strides = array<i32>} : memref<32x1024xbf16, #tpu.memory_space<vmem>>, vector<32x256xbf16>,
    %c0_333 = arith.constant 0 : index
    %c111_334 = arith.constant 111 : index
    %469 = vector.load %arg13[%c0_333, %c111_334] : memref<32x1024xbf16, #tpu.memory_space<vmem>>, vector<32x256xbf16>
    %cst_335 = arith.constant 0.000000e+00 : bf16
    %470 = vector.broadcast %cst_335 : bf16 to vector<32x256xbf16>
    %471 = vector.shape_cast %20 : vector<1x256xi1> to vector<1x256xi1>
    %472 = vector.broadcast %471 : vector<1x256xi1> to vector<32x256xi1>
    %473 = arith.select %472, %469, %470 : vector<32x256xi1>, vector<32x256xbf16>
    %c0_336 = arith.constant 0 : index
    %c0_337 = arith.constant 0 : index
    %474 = vector.load %arg11[%c0_336, %c0_337] : memref<288x512xbf16, #tpu.memory_space<vmem>>, vector<32x256xbf16>
    tpu.vector_store %arg11[%c0_336, %c0_337], %473 {strides = array<i32>} : memref<288x512xbf16, #tpu.memory_space<vmem>>, vector<32x256xbf16>,
    %c0_338 = arith.constant 0 : index
    %c112_339 = arith.constant 112 : index
    %475 = vector.load %arg13[%c0_338, %c112_339] : memref<32x1024xbf16, #tpu.memory_space<vmem>>, vector<32x256xbf16>
    %c32_340 = arith.constant 32 : index
    %c0_341 = arith.constant 0 : index
    %476 = vector.load %arg11[%c32_340, %c0_341] : memref<288x512xbf16, #tpu.memory_space<vmem>>, vector<32x256xbf16>
    tpu.vector_store %arg11[%c32_340, %c0_341], %475 {strides = array<i32>} : memref<288x512xbf16, #tpu.memory_space<vmem>>, vector<32x256xbf16>,
    %c0_342 = arith.constant 0 : index
    %c113_343 = arith.constant 113 : index
    %477 = vector.load %arg13[%c0_342, %c113_343] : memref<32x1024xbf16, #tpu.memory_space<vmem>>, vector<32x256xbf16>
    %cst_344 = arith.constant 0.000000e+00 : bf16
    %478 = vector.broadcast %cst_344 : bf16 to vector<32x256xbf16>
    %479 = vector.shape_cast %29 : vector<1x256xi1> to vector<1x256xi1>
    %480 = vector.broadcast %479 : vector<1x256xi1> to vector<32x256xi1>
    %481 = arith.select %480, %477, %478 : vector<32x256xi1>, vector<32x256xbf16>
    %c64_345 = arith.constant 64 : index
    %c0_346 = arith.constant 0 : index
    %482 = vector.load %arg11[%c64_345, %c0_346] : memref<288x512xbf16, #tpu.memory_space<vmem>>, vector<32x256xbf16>
    tpu.vector_store %arg11[%c64_345, %c0_346], %481 {strides = array<i32>} : memref<288x512xbf16, #tpu.memory_space<vmem>>, vector<32x256xbf16>,
    %c0_347 = arith.constant 0 : index
    %c127_348 = arith.constant 127 : index
    %483 = vector.load %arg13[%c0_347, %c127_348] : memref<32x1024xbf16, #tpu.memory_space<vmem>>, vector<32x256xbf16>
    %cst_349 = arith.constant 0.000000e+00 : bf16
    %484 = vector.broadcast %cst_349 : bf16 to vector<32x256xbf16>
    %485 = vector.shape_cast %20 : vector<1x256xi1> to vector<1x256xi1>
    %486 = vector.broadcast %485 : vector<1x256xi1> to vector<32x256xi1>
    %487 = arith.select %486, %483, %484 : vector<32x256xi1>, vector<32x256xbf16>
    %c96_350 = arith.constant 96 : index
    %c0_351 = arith.constant 0 : index
    %488 = vector.load %arg11[%c96_350, %c0_351] : memref<288x512xbf16, #tpu.memory_space<vmem>>, vector<32x256xbf16>
    tpu.vector_store %arg11[%c96_350, %c0_351], %487 {strides = array<i32>} : memref<288x512xbf16, #tpu.memory_space<vmem>>, vector<32x256xbf16>,
    %c0_352 = arith.constant 0 : index
    %c128_353 = arith.constant 128 : index
    %489 = vector.load %arg13[%c0_352, %c128_353] : memref<32x1024xbf16, #tpu.memory_space<vmem>>, vector<32x256xbf16>
    %c128_354 = arith.constant 128 : index
    %c0_355 = arith.constant 0 : index
    %490 = vector.load %arg11[%c128_354, %c0_355] : memref<288x512xbf16, #tpu.memory_space<vmem>>, vector<32x256xbf16>
    tpu.vector_store %arg11[%c128_354, %c0_355], %489 {strides = array<i32>} : memref<288x512xbf16, #tpu.memory_space<vmem>>, vector<32x256xbf16>,
    %c0_356 = arith.constant 0 : index
    %c129_357 = arith.constant 129 : index
    %491 = vector.load %arg13[%c0_356, %c129_357] : memref<32x1024xbf16, #tpu.memory_space<vmem>>, vector<32x256xbf16>
    %cst_358 = arith.constant 0.000000e+00 : bf16
    %492 = vector.broadcast %cst_358 : bf16 to vector<32x256xbf16>
    %493 = vector.shape_cast %29 : vector<1x256xi1> to vector<1x256xi1>
    %494 = vector.broadcast %493 : vector<1x256xi1> to vector<32x256xi1>
    %495 = arith.select %494, %491, %492 : vector<32x256xi1>, vector<32x256xbf16>
    %c160_359 = arith.constant 160 : index
    %c0_360 = arith.constant 0 : index
    %496 = vector.load %arg11[%c160_359, %c0_360] : memref<288x512xbf16, #tpu.memory_space<vmem>>, vector<32x256xbf16>
    tpu.vector_store %arg11[%c160_359, %c0_360], %495 {strides = array<i32>} : memref<288x512xbf16, #tpu.memory_space<vmem>>, vector<32x256xbf16>,
    %c0_361 = arith.constant 0 : index
    %c143_362 = arith.constant 143 : index
    %497 = vector.load %arg13[%c0_361, %c143_362] : memref<32x1024xbf16, #tpu.memory_space<vmem>>, vector<32x256xbf16>
    %cst_363 = arith.constant 0.000000e+00 : bf16
    %498 = vector.broadcast %cst_363 : bf16 to vector<32x256xbf16>
    %499 = vector.shape_cast %20 : vector<1x256xi1> to vector<1x256xi1>
    %500 = vector.broadcast %499 : vector<1x256xi1> to vector<32x256xi1>
    %501 = arith.select %500, %497, %498 : vector<32x256xi1>, vector<32x256xbf16>
    %c192_364 = arith.constant 192 : index
    %c0_365 = arith.constant 0 : index
    %502 = vector.load %arg11[%c192_364, %c0_365] : memref<288x512xbf16, #tpu.memory_space<vmem>>, vector<32x256xbf16>
    tpu.vector_store %arg11[%c192_364, %c0_365], %501 {strides = array<i32>} : memref<288x512xbf16, #tpu.memory_space<vmem>>, vector<32x256xbf16>,
    %c0_366 = arith.constant 0 : index
    %c144_367 = arith.constant 144 : index
    %503 = vector.load %arg13[%c0_366, %c144_367] : memref<32x1024xbf16, #tpu.memory_space<vmem>>, vector<32x256xbf16>
    %c224_368 = arith.constant 224 : index
    %c0_369 = arith.constant 0 : index
    %504 = vector.load %arg11[%c224_368, %c0_369] : memref<288x512xbf16, #tpu.memory_space<vmem>>, vector<32x256xbf16>
    tpu.vector_store %arg11[%c224_368, %c0_369], %503 {strides = array<i32>} : memref<288x512xbf16, #tpu.memory_space<vmem>>, vector<32x256xbf16>,
    %c0_370 = arith.constant 0 : index
    %c145_371 = arith.constant 145 : index
    %505 = vector.load %arg13[%c0_370, %c145_371] : memref<32x1024xbf16, #tpu.memory_space<vmem>>, vector<32x256xbf16>
    %cst_372 = arith.constant 0.000000e+00 : bf16
    %506 = vector.broadcast %cst_372 : bf16 to vector<32x256xbf16>
    %507 = vector.shape_cast %29 : vector<1x256xi1> to vector<1x256xi1>
    %508 = vector.broadcast %507 : vector<1x256xi1> to vector<32x256xi1>
    %509 = arith.select %508, %505, %506 : vector<32x256xi1>, vector<32x256xbf16>
    %c256_373 = arith.constant 256 : index
    %c0_374 = arith.constant 0 : index
    %510 = vector.load %arg11[%c256_373, %c0_374] : memref<288x512xbf16, #tpu.memory_space<vmem>>, vector<32x256xbf16>
    tpu.vector_store %arg11[%c256_373, %c0_374], %509 {strides = array<i32>} : memref<288x512xbf16, #tpu.memory_space<vmem>>, vector<32x256xbf16>,
    %c0_375 = arith.constant 0 : index
    %c623_376 = arith.constant 623 : index
    %511 = vector.load %arg13[%c0_375, %c623_376] : memref<32x1024xbf16, #tpu.memory_space<vmem>>, vector<32x256xbf16>
    %cst_377 = arith.constant 0.000000e+00 : bf16
    %512 = vector.broadcast %cst_377 : bf16 to vector<32x256xbf16>
    %513 = vector.shape_cast %20 : vector<1x256xi1> to vector<1x256xi1>
    %514 = vector.broadcast %513 : vector<1x256xi1> to vector<32x256xi1>
    %515 = arith.select %514, %511, %512 : vector<32x256xi1>, vector<32x256xbf16>
    %c0_378 = arith.constant 0 : index
    %c256_379 = arith.constant 256 : index
    %516 = vector.load %arg11[%c0_378, %c256_379] : memref<288x512xbf16, #tpu.memory_space<vmem>>, vector<32x256xbf16>
    tpu.vector_store %arg11[%c0_378, %c256_379], %515 {strides = array<i32>} : memref<288x512xbf16, #tpu.memory_space<vmem>>, vector<32x256xbf16>,
    %c0_380 = arith.constant 0 : index
    %c624_381 = arith.constant 624 : index
    %517 = vector.load %arg13[%c0_380, %c624_381] : memref<32x1024xbf16, #tpu.memory_space<vmem>>, vector<32x256xbf16>
    %c32_382 = arith.constant 32 : index
    %c256_383 = arith.constant 256 : index
    %518 = vector.load %arg11[%c32_382, %c256_383] : memref<288x512xbf16, #tpu.memory_space<vmem>>, vector<32x256xbf16>
    tpu.vector_store %arg11[%c32_382, %c256_383], %517 {strides = array<i32>} : memref<288x512xbf16, #tpu.memory_space<vmem>>, vector<32x256xbf16>,
    %c0_384 = arith.constant 0 : index
    %c625_385 = arith.constant 625 : index
    %519 = vector.load %arg13[%c0_384, %c625_385] : memref<32x1024xbf16, #tpu.memory_space<vmem>>, vector<32x256xbf16>
    %cst_386 = arith.constant 0.000000e+00 : bf16
    %520 = vector.broadcast %cst_386 : bf16 to vector<32x256xbf16>
    %521 = vector.shape_cast %29 : vector<1x256xi1> to vector<1x256xi1>
    %522 = vector.broadcast %521 : vector<1x256xi1> to vector<32x256xi1>
    %523 = arith.select %522, %519, %520 : vector<32x256xi1>, vector<32x256xbf16>
    %c64_387 = arith.constant 64 : index
    %c256_388 = arith.constant 256 : index
    %524 = vector.load %arg11[%c64_387, %c256_388] : memref<288x512xbf16, #tpu.memory_space<vmem>>, vector<32x256xbf16>
    tpu.vector_store %arg11[%c64_387, %c256_388], %523 {strides = array<i32>} : memref<288x512xbf16, #tpu.memory_space<vmem>>, vector<32x256xbf16>,
    %c0_389 = arith.constant 0 : index
    %c639_390 = arith.constant 639 : index
    %525 = vector.load %arg13[%c0_389, %c639_390] : memref<32x1024xbf16, #tpu.memory_space<vmem>>, vector<32x256xbf16>
    %cst_391 = arith.constant 0.000000e+00 : bf16
    %526 = vector.broadcast %cst_391 : bf16 to vector<32x256xbf16>
    %527 = vector.shape_cast %20 : vector<1x256xi1> to vector<1x256xi1>
    %528 = vector.broadcast %527 : vector<1x256xi1> to vector<32x256xi1>
    %529 = arith.select %528, %525, %526 : vector<32x256xi1>, vector<32x256xbf16>
    %c96_392 = arith.constant 96 : index
    %c256_393 = arith.constant 256 : index
    %530 = vector.load %arg11[%c96_392, %c256_393] : memref<288x512xbf16, #tpu.memory_space<vmem>>, vector<32x256xbf16>
    tpu.vector_store %arg11[%c96_392, %c256_393], %529 {strides = array<i32>} : memref<288x512xbf16, #tpu.memory_space<vmem>>, vector<32x256xbf16>,
    %c0_394 = arith.constant 0 : index
    %c640_395 = arith.constant 640 : index
    %531 = vector.load %arg13[%c0_394, %c640_395] : memref<32x1024xbf16, #tpu.memory_space<vmem>>, vector<32x256xbf16>
    %c128_396 = arith.constant 128 : index
    %c256_397 = arith.constant 256 : index
    %532 = vector.load %arg11[%c128_396, %c256_397] : memref<288x512xbf16, #tpu.memory_space<vmem>>, vector<32x256xbf16>
    tpu.vector_store %arg11[%c128_396, %c256_397], %531 {strides = array<i32>} : memref<288x512xbf16, #tpu.memory_space<vmem>>, vector<32x256xbf16>,
    %c0_398 = arith.constant 0 : index
    %c641_399 = arith.constant 641 : index
    %533 = vector.load %arg13[%c0_398, %c641_399] : memref<32x1024xbf16, #tpu.memory_space<vmem>>, vector<32x256xbf16>
    %cst_400 = arith.constant 0.000000e+00 : bf16
    %534 = vector.broadcast %cst_400 : bf16 to vector<32x256xbf16>
    %535 = vector.shape_cast %29 : vector<1x256xi1> to vector<1x256xi1>
    %536 = vector.broadcast %535 : vector<1x256xi1> to vector<32x256xi1>
    %537 = arith.select %536, %533, %534 : vector<32x256xi1>, vector<32x256xbf16>
    %c160_401 = arith.constant 160 : index
    %c256_402 = arith.constant 256 : index
    %538 = vector.load %arg11[%c160_401, %c256_402] : memref<288x512xbf16, #tpu.memory_space<vmem>>, vector<32x256xbf16>
    tpu.vector_store %arg11[%c160_401, %c256_402], %537 {strides = array<i32>} : memref<288x512xbf16, #tpu.memory_space<vmem>>, vector<32x256xbf16>,
    %c0_403 = arith.constant 0 : index
    %c655_404 = arith.constant 655 : index
    %539 = vector.load %arg13[%c0_403, %c655_404] : memref<32x1024xbf16, #tpu.memory_space<vmem>>, vector<32x256xbf16>
    %cst_405 = arith.constant 0.000000e+00 : bf16
    %540 = vector.broadcast %cst_405 : bf16 to vector<32x256xbf16>
    %541 = vector.shape_cast %20 : vector<1x256xi1> to vector<1x256xi1>
    %542 = vector.broadcast %541 : vector<1x256xi1> to vector<32x256xi1>
    %543 = arith.select %542, %539, %540 : vector<32x256xi1>, vector<32x256xbf16>
    %c192_406 = arith.constant 192 : index
    %c256_407 = arith.constant 256 : index
    %544 = vector.load %arg11[%c192_406, %c256_407] : memref<288x512xbf16, #tpu.memory_space<vmem>>, vector<32x256xbf16>
    tpu.vector_store %arg11[%c192_406, %c256_407], %543 {strides = array<i32>} : memref<288x512xbf16, #tpu.memory_space<vmem>>, vector<32x256xbf16>,
    %c0_408 = arith.constant 0 : index
    %c656_409 = arith.constant 656 : index
    %545 = vector.load %arg13[%c0_408, %c656_409] : memref<32x1024xbf16, #tpu.memory_space<vmem>>, vector<32x256xbf16>
    %c224_410 = arith.constant 224 : index
    %c256_411 = arith.constant 256 : index
    %546 = vector.load %arg11[%c224_410, %c256_411] : memref<288x512xbf16, #tpu.memory_space<vmem>>, vector<32x256xbf16>
    tpu.vector_store %arg11[%c224_410, %c256_411], %545 {strides = array<i32>} : memref<288x512xbf16, #tpu.memory_space<vmem>>, vector<32x256xbf16>,
    %c0_412 = arith.constant 0 : index
    %c657_413 = arith.constant 657 : index
    %547 = vector.load %arg13[%c0_412, %c657_413] : memref<32x1024xbf16, #tpu.memory_space<vmem>>, vector<32x256xbf16>
    %cst_414 = arith.constant 0.000000e+00 : bf16
    %548 = vector.broadcast %cst_414 : bf16 to vector<32x256xbf16>
    %549 = vector.shape_cast %29 : vector<1x256xi1> to vector<1x256xi1>
    %550 = vector.broadcast %549 : vector<1x256xi1> to vector<32x256xi1>
    %551 = arith.select %550, %547, %548 : vector<32x256xi1>, vector<32x256xbf16>
    %c256_415 = arith.constant 256 : index
    %c256_416 = arith.constant 256 : index
    %552 = vector.load %arg11[%c256_415, %c256_416] : memref<288x512xbf16, #tpu.memory_space<vmem>>, vector<32x256xbf16>
    tpu.vector_store %arg11[%c256_415, %c256_416], %551 {strides = array<i32>} : memref<288x512xbf16, #tpu.memory_space<vmem>>, vector<32x256xbf16>,
    %c0_417 = arith.constant 0 : index
    %c0_418 = arith.constant 0 : index
    %553 = vector.load %arg6[%c0_417, %c0_418] : memref<16x288xbf16, #tpu.memory_space<vmem>>, vector<16x288xbf16>
    %c0_419 = arith.constant 0 : index
    %c0_420 = arith.constant 0 : index
    %554 = vector.load %arg11[%c0_419, %c0_420] : memref<288x512xbf16, #tpu.memory_space<vmem>>, vector<288x512xbf16>
    %cst_421 = arith.constant dense<0.000000e+00> : vector<16x512xf32>
    %555 = tpu.matmul %553, %554, %cst_421 {dimension_numbers = #tpu.dot_dimension_numbers<[1], [0], [0], [1], [0, 0, 1, 1], [], []>} : vector<16x288xbf16>, vector<288x512xbf16>, vector<16x512xf32> -> vector<16x512xf32>
    %c0_422 = arith.constant 0 : index
    %c0_423 = arith.constant 0 : index
    %556 = vector.load %arg7[%c0_422, %c0_423] : memref<16x1xf32, #tpu.memory_space<vmem>>, vector<16x1xf32>
    %557 = vector.broadcast %556 : vector<16x1xf32> to vector<16x512xf32>
    %558 = arith.addf %555, %557 : vector<16x512xf32>
    %c0_424 = arith.constant 0 : index
    %c0_425 = arith.constant 0 : index
    %c0_426 = arith.constant 0 : index
    %559 = vector.load %arg8[%c0_424, %c0_425, %c0_426] : memref<1x16x512xf32, #tpu.memory_space<vmem>>, vector<1x16x512xf32>
    %560 = vector.shape_cast %559 : vector<1x16x512xf32> to vector<16x512xf32>
    %561 = vector.shape_cast %558 : vector<16x512xf32> to vector<1x16x512xf32>
    tpu.vector_store %arg8[%c0_424, %c0_425, %c0_426], %561 {strides = array<i32>} : memref<1x16x512xf32, #tpu.memory_space<vmem>>, vector<1x16x512xf32>,
    return
  }
  func.func @transform_0(%arg0: i32) -> (i32, i32, i32) {
    %c0_i32 = arith.constant 0 : i32
    %c0_i32_0 = arith.constant 0 : i32
    %c0_i32_1 = arith.constant 0 : i32
    return %arg0, %c0_i32, %c0_i32_0 : i32, i32, i32
  }
  func.func @transform_1(%arg0: i32) -> (i32, i32) {
    %c0_i32 = arith.constant 0 : i32
    %c0_i32_0 = arith.constant 0 : i32
    %c0_i32_1 = arith.constant 0 : i32
    return %c0_i32, %c0_i32_0 : i32, i32
  }
  func.func @transform_2(%arg0: i32) -> (i32, i32) {
    %c0_i32 = arith.constant 0 : i32
    %c0_i32_0 = arith.constant 0 : i32
    %c0_i32_1 = arith.constant 0 : i32
    return %c0_i32, %c0_i32_0 : i32, i32
  }
  func.func @transform_3(%arg0: i32) -> (i32, i32) {
    %c0_i32 = arith.constant 0 : i32
    %c0_i32_0 = arith.constant 0 : i32
    %c0_i32_1 = arith.constant 0 : i32
    return %c0_i32, %c0_i32_0 : i32, i32
  }
  func.func @transform_4(%arg0: i32) -> (i32, i32) {
    %c0_i32 = arith.constant 0 : i32
    %c0_i32_0 = arith.constant 0 : i32
    %c0_i32_1 = arith.constant 0 : i32
    return %c0_i32, %c0_i32_0 : i32, i32
  }
  func.func @transform_5(%arg0: i32) -> (i32, i32) {
    %c0_i32 = arith.constant 0 : i32
    %c0_i32_0 = arith.constant 0 : i32
    %c0_i32_1 = arith.constant 0 : i32
    return %c0_i32, %c0_i32_0 : i32, i32
  }
  func.func @transform_6(%arg0: i32) -> (i32, i32) {
    %c0_i32 = arith.constant 0 : i32
    %c0_i32_0 = arith.constant 0 : i32
    %c0_i32_1 = arith.constant 0 : i32
    return %c0_i32, %c0_i32_0 : i32, i32
  }
  func.func @transform_7(%arg0: i32) -> (i32, i32, i32) {
    %c0_i32 = arith.constant 0 : i32
    %c0_i32_0 = arith.constant 0 : i32
    %c0_i32_1 = arith.constant 0 : i32
    return %arg0, %c0_i32, %c0_i32_0 : i32, i32, i32
  }
}

</mosaic_0001>

<bundles_post_ra>
// kernel: _lambda_.1
= control target key start
LH: loop header
LB: loop body
LE: loop exit
PB: predicated region body
PF: predicated region fallthrough
CT: control target
= control target key end

     0   :  { %v7714_v0 = vlaneseq  ;;  %v7712_v1 = vmov 0   ;;  %s7664_s24 = smov 6   ;;  %s7668_s25 = smov 7   ;;  %s7656_s0 = inlined_call_operand.vmem [shape: bf16[1,16,672], index: 0, kind: input, shape index: {}]   ;;  %s7657_s1 = inlined_call_operand.vmem [shape: bf16[32,400], index: 1, kind: input, shape index: {}]   ;;  %s7658_s2 = inlined_call_operand.vmem [shape: f32[32,1], index: 2, kind: input, shape index: {}]   ;;  %s7659_s3 = inlined_call_operand.vmem [shape: bf16[32,288], index: 3, kind: input, shape index: {}]   ;;  %s7660_s4 = inlined_call_operand.vmem [shape: f32[32,1], index: 4, kind: input, shape index: {}]   ;;  %s7661_s5 = inlined_call_operand.vmem [shape: bf16[16,288], index: 5, kind: input, shape index: {}]   ;;  %s7662_s6 = inlined_call_operand.vmem [shape: f32[16,1], index: 6, kind: input, shape index: {}]   ;;  %s7663_s7 = inlined_call_operand.vmem [shape: f32[1,16,512], index: 7, kind: output, shape index: {}]  }
   0x1   :  { %4751 = vset.pattern.permute.xlu1 %v7712_v1  ;;  %4750 = vset.pattern.permute.xlu0 %v7712_v1  ;;  %s7666_s26 = smov 86   ;;  %s7670_s27 = smov 87   ;;  %v5121_v18 = vld [vmem:[%s7656_s0] sm:$0xff]  ;;  %v5126_v19 = vld [vmem:[%s7656_s0 + $0x18] sm:$0xff]  ;;  %v5139_v21 = vld [vmem:[%s7656_s0 + $0x8] sm:$0xff] }
   0x2   :  { %v30_v2 = vand.u32 127, %v7714_v0  ;;  %s7672_s28 = smov 9   ;;  %s7674_s29 = smov 89   ;;  %v5134_v20 = vcombine.high %v5121_v18, %v5126_v19  ;;  %v5144_v22 = vld [vmem:[%s7656_s0 + $0x20] sm:$0xff]  ;;  %v4916_v25 = vld [vmem:[%s7656_s0 + $0x10] ss:$24 sps:$4 sm:$0xff]   ;;  %v5164_v26 = vcombine.low %v5121_v18, %v5126_v19 }
   0x3   :  { %s7676_s30 = smov 10   ;;  %s7678_s8 = smov 90   ;;  %v4915_v23 = vld [vmem:[%s7656_s0 + $0x8] ss:$24 sps:$4 sm:$0xff]   ;;  %v5155_v24 = vcombine.high %v5139_v21, %v5144_v22  ;;  %v5168_v27 = vcombine.low %v5139_v21, %v5144_v22  ;;  %v1053_v38 = vld [vmem:[%s7656_s0 + $0x10] sm:$0xf] }
   0x4   :  { %v31_v3 = vadd.s32 128, %v30_v2  ;;  %v32_v4 = vand.u32 15, %v30_v2  ;;  %s7684_s9 = smov 22   ;;  %s4976_s10 = smov 102   ;;  %v67_v31 = vld [vmem:[%s7656_s0 + $0x8] sm:$0xf] }
   0x5   :  { %s4977_s11 = smov 23   ;;  %s4978_s12 = smov 103   ;;  %v69_v33 = vld [vmem:[%s7656_s0 + $0x20] sm:$0xf]  ;;  %v1055_v42 = vld [vmem:[%s7656_s0 + $0x28] sm:$0xf] }
   0x6   :  { %v33_v5 = vand.u32 15, %v31_v3  ;;  %v34_v6 = vadd.s32 4294967294, %v32_v4  ;;  %v42_v7 = vadd.s32 4294967295, %v32_v4  ;;  %v50_v10 = vadd.s32 1, %v32_v4  ;;  %s4979_s13 = smov 25   ;;  %s4980_s14 = smov 105  }
   0x7   :  { %v58_v12 = vadd.s32 2, %v32_v4  ;;  %s4981_s15 = smov 26   ;;  %s4982_s16 = smov 106   ;;  %v114_v47 = vld [vmem:[%s7656_s0 + $0x8] sm:$0xf] }
   0x8   :  { %v35_v8 = vadd.s32 4294967294, %v33_v5  ;;  %vm36_vm0 = vcmp.ge.s32.totalorder %v34_v6, 0  ;;  %v43_v9 = vadd.s32 4294967295, %v33_v5  ;;  %vm44_vm1 = vcmp.ge.s32.totalorder %v42_v7, 0  ;;  %s4983_s17 = smov 38   ;;  %s4984_s18 = smov 118  }
   0x9   :  { %v51_v11 = vadd.s32 1, %v33_v5  ;;  %v59_v13 = vadd.s32 2, %v33_v5  ;;  %vm54_vm6 = vcmp.lt.s32.totalorder %v50_v10, 16  ;;  %vm62_vm9 = vcmp.lt.s32.totalorder %v58_v12, 16  ;;  %s4985_s19 = smov 39   ;;  %s4986_s20 = smov 119  }
   0xa   :  { %vm37_vm2 = vcmp.ge.s32.totalorder %v35_v8, 0  ;;  %vm45_vm3 = vcmp.ge.s32.totalorder %v43_v9, 0  ;;  %s4987_s21 = smov 41   ;;  %s4988_s22 = smov 121   ;;  %v116_v48 = vld [vmem:[%s7656_s0 + $0x20] sm:$0xf] }
   0xb   :  { %vm74_vm4 = vmpackc.low %vm37_vm2, %vm36_vm0  ;;  %vm55_vm7 = vcmp.lt.s32.totalorder %v51_v11, 16  ;;  %vm63_vm10 = vcmp.lt.s32.totalorder %v59_v13, 16  ;;  %s4989_s23 = smov 42   ;;  %v1092_v53 = vld [vmem:[%s7656_s0 + $0x10] sm:$0xf]  ;;  %vm7696_vm0 = vcmask 48128  }
   0xc   :  { %v5059_v14 = vsel %vm74_vm4, 65537, %v7712_v1  ;;  %vm121_vm5 = vmpackc.low %vm45_vm3, %vm44_vm1  ;;  %v1094_v58 = vld [vmem:[%s7656_s0 + $0x28] sm:$0xf]  ;;  %vm7697_vm1 = vcmask 703488   ;;  %v240_v2 = vld [vmem:[%s7656_s0 + $0x20] sm:$0xf] }
   0xd   :  { %76 = vrot.lane.b32.xlu0 %v5059_v14, %s7664_s24  ;;  %v5064_v15 = vsel %vm121_vm5, 65537, %v7712_v1  ;;  %vm198_vm8 = vmpackc.low %vm55_vm7, %vm54_vm6  ;;  %s4990_s24 = smov 122   ;;  %v238_v61 = vld [vmem:[%s7656_s0 + $0x8] sm:$0xf]  ;;  %v193_v8 = vld [vmem:[%s7656_s0 + $0x20] sm:$0xf] }
   0xe   :  { %7745 = vst [vmem:[#allocation7_spill] sm:$0xff] %v5064_v15  ;;  %123 = vrot.lane.b32.xlu1 %v5064_v15, %s7668_s25  ;;  %v5073_v16 = vsel %vm198_vm8, 65537, %v7712_v1  ;;  %vm245_vm11 = vmpackc.low %vm63_vm10, %vm62_vm9  ;;  %v191_v3 = vld [vmem:[%s7656_s0 + $0x8] sm:$0xf]  ;;  %v1200_v11 = vld [vmem:[%s7656_s0 + $0x10] sm:$0xf] }
   0xf   :  { %7746 = vst [vmem:[#allocation8_spill] sm:$0xff] %v5073_v16  ;;  %v5078_v17 = vsel %vm245_vm11, 65537, %v7712_v1  ;;  %v1202_v12 = vld [vmem:[%s7656_s0 + $0x28] sm:$0xf]  ;;  %vm7702_vm9 = vcmask 187392   ;;  %vm7698_vm10 = vcmask 56320  }
  0x10   :  { %s5002_s25 = smov 74  }
  0x11   :  { %1056 = vrot.lane.b32.xlu0 %v5059_v14, %s7666_s26 }
  0x12   :  { %1095 = vrot.lane.b32.xlu1 %v5064_v15, %s7670_s27  ;;  %s4995_s27 = smov 40  }
  0x15   :  { %200 = vrot.lane.b32.xlu0 %v5073_v16, %s7672_s28  ;;  %s7692_s28 = smov 71  }
  0x16   :  { %1164 = vrot.lane.b32.xlu1 %v5073_v16, %s7674_s29  ;;  %s7680_s29 = smov 54  }
  0x19   :  { %247 = vrot.lane.b32.xlu0 %v5078_v17, %s7676_s30  ;;  %s7682_s30 = smov 55  }
  0x1a   :  { %1203 = vrot.lane.b32.xlu1 %v5078_v17, %s7678_s8  ;;  %s7686_s8 = smov 57  }
  0x1d   :  { %288 = vrot.lane.b32.xlu0 %v5059_v14, %s7684_s9  ;;  %s7694_s9 = smov 120  }
  0x1e   :  { %1242 = vrot.lane.b32.xlu1 %v5059_v14, %s4976_s10 }
  0x21   :  { %329 = vrot.lane.b32.xlu0 %v5064_v15, %s4977_s11 }
  0x22   :  { %1281 = vrot.lane.b32.xlu1 %v5064_v15, %s4978_s12 }
  0x25   :  { %400 = vrot.lane.b32.xlu0 %v5073_v16, %s4979_s13 }
  0x26   :  { %1350 = vrot.lane.b32.xlu1 %v5073_v16, %s4980_s14 }
  0x29   :  { %441 = vrot.lane.b32.xlu0 %v5078_v17, %s4981_s15 }
  0x2a   :  { %1389 = vrot.lane.b32.xlu1 %v5078_v17, %s4982_s16 }
  0x2d   :  { %482 = vrot.lane.b32.xlu0 %v5059_v14, %s4983_s17 }
  0x2e   :  { %1428 = vrot.lane.b32.xlu1 %v5059_v14, %s4984_s18 }
  0x31   :  { %523 = vrot.lane.b32.xlu0 %v5064_v15, %s4985_s19 }
  0x32   :  { %1467 = vrot.lane.b32.xlu1 %v5064_v15, %s4986_s20 }
  0x35   :  { %594 = vrot.lane.b32.xlu0 %v5073_v16, %s4987_s21 }
  0x36   :  { %1536 = vrot.lane.b32.xlu1 %v5073_v16, %s4988_s22 }
  0x39   :  { %635 = vrot.lane.b32.xlu0 %v5078_v17, %s4989_s23 }
  0x3a   :  { %1575 = vrot.lane.b32.xlu1 %v5078_v17, %s4990_s24 }
  0x3d   :  { %676 = vrot.lane.b32.xlu0 %v5059_v14, %s7680_s29  ;;  %s7688_s29 = smov 58  }
  0x3e   :  { %717 = vrot.lane.b32.xlu1 %v5064_v15, %s7682_s30  ;;  %s7690_s30 = smov 70  }
  0x41   :  { %788 = vrot.lane.b32.xlu0 %v5073_v16, %s7686_s8  ;;  %s5009_s8 = smov 127  }
  0x42   :  { %179 = vrot.lane.b32.xlu1 %v5134_v20, %s7694_s9 }
  0x45   :  { %181 = vrot.lane.b32.xlu0 %v4915_v23, %s7694_s9 }
  0x46   :  { %1149 = vrot.lane.b32.xlu1 %v5155_v24, %s4995_s27 }
  0x49   :  { %1151 = vrot.lane.b32.xlu0 %v4916_v25, %s4995_s27 }
  0x4a   :  { %177 = vrot.lane.b32.xlu1 %v5164_v26, %s7694_s9  ;;  %s5001_s9 = smov 73  }
  0x4d   :  { %1147 = vrot.lane.b32.xlu0 %v5168_v27, %s4995_s27  ;;  %s7780_s27 = smov 22  }
  0x4e   :  { %829 = vrot.lane.b32.xlu1 %v5078_v17, %s7688_s29  ;;  %s7789_s29 = smov 89  }
  0x51   :  { %870 = vrot.lane.b32.xlu0 %v5059_v14, %s7690_s30  ;;  %s7783_s30 = smov 90  }
  0x52   :  { %909 = vrot.lane.b32.xlu1 %v5064_v15, %s7692_s28  ;;  %s5003_s28 = smov 88  }
  0x7f   :  { %v77_v28 = vpop.permute.xlu0 %76 }
  0x80   :  { %v78_v29 = vrot.slane %v77_v28, 4  ;;  %v5179_v30 = vpop.permute.xlu1 %123 }
  0x81   :  { %v125_v40 = vrot.slane %v5179_v30, 4 }
  0x82   :  { %vm5184_vm12 = vcmp.ne.s16.totalorder %v78_v29, 0  ;;  %v5291_v14 = vsel %vm7696_vm0, %v78_v29, %v77_v28  ;;  %vm7701_vm0 = vcmask 728064  }
  0x83   :  { %v1057_v34 = vpop.permute.xlu0 %1056  ;;  %v84_v35 = vsel %vm5184_vm12, %v67_v31, 0  ;;  %v86_v39 = vsel %vm5184_vm12, %v69_v33, 0  ;;  %vm5208_vm14 = vcmp.ne.s16.totalorder %v125_v40, 0  ;;  %vm7726_vm5 = vcmp.ne.s16.totalorder %v5291_v14, 0 }
  0x84   :  { %v1058_v36 = vrot.slane %v1057_v34, 4  ;;  %v5193_v37 = vpop.permute.xlu1 %1095  ;;  %v4446_v41 = vcombine.low %v84_v35, %v86_v39  ;;  %v131_v56 = vsel %vm5208_vm14, %v114_v47, 0  ;;  %v133_v57 = vsel %vm5208_vm14, %v116_v48, 0  ;;  %v1163_v47 = vld [vmem:[%s7656_s0 + $0x28] sm:$0xf] }
  0x85   :  { %v1097_v49 = vrot.slane %v5193_v37, 4  ;;  %v4449_v5 = vcombine.low %v131_v56, %v133_v57  ;;  %v83_v54 = vsel %vm7726_vm5, %v5121_v18, 0  ;;  %v85_v56 = vsel %vm7726_vm5, %v5126_v19, 0 }
  0x86   :  { %vm1061_vm13 = vcmp.ne.s16.totalorder %v1058_v36, 0  ;;  %104 = vrot.lane.b32.xlu1 %v4446_v41, %s4990_s24  ;;  %v1059_v23 = vsel %vm7697_vm1, %v1058_v36, %v1057_v34  ;;  %vm7704_vm1 = vcmask 203776  }
  0x87   :  { %v5204_v43 = vpop.permute.xlu0 %200  ;;  %v1063_v44 = vsel %vm1061_vm13, %v1053_v38, 0  ;;  %v1065_v51 = vsel %vm1061_vm13, %v1055_v42, 0  ;;  %vm5228_vm15 = vcmp.ne.s16.totalorder %v1097_v49, 0  ;;  %vm1060_vm7 = vcmp.ne.s16.totalorder %v1059_v23, 0  ;;  %v5375_v23 = vld [vmem:[%s7656_s0 + $0xc] sm:$0xff] }
  0x88   :  { %v5213_v46 = vpop.permute.xlu1 %1164  ;;  %v202_v50 = vrot.slane %v5204_v43, 4  ;;  %v4521_v52 = vcombine.low %v1063_v44, %v1065_v51  ;;  %v1102_v6 = vsel %vm5228_vm15, %v1092_v53, 0  ;;  %v1104_v7 = vsel %vm5228_vm15, %v1094_v58, 0  ;;  %v1161_v44 = vld [vmem:[%s7656_s0 + $0x10] sm:$0xf] }
  0x89   :  { %v1166_v31 = vrot.slane %v5213_v46, 4  ;;  %v4524_v35 = vcombine.low %v1102_v6, %v1104_v7  ;;  %v285_v51 = vld [vmem:[%s7656_s0 + $0x8] sm:$0xf]  ;;  %v287_v58 = vld [vmem:[%s7656_s0 + $0x20] sm:$0xf]  ;;  %v4445_v6 = vcombine.high %v83_v54, %v85_v56  ;;  %v1064_v9 = vsel %vm1060_vm7, %v5144_v22, 0 }
  0x8a   :  { %1083 = vrot.lane.b32.xlu1 %v4521_v52, %s4989_s23  ;;  %vm5250_vm2 = vcmp.ne.s16.totalorder %v202_v50, 0  ;;  %vm7699_vm15 = vcmask 711680  }
  0x8b   :  { %v5232_v55 = vpop.permute.xlu0 %247  ;;  %v208_v38 = vsel %vm5250_vm2, %v191_v3, 0  ;;  %v210_v29 = vsel %vm5250_vm2, %v193_v8, 0  ;;  %vm5313_vm6 = vcmp.ne.s16.totalorder %v1166_v31, 0 }
  0x8c   :  { %v249_v59 = vrot.slane %v5232_v55, 4  ;;  %v5243_v60 = vpop.permute.xlu1 %1203  ;;  %v4455_v48 = vcombine.low %v208_v38, %v210_v29  ;;  %v5388_v38 = vsel %vm7698_vm10, %v125_v40, %v5179_v30 }
  0x8d   :  { %v1205_v63 = vrot.slane %v5243_v60, 4 }
  0x8e   :  { %vm5263_vm3 = vcmp.ne.s16.totalorder %v249_v59, 0  ;;  %151 = vrot.lane.b32.xlu1 %v4449_v5, %s4988_s22  ;;  %v1062_v5 = vsel %vm1060_vm7, %v5139_v21, 0 }
  0x8f   :  { %vm5276_vm4 = vcmp.ne.s16.totalorder %v1205_v63, 0  ;;  %v255_v10 = vsel %vm5263_vm3, %v238_v61, 0  ;;  %v5288_v13 = vpop.permute.xlu0 %288  ;;  %v257_v25 = vsel %vm5263_vm3, %v240_v2, 0  ;;  %v1171_v61 = vsel %vm5313_vm6, %v1161_v44, 0  ;;  %v326_v44 = vld [vmem:[%s7656_s0 + $0x8] sm:$0xf] }
  0x90   :  { %v4458_v33 = vcombine.low %v255_v10, %v257_v25  ;;  %v1210_v39 = vsel %vm5276_vm4, %v1200_v11, 0  ;;  %v1212_v28 = vsel %vm5276_vm4, %v1202_v12, 0  ;;  %v290_v34 = vrot.slane %v5288_v13, 4  ;;  %v5309_v41 = vpop.permute.xlu1 %1242  ;;  %v1239_v25 = vld [vmem:[%s7656_s0 + $0x10] sm:$0xf] }
  0x91   :  { %v4533_v36 = vcombine.low %v1210_v39, %v1212_v28  ;;  %v1244_v57 = vrot.slane %v5309_v41, 4  ;;  %v1173_v2 = vsel %vm5313_vm6, %v1163_v47, 0  ;;  %v328_v47 = vld [vmem:[%s7656_s0 + $0x20] sm:$0xf]  ;;  %vm7709_vm6 = vcmp.ne.s16.totalorder %v5388_v38, 0 }
  0x92   :  { %275 = vrot.lane.b32.xlu0 %v4458_v33, %s4984_s18  ;;  %1122 = vrot.lane.b32.xlu1 %v4524_v35, %s4987_s21  ;;  %vm5329_vm8 = vcmp.ne.s16.totalorder %v290_v34, 0  ;;  %v4530_v10 = vcombine.low %v1171_v61, %v1173_v2  ;;  %v1241_v33 = vld [vmem:[%s7656_s0 + $0x28] sm:$0xf]  ;;  %v130_v2 = vsel %vm7709_vm6, %v5121_v18, 0 }
  0x93   :  { %v330_v52 = vpop.permute.xlu0 %329  ;;  %v296_v7 = vsel %vm5329_vm8, %v285_v51, 0  ;;  %v298_v8 = vsel %vm5329_vm8, %v287_v58, 0  ;;  %vm5359_vm11 = vcmp.ne.s16.totalorder %v1244_v57, 0  ;;  %v5380_v35 = vld [vmem:[%s7656_s0 + $0x24] sm:$0xff] }
  0x94   :  { %v331_v3 = vrot.slane %v330_v52, 4  ;;  %v4461_v39 = vcombine.low %v296_v7, %v298_v8  ;;  %v1249_v42 = vsel %vm5359_vm11, %v1239_v25, 0  ;;  %v1251_v30 = vsel %vm5359_vm11, %v1241_v33, 0 }
  0x95   :  { %v4536_v51 = vcombine.low %v1249_v42, %v1251_v30  ;;  %vm7700_vm11 = vcmask 72704   ;;  %v4519_v25 = vcombine.low %v1062_v5, %v1064_v9  ;;  %v1282_v30 = vpop.permute.xlu1 %1281 }
  0x96   :  { %1230 = vrot.lane.b32.xlu0 %v4533_v36, %s4983_s17  ;;  %228 = vrot.lane.b32.xlu1 %v4455_v48, %s4986_s20  ;;  %v5364_v12 = vsel %vm7702_vm9, %v331_v3, %v330_v52  ;;  %v4520_v36 = vcombine.high %v1062_v5, %v1064_v9  ;;  %vm5405_vm4 = vcmp.ne.s16.totalorder %v331_v3, 0  ;;  %v1098_v48 = vsel %vm7699_vm15, %v1097_v49, %v5193_v37 }
  0x97   :  { %vm334_vm13 = vcmp.ne.s16.totalorder %v5364_v12, 0  ;;  %v4444_v52 = vcombine.low %v83_v54, %v85_v56  ;;  %v337_v58 = vsel %vm5405_vm4, %v326_v44, 0  ;;  %v339_v61 = vsel %vm5405_vm4, %v328_v47, 0 }
  0x98   :  { %v5394_v28 = vsel %vm334_vm13, %v5375_v23, 0  ;;  %v5399_v29 = vsel %vm334_vm13, %v5380_v35, 0  ;;  %v132_v3 = vsel %vm7709_vm6, %v5126_v19, 0  ;;  %vm1099_vm7 = vcmp.ne.s16.totalorder %v1098_v48, 0 }
  0x99   :  { %v4464_v37 = vcombine.low %v337_v58, %v339_v61  ;;  %v4448_v49 = vcombine.high %v130_v2, %v132_v3  ;;  %v1101_v54 = vsel %vm1099_vm7, %v5139_v21, 0  ;;  %v1103_v56 = vsel %vm1099_vm7, %v5144_v22, 0  ;;  %v5512_v61 = vpop.permute.xlu1 %1350 }
  0x9a   :  { %102 = vrot.lane.b32.xlu0 %v4445_v6, %s4990_s24  ;;  %1191 = vrot.lane.b32.xlu1 %v4530_v10, %s4985_s19  ;;  %v5436_v6 = vpop.permute.xlu0 %400  ;;  %v5443_v7 = vsel %vm7700_vm11, %v202_v50, %v5204_v43  ;;  %v1167_v10 = vsel %vm7701_vm0, %v1166_v31, %v5213_v46  ;;  %v4523_v11 = vcombine.high %v1101_v54, %v1103_v56  ;;  %vm7703_vm7 = vcmask 80896  }
  0x9b   :  { %v402_v8 = vrot.slane %v5436_v6, 4  ;;  %vm7706_vm10 = vcmp.ne.s16.totalorder %v5443_v7, 0  ;;  %vm1168_vm11 = vcmp.ne.s16.totalorder %v1167_v10, 0  ;;  %vm7719_vm0 = vcmask 211968  }
  0x9c   :  { %v5477_v31 = vsel %vm7703_vm7, %v249_v59, %v5232_v55  ;;  %v4447_v5 = vcombine.low %v130_v2, %v132_v3  ;;  %vm7705_vm9 = vcmask 736256   ;;  %v209_v42 = vsel %vm7706_vm10, %v5126_v19, 0 }
  0x9d   :  { %v5455_v33 = vsel %vm7704_vm1, %v402_v8, %v5436_v6  ;;  %v1170_v44 = vsel %vm1168_vm11, %v5139_v21, 0  ;;  %v1172_v47 = vsel %vm1168_vm11, %v5144_v22, 0  ;;  %vm7707_vm7 = vcmp.ne.s16.totalorder %v5477_v31, 0 }
  0x9e   :  { %1081 = vrot.lane.b32.xlu0 %v4520_v36, %s4989_s23  ;;  %316 = vrot.lane.b32.xlu1 %v4461_v39, %s4982_s16  ;;  %vm405_vm15 = vcmp.ne.s16.totalorder %v5455_v33, 0  ;;  %v5471_v50 = vpop.permute.xlu0 %441  ;;  %v4522_v39 = vcombine.low %v1101_v54, %v1103_v56  ;;  %v207_v36 = vsel %vm7706_vm10, %v5121_v18, 0  ;;  %v1206_v59 = vsel %vm7705_vm9, %v1205_v63, %v5243_v60  ;;  %v5532_v56 = vpop.permute.xlu1 %1389  ;;  %v1386_v33 = vld [vmem:[%s7656_s0 + $0x10] sm:$0xf] }
  0x9f   :  { %v5464_v43 = vsel %vm405_vm15, %v5375_v23, 0  ;;  %v5469_v46 = vsel %vm405_vm15, %v5380_v35, 0  ;;  %v443_v9 = vrot.slane %v5471_v50, 4  ;;  %v4454_v48 = vcombine.high %v207_v36, %v209_v42 }
  0xa0   :  { %v4528_v58 = vcombine.low %v1170_v44, %v1172_v47  ;;  %v254_v60 = vsel %vm7707_vm7, %v5121_v18, 0  ;;  %v256_v63 = vsel %vm7707_vm7, %v5126_v19, 0  ;;  %vm1207_vm11 = vcmp.ne.s16.totalorder %v1206_v59, 0 }
  0xa1   :  { %v5493_v55 = vsel %vm7719_vm0, %v443_v9, %v5471_v50  ;;  %vm7708_vm9 = vcmask 179200   ;;  %v4529_v2 = vcombine.high %v1170_v44, %v1172_v47  ;;  %vm7711_vm10 = vcmask 834560  }
  0xa2   :  { %100 = vrot.lane.b32.xlu0 %v4444_v52, %s4990_s24  ;;  %1269 = vrot.lane.b32.xlu1 %v4536_v51, %s4981_s15  ;;  %vm446_vm1 = vcmp.ne.s16.totalorder %v5493_v55, 0  ;;  %v4457_v3 = vcombine.high %v254_v60, %v256_v63  ;;  %v5529_v54 = vsel %vm7708_vm9, %v290_v34, %v5288_v13  ;;  %v1245_v10 = vsel %vm7711_vm10, %v1244_v57, %v5309_v41  ;;  %v1278_v34 = vld [vmem:[%s7656_s0 + $0x10] sm:$0xf]  ;;  %v5586_v44 = vpop.permute.xlu0 %482 }
  0xa3   :  { %v5505_v51 = vsel %vm446_vm1, %v5375_v23, 0  ;;  %v5510_v52 = vsel %vm446_vm1, %v5380_v35, 0  ;;  %vm1246_vm7 = vcmp.ne.s16.totalorder %v1245_v10, 0  ;;  %vm7715_vm9 = vcmask 842752   ;;  %v1425_v55 = vld [vmem:[%s7656_s0 + $0x10] sm:$0xf] }
  0xa4   :  { %7767 = vst [vmem:[#allocation9_spill] sm:$0xff] %v5505_v51  ;;  %7768 = vst [vmem:[#allocation10_spill] sm:$0xff] %v5510_v52  ;;  %v1248_v47 = vsel %vm1246_vm7, %v5139_v21, 0  ;;  %v1250_v59 = vsel %vm1246_vm7, %v5144_v22, 0 }
  0xa5   :  { %v4535_v10 = vcombine.high %v1248_v47, %v1250_v59 }
  0xa6   :  { %149 = vrot.lane.b32.xlu0 %v4448_v49, %s4988_s22  ;;  %357 = vrot.lane.b32.xlu1 %v4464_v37, %s4980_s14  ;;  %v1209_v37 = vsel %vm1207_vm11, %v5139_v21, 0  ;;  %v1211_v49 = vsel %vm1207_vm11, %v5144_v22, 0  ;;  %vm7710_vm11 = vcmp.ne.s16.totalorder %v5529_v54, 0  ;;  %v5594_v12 = vpop.permute.xlu0 %523 }
  0xa7   :  { %v4531_v13 = vcombine.low %v1209_v37, %v1211_v49  ;;  %v295_v41 = vsel %vm7710_vm11, %v5121_v18, 0  ;;  %v297_v57 = vsel %vm7710_vm11, %v5126_v19, 0 }
  0xaa   :  { %1120 = vrot.lane.b32.xlu0 %v4523_v11, %s4987_s21  ;;  %1079 = vrot.lane.b32.xlu1 %v4519_v25, %s4989_s23  ;;  %v4453_v11 = vcombine.low %v207_v36, %v209_v42  ;;  %v4532_v25 = vcombine.high %v1209_v37, %v1211_v49  ;;  %v1280_v36 = vld [vmem:[%s7656_s0 + $0x28] sm:$0xf]  ;;  %v5557_v42 = vpop.permute.xlu1 %1428  ;;  %s5004_s23 = smov 8  }
  0xae   :  { %147 = vrot.lane.b32.xlu0 %v4447_v5, %s4988_s22  ;;  %1118 = vrot.lane.b32.xlu1 %v4522_v39, %s4987_s21  ;;  %v1283_v5 = vrot.slane %v1282_v30, 4  ;;  %v4456_v39 = vcombine.low %v254_v60, %v256_v63  ;;  %v5570_v37 = vpop.permute.xlu1 %1467  ;;  %s7795_s21 = smov 87  }
  0xb0   :  { %vm5544_vm6 = vcmp.ne.s16.totalorder %v1283_v5, 0 }
  0xb1   :  { %v1288_v60 = vsel %vm5544_vm6, %v1278_v34, 0  ;;  %v1290_v63 = vsel %vm5544_vm6, %v1280_v36, 0  ;;  %vm7718_vm6 = vcmask 859136  }
  0xb2   :  { %226 = vrot.lane.b32.xlu0 %v4454_v48, %s4986_s20  ;;  %1187 = vrot.lane.b32.xlu1 %v4528_v58, %s4985_s19  ;;  %v1284_v48 = vsel %vm7715_vm9, %v1283_v5, %v1282_v30  ;;  %v4460_v58 = vcombine.high %v295_v41, %v297_v57  ;;  %v336_v5 = vsel %vm334_vm13, %v5121_v18, 0  ;;  %v5582_v34 = vpop.permute.xlu1 %1536 }
  0xb3   :  { %vm1285_vm11 = vcmp.ne.s16.totalorder %v1284_v48, 0  ;;  %v1352_v48 = vrot.slane %v5512_v61, 4 }
  0xb4   :  { %v1287_v30 = vsel %vm1285_vm11, %v5139_v21, 0  ;;  %v1289_v49 = vsel %vm1285_vm11, %v5144_v22, 0 }
  0xb5   :  { %vm1355_vm7 = vcmp.ne.s16.totalorder %v1352_v48, 0 }
  0xb6   :  { %1189 = vrot.lane.b32.xlu0 %v4529_v2, %s4985_s19  ;;  %273 = vrot.lane.b32.xlu1 %v4457_v3, %s4984_s18  ;;  %v4534_v2 = vcombine.low %v1248_v47, %v1250_v59  ;;  %v4539_v3 = vcombine.low %v1288_v60, %v1290_v63  ;;  %v397_v59 = vld [vmem:[%s7656_s0 + $0x8] sm:$0xf]  ;;  %v1347_v60 = vld [vmem:[%s7656_s0 + $0x10] sm:$0xf]  ;;  %s7786_s19 = smov 10  }
  0xb7   :  { %v1349_v63 = vld [vmem:[%s7656_s0 + $0x28] sm:$0xf] }
  0xba   :  { %224 = vrot.lane.b32.xlu0 %v4453_v11, %s4986_s20  ;;  %1228 = vrot.lane.b32.xlu1 %v4532_v25, %s4983_s17  ;;  %v4537_v11 = vcombine.low %v1287_v30, %v1289_v49  ;;  %v4459_v25 = vcombine.low %v295_v41, %v297_v57  ;;  %v5591_v41 = vpop.permute.xlu1 %1575  ;;  %v4538_v57 = vcombine.high %v1287_v30, %v1289_v49  ;;  %v1357_v49 = vsel %vm1355_vm7, %v1347_v60, 0 }
  0xbe   :  { %1226 = vrot.lane.b32.xlu0 %v4531_v13, %s4983_s17  ;;  %271 = vrot.lane.b32.xlu1 %v4456_v39, %s4984_s18  ;;  %v338_v13 = vsel %vm334_vm13, %v5126_v19, 0  ;;  %s5000_s17 = smov 24   ;;  %v5598_v47 = vpop.permute.xlu1 %717  ;;  %vm5603_vm13 = vcmp.ne.s16.totalorder %v402_v8, 0  ;;  %v4918_v8 = vld [vmem:[%s7656_s0 + $0x8] ss:$24 sps:$4 sm:$0xff]  }
  0xbf   :  { %v4463_v39 = vcombine.high %v336_v5, %v338_v13  ;;  %v4462_v36 = vcombine.low %v336_v5, %v338_v13 }
  0xc2   :  { %314 = vrot.lane.b32.xlu0 %v4460_v58, %s4982_s16  ;;  %1265 = vrot.lane.b32.xlu1 %v4534_v2, %s4981_s15  ;;  %v5616_v58 = vpop.permute.xlu0 %594  ;;  %v5635_v2 = vpop.permute.xlu1 %179 }
  0xc6   :  { %1267 = vrot.lane.b32.xlu0 %v4535_v10, %s4981_s15  ;;  %1308 = vrot.lane.b32.xlu1 %v4539_v3, %s4979_s13  ;;  %s4999_s15 = smov 104   ;;  %v1353_v3 = vsel %vm7718_vm6, %v1352_v48, %v5512_v61  ;;  %v1359_v10 = vsel %vm1355_vm7, %v1349_v63, 0  ;;  %v5646_v5 = vpop.permute.xlu1 %1149  ;;  %vm5669_vm7 = vcmp.ne.s16.totalorder %v443_v9, 0  ;;  %v7773_v48 = vmov 0 }
  0xc7   :  { %vm1354_vm11 = vcmp.ne.s16.totalorder %v1353_v3, 0  ;;  %v7774_v48 = vsel %vm5669_vm7, 4294967295, %v7773_v48  ;;  %v1391_v9 = vrot.slane %v5532_v56, 4 }
  0xc8   :  { %7775 = vst [vmem:[#allocation11_spill] sm:$0xff] %v7774_v48 }
  0xc9   :  { %vm5701_vm10 = vcmp.ne.s16.totalorder %v1391_v9, 0 }
  0xca   :  { %312 = vrot.lane.b32.xlu0 %v4459_v25, %s4982_s16  ;;  %1304 = vrot.lane.b32.xlu1 %v4537_v11, %s4979_s13  ;;  %v5643_v11 = vpop.permute.xlu0 %635  ;;  %v4545_v25 = vcombine.low %v1357_v49, %v1359_v10  ;;  %v5706_v1 = vpop.permute.xlu1 %177 }
  0xce   :  { %355 = vrot.lane.b32.xlu0 %v4463_v39, %s4980_s14  ;;  %385 = vrot.lane.b32.xlu1 %v5134_v20, %s4999_s15  ;;  %v1356_v39 = vsel %vm1354_vm11, %v5139_v21, 0  ;;  %v5685_v60 = vpop.permute.xlu0 %676  ;;  %v1014_v20 = vld [vmem:[%s7656_s0 + $0x8] sm:$0xf] }
  0xd2   :  { %1306 = vrot.lane.b32.xlu0 %v4538_v57, %s4979_s13  ;;  %1335 = vrot.lane.b32.xlu1 %v5155_v24, %s5000_s17  ;;  %v399_v24 = vld [vmem:[%s7656_s0 + $0x20] sm:$0xf]  ;;  %v1358_v57 = vsel %vm1354_vm11, %v5144_v22, 0  ;;  %vm7727_vm11 = vcmask 867328   ;;  %v5717_v63 = vpop.permute.xlu0 %788  ;;  %s7790_s13 = smov 9  }
  0xd3   :  { %v410_v6 = vsel %vm5603_vm13, %v399_v24, 0  ;;  %v4543_v3 = vcombine.low %v1356_v39, %v1358_v57  ;;  %v484_v24 = vrot.slane %v5586_v44, 4 }
  0xd5   :  { %vm5730_vm9 = vcmp.ne.s16.totalorder %v484_v24, 0 }
  0xd6   :  { %353 = vrot.lane.b32.xlu0 %v4462_v36, %s4980_s14  ;;  %383 = vrot.lane.b32.xlu1 %v5164_v26, %s4999_s15  ;;  %v408_v26 = vsel %vm5603_vm13, %v397_v59, 0  ;;  %v5658_v36 = vld [vmem:[%s7656_s0] sm:$0xff]  ;;  %v5663_v59 = vld [vmem:[%s7656_s0 + $0x18] sm:$0xff] }
  0xd7   :  { %v4470_v30 = vcombine.low %v408_v26, %v410_v6  ;;  %v438_v26 = vld [vmem:[%s7656_s0 + $0x8] sm:$0xf]  ;;  %v440_v6 = vld [vmem:[%s7656_s0 + $0x20] sm:$0xf]  ;;  %v409_v49 = vsel %vm405_vm15, %v5663_v59, 0 }
  0xd8   :  { %v449_v10 = vsel %vm5669_vm7, %v438_v26, 0  ;;  %v1392_v26 = vsel %vm7727_vm11, %v1391_v9, %v5532_v56  ;;  %v5725_v56 = vpop.permute.xlu1 %829  ;;  %vm153_vm11 = vcmask 990208  }
  0xda   :  { %978 = vrot.lane.b32.xlu0 %v5073_v16, %s5001_s9  ;;  %1017 = vrot.lane.b32.xlu1 %v5078_v17, %s5002_s25  ;;  %v4919_v17 = vld [vmem:[%s7656_s0 + $0x10] ss:$24 sps:$4 sm:$0xff]  }
  0xde   :  { %387 = vrot.lane.b32.xlu0 %v4918_v8, %s4999_s15  ;;  %428 = vrot.lane.b32.xlu1 %v4470_v30, %s4978_s12  ;;  %v407_v30 = vsel %vm405_vm15, %v5658_v36, 0  ;;  %vm1393_vm15 = vcmp.ne.s16.totalorder %v1392_v26, 0  ;;  %v4544_v8 = vcombine.high %v1356_v39, %v1358_v57  ;;  %v481_v39 = vld [vmem:[%s7656_s0 + $0x20] sm:$0xf]  ;;  %v1430_v57 = vrot.slane %v5557_v42, 4 }
  0xdf   :  { %v1395_v9 = vsel %vm1393_vm15, %v5139_v21, 0  ;;  %v492_v26 = vsel %vm5730_vm9, %v481_v39, 0 }
  0xe2   :  { %1337 = vrot.lane.b32.xlu0 %v4919_v17, %s5000_s17  ;;  %1377 = vrot.lane.b32.xlu1 %v4545_v25, %s4977_s11  ;;  %v451_v17 = vsel %vm5669_vm7, %v440_v6, 0  ;;  %v4469_v6 = vcombine.high %v407_v30, %v409_v49  ;;  %v4468_v25 = vcombine.low %v407_v30, %v409_v49  ;;  %v5760_v49 = vpop.permute.xlu1 %909  ;;  %v520_v30 = vld [vmem:[%s7656_s0 + $0x8] sm:$0xf] }
  0xe3   :  { %v4473_v0 = vcombine.low %v449_v10, %v451_v17  ;;  %v1397_v10 = vsel %vm1393_vm15, %v5144_v22, 0  ;;  %vm5755_vm15 = vcmp.ne.s16.totalorder %v1430_v57, 0 }
  0xe6   :  { %1333 = vrot.lane.b32.xlu0 %v5168_v27, %s5000_s17  ;;  %1373 = vrot.lane.b32.xlu1 %v4543_v3, %s4977_s11  ;;  %v1388_v27 = vld [vmem:[%s7656_s0 + $0x28] sm:$0xf]  ;;  %v1396_v3 = vsel %vm5701_vm10, %v1386_v33, 0  ;;  %v448_v33 = vsel %vm446_vm1, %v5658_v36, 0  ;;  %s7828_s17 = smov 120  }
  0xe7   :  { %v1398_v50 = vsel %vm5701_vm10, %v1388_v27, 0  ;;  %vm7730_vm10 = vcmask 965632  }
  0xe8   :  { %v4548_v13 = vcombine.low %v1396_v3, %v1398_v50  ;;  %v5742_v50 = vpop.permute.xlu0 %181  ;;  %v1431_v3 = vsel %vm7730_vm10, %v1430_v57, %v5557_v42  ;;  %v4547_v42 = vcombine.high %v1395_v9, %v1397_v10  ;;  %v525_v57 = vrot.slane %v5594_v12, 4 }
  0xea   :  { %426 = vrot.lane.b32.xlu0 %v4469_v6, %s4978_s12  ;;  %469 = vrot.lane.b32.xlu1 %v4473_v0, %s4976_s10  ;;  %v479_v0 = vld [vmem:[%s7656_s0 + $0x8] sm:$0xf] }
  0xeb   :  { %v490_v27 = vsel %vm5730_vm9, %v479_v0, 0  ;;  %v1427_v6 = vld [vmem:[%s7656_s0 + $0x28] sm:$0xf]  ;;  %vm1432_vm9 = vcmp.ne.s16.totalorder %v1431_v3, 0 }
  0xec   :  { %v4476_v0 = vcombine.low %v490_v27, %v492_v26  ;;  %v5770_v39 = vpop.permute.xlu0 %1151  ;;  %v1434_v16 = vsel %vm1432_vm9, %v5139_v21, 0 }
  0xee   :  { %1375 = vrot.lane.b32.xlu0 %v4544_v8, %s4977_s11  ;;  %1416 = vrot.lane.b32.xlu1 %v4548_v13, %s7780_s27  ;;  %v4546_v8 = vcombine.low %v1395_v9, %v1397_v10  ;;  %v450_v13 = vsel %vm446_vm1, %v5663_v59, 0  ;;  %vm7731_vm1 = vcmask 310272   ;;  %v1469_v9 = vrot.slane %v5570_v37, 4 }
  0xef   :  { %v4472_v17 = vcombine.high %v448_v33, %v450_v13  ;;  %v486_v61 = vsel %vm7731_vm1, %v484_v24, %v5586_v44  ;;  %v522_v44 = vld [vmem:[%s7656_s0 + $0x20] sm:$0xf] }
  0xf0   :  { %vm487_vm6 = vcmp.ne.s16.totalorder %v486_v61, 0  ;;  %v5796_v10 = vpop.permute.xlu0 %1147  ;;  %v4471_v61 = vcombine.low %v448_v33, %v450_v13  ;;  %v1466_v33 = vld [vmem:[%s7656_s0 + $0x28] sm:$0xf]  ;;  %vm5811_vm0 = vcmp.ne.s16.totalorder %v1469_v9, 0 }
  0xf1   :  { %v1476_v52 = vsel %vm5811_vm0, %v1466_v33, 0 }
  0xf2   :  { %424 = vrot.lane.b32.xlu0 %v4468_v25, %s4978_s12  ;;  %1412 = vrot.lane.b32.xlu1 %v4546_v8, %s7780_s27  ;;  %v1435_v25 = vsel %vm5755_vm15, %v1425_v55, 0  ;;  %v1437_v8 = vsel %vm5755_vm15, %v1427_v6, 0  ;;  %vm5790_vm15 = vcmp.ne.s16.totalorder %v525_v57, 0  ;;  %v489_v55 = vsel %vm487_vm6, %v5121_v18, 0 }
  0xf3   :  { %v4551_v26 = vcombine.low %v1435_v25, %v1437_v8  ;;  %v491_v6 = vsel %vm487_vm6, %v5126_v19, 0  ;;  %v531_v25 = vsel %vm5790_vm15, %v520_v30, 0  ;;  %v533_v8 = vsel %vm5790_vm15, %v522_v44, 0 }
  0xf4   :  { %vm7732_vm6 = vcmask 318464   ;;  %v5818_v30 = vpop.permute.xlu0 %870  ;;  %v4475_v44 = vcombine.high %v489_v55, %v491_v6 }
  0xf6   :  { %467 = vrot.lane.b32.xlu0 %v4472_v17, %s4976_s10  ;;  %510 = vrot.lane.b32.xlu1 %v4476_v0, %s7783_s30  ;;  %v1436_v17 = vsel %vm1432_vm9, %v5144_v22, 0  ;;  %vm230_vm9 = vcmask 973824  }
  0xf7   :  { %v4549_v0 = vcombine.low %v1434_v16, %v1436_v17 }
  0xf8   :  { %v105_v27 = vpop.permute.xlu1 %104 }
  0xfa   :  { %1414 = vrot.lane.b32.xlu0 %v4547_v42, %s7780_s27  ;;  %1455 = vrot.lane.b32.xlu1 %v4551_v26, %s7786_s19  ;;  %v1464_v42 = vld [vmem:[%s7656_s0 + $0x10] sm:$0xf]  ;;  %v1470_v26 = vsel %vm230_vm9, %v1469_v9, %v5570_v37  ;;  %v4550_v9 = vcombine.high %v1434_v16, %v1436_v17 }
  0xfb   :  { %v1474_v15 = vsel %vm5811_vm0, %v1464_v42, 0  ;;  %vm1471_vm15 = vcmp.ne.s16.totalorder %v1470_v26, 0  ;;  %vm106_vm0 = vcmask 998400  }
  0xfc   :  { %v1084_v3 = vpop.permute.xlu1 %1083  ;;  %v1475_v42 = vsel %vm1471_vm15, %v5144_v22, 0 }
  0xfe   :  { %465 = vrot.lane.b32.xlu0 %v4471_v61, %s4976_s10  ;;  %1451 = vrot.lane.b32.xlu1 %v4549_v0, %s7786_s19  ;;  %v4479_v61 = vcombine.low %v531_v25, %v533_v8  ;;  %v527_v0 = vsel %vm7732_vm6, %v525_v57, %v5594_v12  ;;  %v4554_v25 = vcombine.low %v1474_v15, %v1476_v52  ;;  %v1473_v8 = vsel %vm1471_vm15, %v5139_v21, 0  ;;  %v4920_v15 = vld [vmem:[%s7656_s0 + $0x8] ss:$24 sps:$4 sm:$0xff]  }
  0xff   :  { %vm528_vm5 = vcmp.ne.s16.totalorder %v527_v0, 0  ;;  %v4474_v12 = vcombine.low %v489_v55, %v491_v6  ;;  %v4552_v57 = vcombine.low %v1473_v8, %v1475_v42  ;;  %v4921_v6 = vld [vmem:[%s7656_s0 + $0x10] ss:$24 sps:$4 sm:$0xff]  }
 0x100   :  { %v5820_v24 = vpop.permute.xlu1 %151  ;;  %v530_v13 = vsel %vm528_vm5, %v5121_v18, 0  ;;  %v532_v16 = vsel %vm528_vm5, %v5126_v19, 0  ;;  %vm7733_vm5 = vcmask 343040  }
 0x101   :  { %v4478_v52 = vcombine.high %v530_v13, %v532_v16 }
 0x102   :  { %508 = vrot.lane.b32.xlu0 %v4475_v44, %s7783_s30  ;;  %551 = vrot.lane.b32.xlu1 %v4479_v61, %s7789_s29  ;;  %v4553_v61 = vcombine.high %v1473_v8, %v1475_v42  ;;  %v593_v8 = vld [vmem:[%s7656_s0 + $0x20] sm:$0xf] }
 0x104   :  { %v5830_v37 = vpop.permute.xlu0 %275  ;;  %v5832_v51 = vpop.permute.xlu1 %1122 }
 0x106   :  { %1453 = vrot.lane.b32.xlu0 %v4550_v9, %s7786_s19  ;;  %1494 = vrot.lane.b32.xlu1 %v4554_v25, %s7790_s13  ;;  %v596_v9 = vrot.slane %v5616_v58, 4  ;;  %s5010_s19 = smov 1  }
 0x108   :  { %v5838_v33 = vpop.permute.xlu0 %1230  ;;  %v5842_v17 = vpop.permute.xlu1 %228  ;;  %vm5869_vm15 = vcmp.ne.s16.totalorder %v596_v9, 0 }
 0x109   :  { %v604_v48 = vsel %vm5869_vm15, %v593_v8, 0 }
 0x10a   :  { %506 = vrot.lane.b32.xlu0 %v4474_v12, %s7783_s30  ;;  %1490 = vrot.lane.b32.xlu1 %v4552_v57, %s7790_s13  ;;  %v1538_v57 = vrot.slane %v5582_v34, 4  ;;  %s7798_s30 = smov 7  }
 0x10c   :  { %v103_v26 = vpop.permute.xlu0 %102  ;;  %v5849_v44 = vpop.permute.xlu1 %1191  ;;  %vm5897_vm10 = vcmp.ne.s16.totalorder %v1538_v57, 0 }
 0x10d   :  { %v108_v55 = vsel %vm106_vm0, %v103_v26, %v105_v27  ;;  %v591_v27 = vld [vmem:[%s7656_s0 + $0x8] sm:$0xf] }
 0x10e   :  { %2109 = vmatprep.subr.bf16.mxu0 %v108_v55  ;;  %549 = vrot.lane.b32.xlu0 %v4478_v52, %s7789_s29 }
 0x10f   :  { %581 = vrot.lane.b32.xlu1 %v4920_v15, %s5003_s28  ;;  %v4477_v15 = vcombine.low %v530_v13, %v532_v16  ;;  %v1533_v13 = vld [vmem:[%s7656_s0 + $0x10] sm:$0xf]  ;;  %v1535_v16 = vld [vmem:[%s7656_s0 + $0x28] sm:$0xf] }
 0x110   :  { %v1082_v0 = vpop.permute.xlu0 %1081  ;;  %v5858_v25 = vpop.permute.xlu1 %316 }
 0x111   :  { %v1086_v12 = vsel %vm7733_vm5, %v1082_v0, %v1084_v3  ;;  %v4922_v3 = vld [vmem:[%s7656_s0 + $0x8] ss:$24 sps:$4 sm:$0xff]  }
 0x112   :  { %2215 = vmatprep.subr.bf16.mxu1 %v1086_v12  ;;  %1492 = vrot.lane.b32.xlu0 %v4553_v61, %s7790_s13  ;;  %v602_v12 = vsel %vm5869_vm15, %v591_v27, 0  ;;  %vm597_vm15 = vcmask 334848  }
 0x113   :  { %1523 = vrot.lane.b32.xlu1 %v4921_v6, %s5004_s23  ;;  %v5887_v6 = vcombine.high %v5658_v36, %v5663_v59 }
 0x114   :  { %v101_v52 = vpop.permute.xlu0 %100  ;;  %v5877_v55 = vpop.permute.xlu1 %1269 }
 0x115   :  { %v107_v61 = vsel %vm106_vm0, %v101_v52, %v103_v26  ;;  %v1539_v26 = vsel %vm153_vm11, %v1538_v57, %v5582_v34  ;;  %v1545_v34 = vsel %vm5897_vm10, %v1535_v16, 0  ;;  %v4925_v57 = vld [vmem:[%s7656_s0 + $0xc] ss:$24 sps:$4 sm:$0xff]  }
 0x116   :  { %547 = vrot.lane.b32.xlu0 %v4477_v15, %s7789_s29  ;;  %2110 = vmatpush1.bf16.msra.mxu0 %v107_v61  ;;  %v4485_v15 = vcombine.low %v602_v12, %v604_v48  ;;  %vm1540_vm1 = vcmp.ne.s16.totalorder %v1539_v26, 0  ;;  %v1543_v61 = vsel %vm5897_vm10, %v1533_v13, 0  ;;  %v598_v48 = vsel %vm597_vm15, %v596_v9, %v5616_v58  ;;  %s7807_s29 = smov 6  }
 0x117   :  { %1519 = vrot.lane.b32.xlu1 %v4922_v3, %s5004_s23  ;;  %v5919_v3 = vsel %vm1540_vm1, %v5139_v21, 0  ;;  %v637_v12 = vrot.slane %v5643_v11, 4  ;;  %v4560_v16 = vcombine.low %v1543_v61, %v1545_v34  ;;  %v5925_v27 = vsel %vm1540_vm1, %v5144_v22, 0  ;;  %v632_v21 = vld [vmem:[%s7656_s0 + $0x8] sm:$0xf] }
 0x118   :  { %v150_v8 = vpop.permute.xlu0 %149  ;;  %v5902_v42 = vpop.permute.xlu1 %357  ;;  %vm599_vm10 = vcmp.ne.s16.totalorder %v598_v48, 0  ;;  %v5931_v58 = vcombine.low %v5658_v36, %v5663_v59  ;;  %vm183_vm1 = vcmask 982016  }
 0x119   :  { %v155_v52 = vsel %vm153_vm11, %v150_v8, %v5820_v24  ;;  %vm5939_vm6 = vcmp.ne.s16.totalorder %v637_v12, 0  ;;  %v5949_v61 = vsel %vm599_vm10, %v5121_v18, 0  ;;  %v603_v34 = vsel %vm599_vm10, %v5126_v19, 0  ;;  %v1572_v18 = vld [vmem:[%s7656_s0 + $0x10] sm:$0xf] }
 0x11a   :  { %579 = vrot.lane.b32.xlu0 %v5887_v6, %s5003_s28  ;;  %2111 = vmatprep.subr.bf16.mxu0 %v155_v52  ;;  %v1574_v19 = vld [vmem:[%s7656_s0 + $0x28] sm:$0xf]  ;;  %v185_v48 = vsel %vm183_vm1, %v5635_v2, %v5742_v50 }
 0x11b   :  { %622 = vrot.lane.b32.xlu1 %v4485_v15, %s7795_s21  ;;  %v4558_v15 = vcombine.low %v5919_v3, %v5925_v27 }
 0x11c   :  { %v1121_v24 = vpop.permute.xlu0 %1120  ;;  %v1080_v13 = vpop.permute.xlu1 %1079 }
 0x11d   :  { %v1125_v26 = vsel %vm597_vm15, %v1121_v24, %v5832_v51  ;;  %v1085_v52 = vsel %vm7733_vm5, %v1080_v13, %v1082_v0  ;;  %v634_v51 = vld [vmem:[%s7656_s0 + $0x20] sm:$0xf]  ;;  %v1577_v0 = vrot.slane %v5591_v41, 4  ;;  %vm1153_vm5 = vcmask 326656  }
 0x11e   :  { %1521 = vrot.lane.b32.xlu0 %v4925_v57, %s5004_s23  ;;  %2216 = vmatpush1.bf16.msra.mxu1 %v1085_v52 }
 0x11f   :  { %1563 = vrot.lane.b32.xlu1 %v4560_v16, %s7798_s30  ;;  %2217 = vmatprep.subr.bf16.mxu1 %v1125_v26  ;;  %v643_v16 = vsel %vm5939_vm6, %v632_v21, 0  ;;  %v645_v26 = vsel %vm5939_vm6, %v634_v51, 0  ;;  %vm5967_vm10 = vcmp.ne.s16.totalorder %v1577_v0, 0  ;;  %v1578_v21 = vsel %vm106_vm0, %v1577_v0, %v5591_v41 }
 0x120   :  { %v148_v9 = vpop.permute.xlu0 %147  ;;  %v1119_v57 = vpop.permute.xlu1 %1118  ;;  %v4484_v51 = vcombine.high %v5949_v61, %v603_v34  ;;  %v1584_v41 = vsel %vm5967_vm10, %v1574_v19, 0  ;;  %v1154_v0 = vsel %vm1153_vm5, %v5796_v10, %v5646_v5  ;;  %vm1579_vm6 = vcmp.ne.s16.totalorder %v1578_v21, 0 }
 0x121   :  { %v154_v13 = vsel %vm153_vm11, %v148_v9, %v150_v8  ;;  %v1124_v52 = vsel %vm597_vm15, %v1119_v57, %v1121_v24  ;;  %v1155_v24 = vsel %vm1153_vm5, %v5646_v5, %v5770_v39  ;;  %v4488_v57 = vcombine.low %v643_v16, %v645_v26 }
 0x122   :  { %577 = vrot.lane.b32.xlu0 %v5931_v58, %s5003_s28  ;;  %2112 = vmatpush1.bf16.msra.mxu0 %v154_v13  ;;  %v1582_v39 = vsel %vm5967_vm10, %v1572_v18, 0  ;;  %vm7801_vm15 = vcmask 343040   ;;  %s7802_s28 = smov 86   ;;  %v678_v13 = vrot.slane %v5685_v60, 4  ;;  %vm7803_vm10 = vcmask 318464  }
 0x123   :  { %1559 = vrot.lane.b32.xlu1 %v4558_v15, %s7798_s30  ;;  %2218 = vmatpush1.bf16.msra.mxu1 %v1124_v52  ;;  %v184_v15 = vsel %vm183_vm1, %v5706_v1, %v5635_v2  ;;  %v639_v1 = vsel %vm7801_vm15, %v637_v12, %v5643_v11  ;;  %v4559_v2 = vcombine.high %v5919_v3, %v5925_v27  ;;  %vm7804_vm5 = vmmov %vm7803_vm10  ;;  %v4958_v11 = vld [vmem:[%s7656_s0 + $0x8] sm:$0xff]  ;;  %v4959_v3 = vld [vmem:[%s7656_s0 + $0x20] sm:$0xff] }
 0x124   :  { %2113 = vmatprep.subr.bf16.mxu0 %v185_v48  ;;  %2219 = vmatprep.subr.bf16.mxu1 %v1155_v24  ;;  %v227_v22 = vpop.permute.xlu0 %226  ;;  %v1188_v9 = vpop.permute.xlu1 %1187  ;;  %v4563_v26 = vcombine.low %v1582_v39, %v1584_v41  ;;  %v1581_v10 = vsel %vm1579_vm6, %v4958_v11, 0  ;;  %v1583_v12 = vsel %vm1579_vm6, %v4959_v3, 0  ;;  %vm640_vm15 = vcmp.ne.s16.totalorder %v639_v1, 0  ;;  %v675_v27 = vld [vmem:[%s7656_s0 + $0x20] sm:$0xf] }
 0x125   :  { %v232_v50 = vsel %vm230_vm9, %v227_v22, %v5842_v17  ;;  %v4483_v19 = vcombine.low %v5949_v61, %v603_v34  ;;  %v4561_v48 = vcombine.low %v1581_v10, %v1583_v12  ;;  %v642_v24 = vsel %vm640_vm15, %v5658_v36, 0 }
 0x126   :  { %620 = vrot.lane.b32.xlu0 %v4484_v51, %s7795_s21  ;;  %2114 = vmatpush1.bf16.msra.mxu0 %v184_v15  ;;  %v644_v21 = vsel %vm640_vm15, %v5663_v59, 0  ;;  %vm7808_vm6 = vcmask 310272   ;;  %vm7809_vm15 = vcmask 965632   ;;  %v719_v11 = vrot.slane %v5598_v47, 4 }
 0x127   :  { %663 = vrot.lane.b32.xlu1 %v4488_v57, %s7802_s28  ;;  %2220 = vmatpush1.bf16.msra.mxu1 %v1154_v0  ;;  %v4487_v39 = vcombine.high %v642_v24, %v644_v21 }
 0x128   :  { %2115 = vmatprep.subr.bf16.mxu0 %v232_v50  ;;  %v1190_v17 = vpop.permute.xlu0 %1189  ;;  %v274_v16 = vpop.permute.xlu1 %273  ;;  %v1613_v50 = vld [vmem:[%s7656_s0 + $0x2c] sm:$0xf] }
 0x129   :  { %v1194_v52 = vsel %vm7803_vm10, %v1190_v17, %v5849_v44  ;;  %v1193_v5 = vsel %vm7804_vm5, %v1188_v9, %v1190_v17  ;;  %v673_v44 = vld [vmem:[%s7656_s0 + $0x8] sm:$0xf]  ;;  %vm6016_vm10 = vcmp.ne.s16.totalorder %v678_v13, 0  ;;  %vm7734_vm5 = vcmask 441344  }
 0x12a   :  { %1561 = vrot.lane.b32.xlu0 %v4559_v2, %s7798_s30  ;;  %2221 = vmatprep.subr.bf16.mxu1 %v1194_v52  ;;  %v684_v57 = vsel %vm6016_vm10, %v673_v44, 0  ;;  %v686_v15 = vsel %vm6016_vm10, %v675_v27, 0  ;;  %v279_v34 = vsel %vm7809_vm15, %v274_v16, %v5830_v37  ;;  %vm7810_vm10 = vmmov %vm7808_vm6  ;;  %v680_v2 = vsel %vm7734_vm5, %v678_v13, %v5685_v60  ;;  %v4961_v27 = vld [vmem:[%s7656_s0 + $0x18] sm:$0xff]  ;;  %s5005_s30 = smov 72  }
 0x12b   :  { %1602 = vrot.lane.b32.xlu1 %v4563_v26, %s7807_s29  ;;  %2222 = vmatpush1.bf16.msra.mxu1 %v1193_v5  ;;  %v1617_v26 = vsel %vm5184_vm12, %v1613_v50, 0  ;;  %v4562_v52 = vcombine.high %v1581_v10, %v1583_v12  ;;  %v714_v10 = vld [vmem:[%s7656_s0 + $0x8] sm:$0xf]  ;;  %v716_v12 = vld [vmem:[%s7656_s0 + $0x20] sm:$0xf]  ;;  %vm720_vm5 = vcmask 449536  }
 0x12c   :  { %v225_v8 = vpop.permute.xlu0 %224  ;;  %v1229_v51 = vpop.permute.xlu1 %1228  ;;  %v721_v50 = vsel %vm720_vm5, %v719_v11, %v5598_v47  ;;  %v6109_v47 = vld [vmem:[%s7656_s0 + $0xc] sm:$0xff] }
 0x12d   :  { %v231_v9 = vsel %vm230_vm9, %v225_v8, %v227_v22  ;;  %v1233_v61 = vsel %vm7808_vm6, %v1229_v51, %v5838_v33  ;;  %v1611_v22 = vld [vmem:[%s7656_s0 + $0x14] sm:$0xf]  ;;  %v4491_v33 = vcombine.low %v684_v57, %v686_v15  ;;  %vm7811_vm6 = vmmov %vm7809_vm15  ;;  %vm681_vm15 = vcmp.ne.s16.totalorder %v680_v2, 0 }
 0x12e   :  { %618 = vrot.lane.b32.xlu0 %v4483_v19, %s7795_s21  ;;  %2116 = vmatpush1.bf16.msra.mxu0 %v231_v9  ;;  %v1615_v17 = vsel %vm5184_vm12, %v1611_v22, 0  ;;  %v685_v18 = vsel %vm681_vm15, %v4961_v27, 0 }
 0x12f   :  { %1598 = vrot.lane.b32.xlu1 %v4561_v48, %s7807_s29  ;;  %2223 = vmatprep.subr.bf16.mxu1 %v1233_v61  ;;  %v4566_v13 = vcombine.low %v1615_v17, %v1617_v26  ;;  %v6117_v17 = vld [vmem:[%s7656_s0 + $0x24] sm:$0xff] }
 0x130   :  { %2117 = vmatprep.subr.bf16.mxu0 %v279_v34  ;;  %v1227_v41 = vpop.permute.xlu0 %1226  ;;  %v272_v0 = vpop.permute.xlu1 %271 }
 0x131   :  { %v1232_v1 = vsel %vm7810_vm10, %v1227_v41, %v1229_v51  ;;  %v278_v37 = vsel %vm7811_vm6, %v272_v0, %v274_v16  ;;  %vm7812_vm10 = vcmask 867328   ;;  %vm7813_vm6 = vcmp.ne.s16.totalorder %v5291_v14, 0  ;;  %v4960_v14 = vld [vmem:[%s7656_s0] sm:$0xff] }
 0x132   :  { %661 = vrot.lane.b32.xlu0 %v4487_v39, %s7802_s28  ;;  %2224 = vmatpush1.bf16.msra.mxu1 %v1232_v1  ;;  %v1614_v3 = vsel %vm7813_vm6, %v5375_v23, 0  ;;  %vm7814_vm12 = vmmov %vm7813_vm6  ;;  %v683_v23 = vsel %vm681_vm15, %v4960_v14, 0  ;;  %vm7817_vm6 = vcmask 211968   ;;  %vm7819_vm15 = vcmask 867328  }
 0x133   :  { %704 = vrot.lane.b32.xlu1 %v4491_v33, %s5002_s25  ;;  %2118 = vmatpush1.bf16.msra.mxu0 %v278_v37  ;;  %v1616_v32 = vsel %vm7814_vm12, %v5380_v35, 0  ;;  %v4486_v35 = vcombine.low %v642_v24, %v644_v21  ;;  %vm7818_vm12 = vmmov %vm7817_vm6  ;;  %v1644_v21 = vld [vmem:[%s7656_s0 + $0x14] sm:$0xf]  ;;  %v4490_v57 = vcombine.high %v683_v23, %v685_v18 }
 0x134   :  { %v315_v5 = vpop.permute.xlu0 %314  ;;  %v1266_v60 = vpop.permute.xlu1 %1265  ;;  %v4564_v8 = vcombine.low %v1614_v3, %v1616_v32  ;;  %v1648_v39 = vsel %vm5208_vm14, %v1644_v21, 0  ;;  %v4565_v33 = vcombine.high %v1614_v3, %v1616_v32  ;;  %v4927_v32 = vld [vmem:[%s7656_s0 + $0x8] ss:$24 sps:$4 sm:$0xff]  }
 0x135   :  { %v320_v16 = vsel %vm7812_vm10, %v315_v5, %v5858_v25  ;;  %vm6067_vm10 = vcmp.ne.s16.totalorder %v719_v11, 0 }
 0x136   :  { %1600 = vrot.lane.b32.xlu0 %v4562_v52, %s7807_s29  ;;  %2119 = vmatprep.subr.bf16.mxu0 %v320_v16  ;;  %v725_v9 = vsel %vm6067_vm10, %v714_v10, 0  ;;  %v727_v24 = vsel %vm6067_vm10, %v716_v12, 0  ;;  %vm722_vm10 = vcmp.ne.s16.totalorder %v721_v50, 0 }
 0x137   :  { %1635 = vrot.lane.b32.xlu1 %v4566_v13, %s4990_s24  ;;  %v4494_v34 = vcombine.low %v725_v9, %v727_v24  ;;  %v724_v52 = vsel %vm722_vm10, %v4960_v14, 0 }
 0x138   :  { %v1268_v44 = vpop.permute.xlu0 %1267  ;;  %v1309_v19 = vpop.permute.xlu1 %1308 }
 0x139   :  { %v1272_v48 = vsel %vm7817_vm6, %v1268_v44, %v5877_v55  ;;  %v1271_v51 = vsel %vm7818_vm12, %v1266_v60, %v1268_v44  ;;  %v1646_v55 = vld [vmem:[%s7656_s0 + $0x2c] sm:$0xf]  ;;  %vm7820_vm6 = vcmask 859136   ;;  %vm7821_vm12 = vcmp.ne.s16.totalorder %v5388_v38, 0 }
 0x13a   :  { %659 = vrot.lane.b32.xlu0 %v4486_v35, %s7802_s28  ;;  %2225 = vmatprep.subr.bf16.mxu1 %v1272_v48  ;;  %v1650_v41 = vsel %vm5208_vm14, %v1646_v55, 0  ;;  %v1647_v45 = vsel %vm7821_vm12, %v6109_v47, 0  ;;  %vm7822_vm14 = vmmov %vm7821_vm12  ;;  %v726_v60 = vsel %vm722_vm10, %v4961_v27, 0  ;;  %vm7825_vm10 = vcmask 859136  }
 0x13b   :  { %1631 = vrot.lane.b32.xlu1 %v4564_v8, %s4990_s24  ;;  %2226 = vmatpush1.bf16.msra.mxu1 %v1271_v51  ;;  %v4569_v2 = vcombine.low %v1648_v39, %v1650_v41  ;;  %v1649_v26 = vsel %vm7822_vm14, %v6117_v17, 0  ;;  %v4493_v10 = vcombine.high %v724_v52, %v726_v60  ;;  %v790_v27 = vrot.slane %v5717_v63, 4  ;;  %v787_v8 = vld [vmem:[%s7656_s0 + $0x20] sm:$0xf]  ;;  %v6162_v51 = vld [vmem:[%s7656_s0 + $0xc] ss:$24 sps:$4 sm:$0xff]  }
 0x13c   :  { %v313_v15 = vpop.permute.xlu0 %312  ;;  %v1305_v61 = vpop.permute.xlu1 %1304  ;;  %v4567_v16 = vcombine.low %v1647_v45, %v1649_v26  ;;  %v4568_v44 = vcombine.high %v1647_v45, %v1649_v26  ;;  %v4492_v9 = vcombine.low %v724_v52, %v726_v60  ;;  %vm389_vm14 = vcmask 850944   ;;  %v828_v60 = vld [vmem:[%s7656_s0 + $0x20] sm:$0xf] }
 0x13d   :  { %v319_v22 = vsel %vm7819_vm15, %v313_v15, %v315_v5  ;;  %v4489_v5 = vcombine.low %v683_v23, %v685_v18  ;;  %vm7823_vm15 = vcmask 203776   ;;  %v4928_v23 = vld [vmem:[%s7656_s0 + $0x14] ss:$24 sps:$4 sm:$0xff]   ;;  %vm6154_vm12 = vcmp.ne.s16.totalorder %v790_v27, 0 }
 0x13e   :  { %702 = vrot.lane.b32.xlu0 %v4490_v57, %s5002_s25  ;;  %2120 = vmatpush1.bf16.msra.mxu0 %v319_v22  ;;  %v798_v57 = vsel %vm6154_vm12, %v787_v8, 0  ;;  %v831_v26 = vrot.slane %v5725_v56, 4 }
 0x13f   :  { %745 = vrot.lane.b32.xlu1 %v4494_v34, %s5001_s9  ;;  %v1708_v34 = vld [vmem:[%s7656_s0 + $0x2c] sm:$0xf] }
 0x140   :  { %v356_v0 = vpop.permute.xlu0 %355  ;;  %v386_v1 = vpop.permute.xlu1 %385 }
 0x141   :  { %v361_v37 = vsel %vm7820_vm6, %v356_v0, %v5902_v42  ;;  %v4936_v42 = vld [vmem:[%s7657_s1 + $0x4] ss:$16 sps:$4 sm:$0xff]   ;;  %vm7824_vm6 = vmmov %vm7823_vm15 }
 0x142   :  { %1633 = vrot.lane.b32.xlu0 %v4565_v33, %s4990_s24  ;;  %2121 = vmatprep.subr.bf16.mxu0 %v361_v37  ;;  %s5012_s24 = smov 17  }
 0x143   :  { %1668 = vrot.lane.b32.xlu1 %v4569_v2, %s4988_s22  ;;  %2247 = vmatprep.mubr.bf16.mxu1 %v4936_v42  ;;  %v1712_v2 = vsel %vm5250_vm2, %v1708_v34, 0 }
 0x144   :  { %v1307_v11 = vpop.permute.xlu0 %1306  ;;  %v1336_v13 = vpop.permute.xlu1 %1335  ;;  %2141 = vmatprep.mubr.bf16.mxu0 %v4936_v42 }
 0x145   :  { %v1311_v38 = vsel %vm7823_vm15, %v1307_v11, %v1309_v19  ;;  %v1310_v3 = vsel %vm7824_vm6, %v1305_v61, %v1307_v11  ;;  %v785_v19 = vld [vmem:[%s7656_s0 + $0x8] sm:$0xf]  ;;  %vm1339_vm15 = vcmask 195584   ;;  %v1706_v61 = vld [vmem:[%s7656_s0 + $0x14] sm:$0xf]  ;;  %vm791_vm6 = vcmask 465920  }
 0x146   :  { %700 = vrot.lane.b32.xlu0 %v4489_v5, %s5002_s25  ;;  %2227 = vmatprep.subr.bf16.mxu1 %v1311_v38  ;;  %v796_v55 = vsel %vm6154_vm12, %v785_v19, 0  ;;  %v1710_v33 = vsel %vm5250_vm2, %v1706_v61, 0  ;;  %v792_v37 = vsel %vm791_vm6, %v790_v27, %v5717_v63  ;;  %s7829_s25 = smov 71   ;;  %vm7830_vm2 = vcmp.ne.s16.totalorder %v5443_v7, 0  ;;  %v826_v63 = vld [vmem:[%s7656_s0 + $0x8] sm:$0xf] }
 0x147   :  { %1664 = vrot.lane.b32.xlu1 %v4567_v16, %s4988_s22  ;;  %2228 = vmatpush1.bf16.msra.mxu1 %v1310_v3  ;;  %v4500_v41 = vcombine.low %v796_v55, %v798_v57  ;;  %v4575_v52 = vcombine.low %v1710_v33, %v1712_v2  ;;  %v1709_v62 = vsel %vm7830_vm2, %v6109_v47, 0  ;;  %vm793_vm12 = vcmp.ne.s16.totalorder %v792_v37, 0 }
 0x148   :  { %v354_v12 = vpop.permute.xlu0 %353  ;;  %v384_v25 = vpop.permute.xlu1 %383  ;;  %v795_v16 = vsel %vm793_vm12, %v5658_v36, 0  ;;  %v797_v38 = vsel %vm793_vm12, %v5663_v59, 0  ;;  %vm7835_vm12 = vcmask 187392   ;;  %v872_v61 = vrot.slane %v5818_v30, 4 }
 0x149   :  { %v360_v14 = vsel %vm7825_vm10, %v354_v12, %v356_v0  ;;  %v390_v15 = vsel %vm389_vm14, %v384_v25, %v386_v1  ;;  %vm7831_vm10 = vmmov %vm7830_vm2  ;;  %vm7834_vm2 = vcmask 842752  }
 0x14a   :  { %743 = vrot.lane.b32.xlu0 %v4493_v10, %s5001_s9  ;;  %2122 = vmatpush1.bf16.msra.mxu0 %v360_v14  ;;  %v1711_v11 = vsel %vm7831_vm10, %v6117_v17, 0  ;;  %v1739_v14 = vld [vmem:[%s7656_s0 + $0x14] sm:$0xf]  ;;  %vm832_vm10 = vcmask 474112  }
 0x14b   :  { %775 = vrot.lane.b32.xlu1 %v4927_v32, %s5005_s30  ;;  %v4573_v32 = vcombine.low %v1709_v62, %v1711_v11  ;;  %v833_v55 = vsel %vm832_vm10, %v831_v26, %v5725_v56  ;;  %v867_v56 = vld [vmem:[%s7656_s0 + $0x8] sm:$0xf] }
 0x14c   :  { %v6142_v35 = vpop.permute.xlu0 %978  ;;  %v6145_v18 = vpop.permute.xlu1 %1017 }
 0x14e   :  { %1666 = vrot.lane.b32.xlu0 %v4568_v44, %s4988_s22  ;;  %v4499_v44 = vcombine.high %v795_v16, %v797_v38  ;;  %s5008_s22 = smov 113  }
 0x14f   :  { %1697 = vrot.lane.b32.xlu1 %v4928_v23, %s7828_s17  ;;  %v1741_v23 = vld [vmem:[%s7656_s0 + $0x2c] sm:$0xf] }
 0x150   :  { %v388_v24 = vpop.permute.xlu0 %387  ;;  %v429_v21 = vpop.permute.xlu1 %428 }
 0x151   :  { %v391_v22 = vsel %vm389_vm14, %v386_v1, %v388_v24  ;;  %v6189_v1 = vld [vmem:[%s7656_s0 + $0x10] ss:$24 sps:$4 sm:$0xff]   ;;  %v1743_v24 = vsel %vm5263_vm3, %v1739_v14, 0 }
 0x152   :  { %741 = vrot.lane.b32.xlu0 %v4492_v9, %s5001_s9  ;;  %2123 = vmatprep.subr.bf16.mxu0 %v391_v22  ;;  %s5006_s9 = smov 56  }
 0x153   :  { %1693 = vrot.lane.b32.xlu1 %v6162_v51, %s7828_s17  ;;  %2124 = vmatpush1.bf16.msra.mxu0 %v390_v15  ;;  %v4574_v15 = vcombine.high %v1709_v62, %v1711_v11 }
 0x154   :  { %v1338_v50 = vpop.permute.xlu0 %1337  ;;  %v1378_v39 = vpop.permute.xlu1 %1377 }
 0x155   :  { %v1341_v0 = vsel %vm1339_vm15, %v1336_v13, %v1338_v50 }
 0x156   :  { %773 = vrot.lane.b32.xlu0 %v5887_v6, %s5005_s30  ;;  %2229 = vmatprep.subr.bf16.mxu1 %v1341_v0 }
 0x157   :  { %816 = vrot.lane.b32.xlu1 %v4500_v41, %s7829_s25  ;;  %v869_v41 = vld [vmem:[%s7656_s0 + $0x20] sm:$0xf] }
 0x158   :  { %v1334_v45 = vpop.permute.xlu0 %1333  ;;  %v1374_v42 = vpop.permute.xlu1 %1373 }
 0x159   :  { %v1340_v5 = vsel %vm1339_vm15, %v1334_v45, %v1336_v13  ;;  %vm6210_vm15 = vcmp.ne.s16.totalorder %v831_v26, 0 }
 0x15a   :  { %1695 = vrot.lane.b32.xlu0 %v6189_v1, %s7828_s17  ;;  %2230 = vmatpush1.bf16.msra.mxu1 %v1340_v5  ;;  %v837_v12 = vsel %vm6210_vm15, %v826_v63, 0  ;;  %v839_v25 = vsel %vm6210_vm15, %v828_v60, 0  ;;  %vm7836_vm15 = vmmov %vm7835_vm12  ;;  %s5007_s17 = smov 111  }
 0x15b   :  { %1730 = vrot.lane.b32.xlu1 %v4575_v52, %s4986_s20  ;;  %v4503_v8 = vcombine.low %v837_v12, %v839_v25  ;;  %v911_v12 = vrot.slane %v5760_v49, 4 }
 0x15c   :  { %v427_v7 = vpop.permute.xlu0 %426  ;;  %v470_v3 = vpop.permute.xlu1 %469 }
 0x15d   :  { %v432_v10 = vsel %vm7834_vm2, %v427_v7, %v429_v21  ;;  %v1745_v21 = vsel %vm5263_vm3, %v1741_v23, 0 }
 0x15e   :  { %771 = vrot.lane.b32.xlu0 %v5931_v58, %s5005_s30  ;;  %2125 = vmatprep.subr.bf16.mxu0 %v432_v10  ;;  %s7837_s30 = smov 70   ;;  %v4578_v22 = vcombine.low %v1743_v24, %v1745_v21 }
 0x15f   :  { %1726 = vrot.lane.b32.xlu1 %v4573_v32, %s4986_s20 }
 0x160   :  { %v1376_v27 = vpop.permute.xlu0 %1375  ;;  %v1417_v19 = vpop.permute.xlu1 %1416 }
 0x161   :  { %v1380_v48 = vsel %vm7835_vm12, %v1376_v27, %v1378_v39  ;;  %v1379_v9 = vsel %vm7836_vm15, %v1374_v42, %v1376_v27  ;;  %vm7838_vm12 = vcmp.ne.s16.totalorder %v5477_v31, 0  ;;  %vm834_vm15 = vcmp.ne.s16.totalorder %v833_v55, 0  ;;  %v908_v27 = vld [vmem:[%s7656_s0 + $0x20] sm:$0xf] }
 0x162   :  { %814 = vrot.lane.b32.xlu0 %v4499_v44, %s7829_s25  ;;  %2231 = vmatprep.subr.bf16.mxu1 %v1380_v48  ;;  %v1742_v39 = vsel %vm7838_vm12, %v6109_v47, 0  ;;  %vm7839_vm3 = vmmov %vm7838_vm12  ;;  %v4498_v31 = vcombine.low %v795_v16, %v797_v38  ;;  %v836_v2 = vsel %vm834_vm15, %v5658_v36, 0  ;;  %v838_v37 = vsel %vm834_vm15, %v5663_v59, 0  ;;  %v1772_v36 = vld [vmem:[%s7656_s0 + $0x14] sm:$0xf]  ;;  %v6315_v48 = vld [vmem:[%s7656_s0 + $0x18] sm:$0xff] }
 0x163   :  { %857 = vrot.lane.b32.xlu1 %v4503_v8, %s7837_s30  ;;  %2232 = vmatpush1.bf16.msra.mxu1 %v1379_v9  ;;  %v1744_v4 = vsel %vm7839_vm3, %v6117_v17, 0  ;;  %vm7842_vm12 = vcmask 834560   ;;  %v1774_v59 = vld [vmem:[%s7656_s0 + $0x2c] sm:$0xf]  ;;  %v4502_v62 = vcombine.high %v836_v2, %v838_v37  ;;  %vm859_vm3 = vcmask 572416  }
 0x164   :  { %v425_v57 = vpop.permute.xlu0 %424  ;;  %v1413_v34 = vpop.permute.xlu1 %1412  ;;  %v4576_v26 = vcombine.low %v1742_v39, %v1744_v4  ;;  %vm7843_vm15 = vcmask 179200   ;;  %v1776_v16 = vsel %vm5329_vm8, %v1772_v36, 0  ;;  %v1778_v38 = vsel %vm5329_vm8, %v1774_v59, 0 }
 0x165   :  { %v431_v50 = vsel %vm7834_vm2, %v425_v57, %v427_v7  ;;  %vm6256_vm2 = vcmp.ne.s16.totalorder %v872_v61, 0  ;;  %v4577_v10 = vcombine.high %v1742_v39, %v1744_v4  ;;  %v4581_v14 = vcombine.low %v1776_v16, %v1778_v38 }
 0x166   :  { %1728 = vrot.lane.b32.xlu0 %v4574_v15, %s4986_s20  ;;  %2126 = vmatpush1.bf16.msra.mxu0 %v431_v50  ;;  %v877_v52 = vsel %vm6256_vm2, %v867_v56, 0  ;;  %v879_v5 = vsel %vm6256_vm2, %v869_v41, 0  ;;  %vm7844_vm2 = vmmov %vm7843_vm15  ;;  %v980_v38 = vrot.slane %v6142_v35, 4 }
 0x167   :  { %1763 = vrot.lane.b32.xlu1 %v4578_v22, %s4984_s18  ;;  %v4506_v60 = vcombine.low %v877_v52, %v879_v5 }
 0x168   :  { %v468_v33 = vpop.permute.xlu0 %467  ;;  %v511_v45 = vpop.permute.xlu1 %510 }
 0x169   :  { %v473_v42 = vsel %vm7842_vm12, %v468_v33, %v470_v3  ;;  %v873_v3 = vsel %vm859_vm3, %v872_v61, %v5818_v30  ;;  %v906_v30 = vld [vmem:[%s7656_s0 + $0x8] sm:$0xf]  ;;  %v1805_v61 = vld [vmem:[%s7656_s0 + $0x14] sm:$0xf] }
 0x16a   :  { %812 = vrot.lane.b32.xlu0 %v4498_v31, %s7829_s25  ;;  %2127 = vmatprep.subr.bf16.mxu0 %v473_v42  ;;  %s7845_s25 = smov 58   ;;  %v1809_v0 = vsel %vm5405_vm4, %v1805_v61, 0 }
 0x16b   :  { %1759 = vrot.lane.b32.xlu1 %v4576_v26, %s4984_s18 }
 0x16c   :  { %v1415_v11 = vpop.permute.xlu0 %1414  ;;  %v1456_v63 = vpop.permute.xlu1 %1455 }
 0x16d   :  { %v1419_v13 = vsel %vm7843_vm15, %v1415_v11, %v1417_v19  ;;  %v1418_v7 = vsel %vm7844_vm2, %v1413_v34, %v1415_v11  ;;  %vm7846_vm15 = vcmp.ne.s16.totalorder %v5529_v54, 0  ;;  %vm874_vm2 = vcmp.ne.s16.totalorder %v873_v3, 0  ;;  %v1807_v34 = vld [vmem:[%s7656_s0 + $0x2c] sm:$0xf]  ;;  %v4932_v11 = vld [vmem:[%s7656_s0 + $0x8] ss:$24 sps:$4 sm:$0xff]  }
 0x16e   :  { %855 = vrot.lane.b32.xlu0 %v4502_v62, %s7837_s30  ;;  %2233 = vmatprep.subr.bf16.mxu1 %v1419_v13  ;;  %v1775_v44 = vsel %vm7846_vm15, %v6109_v47, 0  ;;  %vm7847_vm8 = vmmov %vm7846_vm15  ;;  %v4501_v54 = vcombine.low %v836_v2, %v838_v37  ;;  %v878_v9 = vsel %vm874_vm2, %v6315_v48, 0  ;;  %vm7850_vm15 = vcmask 736256   ;;  %v4933_v3 = vld [vmem:[%s7656_s0 + $0x14] ss:$24 sps:$4 sm:$0xff]  }
 0x16f   :  { %897 = vrot.lane.b32.xlu1 %v4506_v60, %s7845_s25  ;;  %2234 = vmatpush1.bf16.msra.mxu1 %v1418_v7  ;;  %v1777_v53 = vsel %vm7847_vm8, %v6117_v17, 0  ;;  %v6309_v17 = vld [vmem:[%s7656_s0] sm:$0xff]  ;;  %vm818_vm8 = vcmask 580608   ;;  %v1811_v31 = vsel %vm5405_vm4, %v1807_v34, 0  ;;  %vm7854_vm4 = vcmask 728064  }
 0x170   :  { %v466_v32 = vpop.permute.xlu0 %465  ;;  %v1452_v25 = vpop.permute.xlu1 %1451  ;;  %v876_v8 = vsel %vm874_vm2, %v6309_v17, 0  ;;  %v4579_v21 = vcombine.low %v1775_v44, %v1777_v53  ;;  %vm7851_vm2 = vcmask 80896   ;;  %v4580_v37 = vcombine.high %v1775_v44, %v1777_v53 }
 0x171   :  { %v472_v23 = vsel %vm7842_vm12, %v466_v32, %v468_v33  ;;  %vm6301_vm12 = vcmp.ne.s16.totalorder %v911_v12, 0  ;;  %v4505_v22 = vcombine.high %v876_v8, %v878_v9  ;;  %v912_v33 = vsel %vm818_vm8, %v911_v12, %v5760_v49 }
 0x172   :  { %1761 = vrot.lane.b32.xlu0 %v4577_v10, %s4984_s18  ;;  %2128 = vmatpush1.bf16.msra.mxu0 %v472_v23  ;;  %v916_v57 = vsel %vm6301_vm12, %v906_v30, 0  ;;  %v918_v15 = vsel %vm6301_vm12, %v908_v27, 0  ;;  %vm7852_vm12 = vmmov %vm7851_vm2  ;;  %v4584_v26 = vcombine.low %v1809_v0, %v1811_v31  ;;  %v4504_v40 = vcombine.low %v876_v8, %v878_v9  ;;  %v977_v23 = vld [vmem:[%s7656_s0 + $0x20] sm:$0xf]  ;;  %s7862_s18 = smov 55  }
 0x173   :  { %1796 = vrot.lane.b32.xlu1 %v4581_v14, %s4982_s16  ;;  %v4509_v4 = vcombine.low %v916_v57, %v918_v15  ;;  %v7855_v62 = vcombine.low %v5394_v28, %v5399_v29  ;;  %v975_v14 = vld [vmem:[%s7656_s0 + $0x8] sm:$0xf]  ;;  %v1019_v34 = vrot.slane %v6145_v18, 4 }
 0x174   :  { %v509_v47 = vpop.permute.xlu0 %508  ;;  %v552_v24 = vpop.permute.xlu1 %551 }
 0x175   :  { %v514_v55 = vsel %vm7850_vm15, %v509_v47, %v511_v45 }
 0x176   :  { %853 = vrot.lane.b32.xlu0 %v4501_v54, %s7837_s30  ;;  %2129 = vmatprep.subr.bf16.mxu0 %v514_v55  ;;  %s7853_s30 = smov 57   ;;  %v1867_v54 = vld [vmem:[%s7656_s0 + $0x14] sm:$0xf] }
 0x177   :  { %1792 = vrot.lane.b32.xlu1 %v4579_v21, %s4982_s16 }
 0x178   :  { %v1454_v50 = vpop.permute.xlu0 %1453  ;;  %v1495_v39 = vpop.permute.xlu1 %1494 }
 0x179   :  { %v1458_v56 = vsel %vm7851_vm2, %v1454_v50, %v1456_v63  ;;  %v1457_v41 = vsel %vm7852_vm12, %v1452_v25, %v1454_v50  ;;  %vm913_vm2 = vcmp.ne.s16.totalorder %v912_v33, 0  ;;  %vm7856_vm12 = vcmask 72704  }
 0x17a   :  { %895 = vrot.lane.b32.xlu0 %v4505_v22, %s7845_s25  ;;  %2235 = vmatprep.subr.bf16.mxu1 %v1458_v56  ;;  %v915_v5 = vsel %vm913_vm2, %v6309_v17, 0  ;;  %v917_v49 = vsel %vm913_vm2, %v6315_v48, 0  ;;  %vm7858_vm2 = vmmov %vm7854_vm4  ;;  %v7859_v25 = vcombine.high %v5394_v28, %v5399_v29 }
 0x17b   :  { %936 = vrot.lane.b32.xlu1 %v4509_v4, %s7853_s30  ;;  %2236 = vmatpush1.bf16.msra.mxu1 %v1457_v41  ;;  %v4508_v63 = vcombine.high %v915_v5, %v917_v49  ;;  %v4507_v53 = vcombine.low %v915_v5, %v917_v49 }
 0x17c   :  { %v507_v2 = vpop.permute.xlu0 %506  ;;  %v1491_v45 = vpop.permute.xlu1 %1490 }
 0x17d   :  { %v513_v42 = vsel %vm7850_vm15, %v507_v2, %v509_v47  ;;  %vm7857_vm15 = vmmov %vm7856_vm12  ;;  %v1869_v47 = vld [vmem:[%s7656_s0 + $0x2c] sm:$0xf]  ;;  %v7866_v2 = vcombine.low %v5464_v43, %v5469_v46 }
 0x17e   :  { %1794 = vrot.lane.b32.xlu0 %v4580_v37, %s4982_s16  ;;  %2130 = vmatpush1.bf16.msra.mxu0 %v513_v42  ;;  %v1873_v57 = vsel %vm5603_vm13, %v1869_v47, 0  ;;  %v1900_v37 = vld [vmem:[%s7656_s0 + $0x14] sm:$0xf]  ;;  %v7880_v47 = vlaneseq }
 0x17f   :  { %1829 = vrot.lane.b32.xlu1 %v4584_v26, %s4980_s14 }
 0x180   :  { %v550_v52 = vpop.permute.xlu0 %549 }
 0x181   :  { %v582_v36 = vpop.permute.xlu1 %581  ;;  %v555_v59 = vsel %vm7854_vm4, %v550_v52, %v552_v24  ;;  %vm583_vm4 = vcmask 719872  }
 0x182   :  { %893 = vrot.lane.b32.xlu0 %v4504_v40, %s7845_s25  ;;  %2131 = vmatprep.subr.bf16.mxu0 %v555_v59 }
 0x183   :  { %1825 = vrot.lane.b32.xlu1 %v7855_v62, %s4980_s14 }
 0x184   :  { %v1493_v60 = vpop.permute.xlu0 %1492 }
 0x185   :  { %v1524_v13 = vpop.permute.xlu1 %1523  ;;  %v1497_v7 = vsel %vm7856_vm12, %v1493_v60, %v1495_v39  ;;  %v1496_v16 = vsel %vm7857_vm15, %v1491_v45, %v1493_v60  ;;  %vm6374_vm12 = vcmp.ne.s16.totalorder %v980_v38, 0  ;;  %vm1525_vm15 = vcmask 64512   ;;  %v1902_v45 = vld [vmem:[%s7656_s0 + $0x2c] sm:$0xf] }
 0x186   :  { %934 = vrot.lane.b32.xlu0 %v4508_v63, %s7853_s30  ;;  %2237 = vmatprep.subr.bf16.mxu1 %v1497_v7  ;;  %v985_v27 = vsel %vm6374_vm12, %v975_v14, 0  ;;  %v987_v19 = vsel %vm6374_vm12, %v977_v23, 0  ;;  %v1906_v59 = vsel %vm5669_vm7, %v1902_v45, 0  ;;  %v7871_v7 = vcombine.high %v5464_v43, %v5469_v46  ;;  %v4942_v45 = vld [vmem:[%s7657_s1 + $0xc] ss:$16 sps:$4 sm:$0xff]  }
 0x187   :  { %965 = vrot.lane.b32.xlu1 %v4932_v11, %s5006_s9  ;;  %2238 = vmatpush1.bf16.msra.mxu1 %v1496_v16  ;;  %v4515_v24 = vcombine.low %v985_v27, %v987_v19 }
 0x188   :  { %v548_v32 = vpop.permute.xlu0 %547 }
 0x189   :  { %v1520_v10 = vpop.permute.xlu1 %1519  ;;  %v554_v12 = vsel %vm7858_vm2, %v548_v32, %v550_v52  ;;  %vm747_vm2 = vcmask 596992  }
 0x18a   :  { %1827 = vrot.lane.b32.xlu0 %v7859_v25, %s4980_s14  ;;  %2132 = vmatpush1.bf16.msra.mxu0 %v554_v12  ;;  %v981_v15 = vsel %vm747_vm2, %v980_v38, %v6142_v35  ;;  %v1016_v35 = vld [vmem:[%s7656_s0 + $0x20] sm:$0xf]  ;;  %s7870_s0 = smov 54   ;;  %v7873_v12 = vld [vmem:[#allocation9_spill] sm:$0xff]  ;;  %v7874_v25 = vld [vmem:[#allocation10_spill] sm:$0xff] }
 0x18b   :  { %1858 = vrot.lane.b32.xlu1 %v4933_v3, %s4999_s15  ;;  %vm982_vm12 = vcmp.ne.s16.totalorder %v981_v15, 0  ;;  %v7875_v43 = vcombine.low %v7873_v12, %v7874_v25 }
 0x18c   :  { %v580_v30 = vpop.permute.xlu0 %579  ;;  %v984_v56 = vsel %vm982_vm12, %v6309_v17, 0 }
 0x18d   :  { %v623_v28 = vpop.permute.xlu1 %622  ;;  %v585_v29 = vsel %vm583_vm4, %v580_v30, %v582_v36  ;;  %v1904_v36 = vsel %vm5669_vm7, %v1900_v37, 0  ;;  %vm7872_vm7 = vcmask 703488   ;;  %v4939_v37 = vld [vmem:[%s7657_s1 + $0x20] ss:$16 sps:$4 sm:$0xff]  }
 0x18e   :  { %932 = vrot.lane.b32.xlu0 %v4507_v53, %s7853_s30  ;;  %2133 = vmatprep.subr.bf16.mxu0 %v585_v29  ;;  %v4593_v60 = vcombine.low %v1904_v36, %v1906_v59  ;;  %s5013_s30 = smov 16  }
 0x18f   :  { %1854 = vrot.lane.b32.xlu1 %v6162_v51, %s4999_s15  ;;  %v1871_v51 = vsel %vm5603_vm13, %v1867_v54, 0  ;;  %vm6412_vm13 = vcmp.ne.s16.totalorder %v1019_v34, 0 }
 0x190   :  { %v1522_v8 = vpop.permute.xlu0 %1521  ;;  %v4590_v50 = vcombine.low %v1871_v51, %v1873_v57  ;;  %v1024_v31 = vsel %vm6412_vm13, %v1014_v20, 0  ;;  %v1026_v33 = vsel %vm6412_vm13, %v1016_v35, 0  ;;  %v2043_v20 = vld [vmem:[%s7658_s2 + $0x18] sm:$0xff]  ;;  %v7881_v35 = vld [vmem:[#allocation7_spill] sm:$0xff] }
 0x191   :  { %v1564_v9 = vpop.permute.xlu1 %1563  ;;  %v1527_v21 = vsel %vm1525_vm15, %v1522_v8, %v1524_v13  ;;  %v1526_v55 = vsel %vm1525_vm15, %v1520_v10, %v1522_v8  ;;  %vm706_vm15 = vcmask 605184   ;;  %v4518_v52 = vcombine.low %v1024_v31, %v1026_v33 }
 0x192   :  { %963 = vrot.lane.b32.xlu0 %v5887_v6, %s5006_s9  ;;  %2239 = vmatprep.subr.bf16.mxu1 %v1527_v21  ;;  %v1020_v62 = vsel %vm706_vm15, %v1019_v34, %v6145_v18  ;;  %v2368_v8 = vshrl.u32 %v7880_v47, 7  ;;  %v4934_v34 = vld [vmem:[%s7657_s1] ss:$16 sps:$4 sm:$0xff]  }
 0x193   :  { %1005 = vrot.lane.b32.xlu1 %v4515_v24, %s7862_s18  ;;  %2240 = vmatpush1.bf16.msra.mxu1 %v1526_v55  ;;  %v2040_v24 = vld [vmem:[%s7658_s2] sm:$0xff]  ;;  %v2042_v55 = vld [vmem:[%s7658_s2 + $0x10] sm:$0xff] }
 0x194   :  { %v578_v61 = vpop.permute.xlu0 %577  ;;  %v2369_v51 = vsub.s32 0, %v2368_v8 }
 0x195   :  { %v1560_v22 = vpop.permute.xlu1 %1559  ;;  %v584_v6 = vsel %vm583_vm4, %v578_v61, %v580_v30  ;;  %vm7865_vm4 = vcmask 711680  }
 0x196   :  { %1856 = vrot.lane.b32.xlu0 %v6189_v1, %s4999_s15  ;;  %2134 = vmatpush1.bf16.msra.mxu0 %v584_v6  ;;  %v986_v1 = vsel %vm982_vm12, %v6315_v48, 0  ;;  %vm7867_vm12 = vcmask 56320   ;;  %v2370_v39 = vrot.slane %v7881_v35, %v2369_v51  ;;  %s5011_s15 = smov 15  }
 0x197   :  { %1891 = vrot.lane.b32.xlu1 %v4590_v50, %s4978_s12  ;;  %v4514_v26 = vcombine.high %v984_v56, %v986_v1  ;;  %vm7868_vm13 = vmmov %vm7867_vm12  ;;  %v4513_v16 = vcombine.low %v984_v56, %v986_v1  ;;  %v2373_v50 = vsub.s32 4, %v2368_v8 }
 0x198   :  { %v621_v4 = vpop.permute.xlu0 %620 }
 0x199   :  { %v664_v41 = vpop.permute.xlu1 %663  ;;  %v626_v0 = vsel %vm7865_vm4, %v621_v4, %v623_v28  ;;  %v7879_v28 = vcombine.high %v7873_v12, %v7874_v25  ;;  %v2374_v1 = vrot.slane %v7881_v35, %v2373_v50 }
 0x19a   :  { %961 = vrot.lane.b32.xlu0 %v5931_v58, %s5006_s9  ;;  %2135 = vmatprep.subr.bf16.mxu0 %v626_v0  ;;  %v7882_v0 = vld [vmem:[#allocation8_spill] sm:$0xff] }
 0x19b   :  { %1887 = vrot.lane.b32.xlu1 %v7866_v2, %s4978_s12  ;;  %v2467_v31 = vrot.slane %v7882_v0, %v2369_v51 }
 0x19c   :  { %v1562_v42 = vpop.permute.xlu0 %1561 }
 0x19d   :  { %v1603_v40 = vpop.permute.xlu1 %1602  ;;  %v1566_v58 = vsel %vm7867_vm12, %v1562_v42, %v1564_v9  ;;  %v1565_v5 = vsel %vm7868_vm13, %v1560_v22, %v1562_v42  ;;  %vm1021_vm12 = vcmp.ne.s16.totalorder %v1020_v62, 0  ;;  %vm7876_vm13 = vcmask 48128   ;;  %v2041_v9 = vld [vmem:[%s7658_s2 + $0x8] sm:$0xff]  ;;  %v4937_v22 = vld [vmem:[%s7657_s1 + $0x24] ss:$16 sps:$4 sm:$0xff]  }
 0x19e   :  { %1003 = vrot.lane.b32.xlu0 %v4514_v26, %s7862_s18  ;;  %2241 = vmatprep.subr.bf16.mxu1 %v1566_v58  ;;  %v1023_v18 = vsel %vm1021_vm12, %v6309_v17, 0  ;;  %v1025_v3 = vsel %vm1021_vm12, %v6315_v48, 0  ;;  %vm7878_vm12 = vmmov %vm7872_vm7  ;;  %v2471_v42 = vrot.slane %v7882_v0, %v2373_v50 }
 0x19f   :  { %1044 = vrot.lane.b32.xlu1 %v4518_v52, %s7870_s0  ;;  %2242 = vmatpush1.bf16.msra.mxu1 %v1565_v5  ;;  %v4517_v46 = vcombine.high %v1023_v18, %v1025_v3  ;;  %v4516_v29 = vcombine.low %v1023_v18, %v1025_v3 }
 0x1a0   :  { %v619_v11 = vpop.permute.xlu0 %618 }
 0x1a1   :  { %v1599_v63 = vpop.permute.xlu1 %1598  ;;  %v625_v13 = vsel %vm7865_vm4, %v619_v11, %v621_v4  ;;  %vm7877_vm4 = vmmov %vm7876_vm13 }
 0x1a2   :  { %1889 = vrot.lane.b32.xlu0 %v7871_v7, %s4978_s12  ;;  %2136 = vmatpush1.bf16.msra.mxu0 %v625_v13 }
 0x1a3   :  { %1924 = vrot.lane.b32.xlu1 %v4593_v60, %s4976_s10 }
 0x1a4   :  { %v662_v38 = vpop.permute.xlu0 %661 }
 0x1a5   :  { %v705_v32 = vpop.permute.xlu1 %704  ;;  %v667_v10 = vsel %vm7872_vm7, %v662_v38, %v664_v41 }
 0x1a6   :  { %1001 = vrot.lane.b32.xlu0 %v4513_v16, %s7862_s18  ;;  %2137 = vmatprep.subr.bf16.mxu0 %v667_v10 }
 0x1a7   :  { %1920 = vrot.lane.b32.xlu1 %v7875_v43, %s4976_s10 }
 0x1a8   :  { %v1601_v14 = vpop.permute.xlu0 %1600 }
 0x1a9   :  { %v1636_v23 = vpop.permute.xlu1 %1635  ;;  %v1605_v44 = vsel %vm7876_vm13, %v1601_v14, %v1603_v40  ;;  %v1604_v17 = vsel %vm7877_vm4, %v1599_v63, %v1601_v14  ;;  %vm7893_vm13 = vcmask 834560  }
 0x1aa   :  { %1042 = vrot.lane.b32.xlu0 %v4517_v46, %s7870_s0  ;;  %2243 = vmatprep.subr.bf16.mxu1 %v1605_v44  ;;  %vm7894_vm4 = vmmov %vm7893_vm13 }
 0x1ab   :  { %2244 = vmatpush1.bf16.msra.mxu1 %v1604_v17  ;;  %2051 = vperm.xlu1 %4751, %v2041_v9  }
 0x1ac   :  { %v660_v48 = vpop.permute.xlu0 %659 }
 0x1ad   :  { %v1632_v53 = vpop.permute.xlu1 %1631  ;;  %v666_v30 = vsel %vm7878_vm12, %v660_v48, %v662_v38  ;;  %v7883_v38 = vmov 0   ;;  %vm7743_vm12 = vcmask 908288  }
 0x1ae   :  { %1922 = vrot.lane.b32.xlu0 %v7879_v28, %s4976_s10  ;;  %2138 = vmatpush1.bf16.msra.mxu0 %v666_v30 }
 0x1af   :  { %2056 = vperm.xlu1 %4751, %v2042_v55  }
 0x1b0   :  { %v703_v27 = vpop.permute.xlu0 %702 }
 0x1b1   :  { %v746_v19 = vpop.permute.xlu1 %745  ;;  %v708_v54 = vsel %vm706_vm15, %v703_v27, %v705_v32 }
 0x1b2   :  { %1040 = vrot.lane.b32.xlu0 %v4516_v29, %s7870_s0  ;;  %2139 = vmatprep.subr.bf16.mxu0 %v708_v54 }
 0x1b3   :  { %2375 = vrot.lane.b32.xlu1 %v2370_v39, %s5007_s17 }
 0x1b4   :  { %v1634_v21 = vpop.permute.xlu0 %1633 }
 0x1b5   :  { %v1669_v57 = vpop.permute.xlu1 %1668  ;;  %v1638_v15 = vsel %vm106_vm0, %v1634_v21, %v1636_v23  ;;  %v1637_v61 = vsel %vm106_vm0, %v1632_v53, %v1634_v21  ;;  %vm2102_vm0 = vcmask 130048  }
 0x1b6   :  { %2245 = vmatprep.subr.bf16.mxu1 %v1638_v15  ;;  %2046 = vperm.xlu0 %4750, %v2040_v24  }
 0x1b7   :  { %2246 = vmatpush1.bf16.msra.mxu1 %v1637_v61  ;;  %2472 = vrot.lane.b32.xlu1 %v2467_v31, %s5008_s22 }
 0x1b8   :  { %v701_v6 = vpop.permute.xlu0 %700 }
 0x1b9   :  { %v1665_v4 = vpop.permute.xlu1 %1664  ;;  %v707_v56 = vsel %vm706_vm15, %v701_v6, %v703_v27  ;;  %vm777_vm15 = vcmask 588800  }
 0x1ba   :  { %2140 = vmatpush1.bf16.msra.mxu0 %v707_v56  ;;  %2248 = vmatmul.mubr.bf16.vlgmr.msra.gmra.mrb[0].mxu1 %v4934_v34 }
 0x1bb   :  { %2257 = vmatprep.mubr.bf16.mxu1 %v4937_v22  ;;  %2061 = vperm.xlu0 %4750, %v2043_v20  }
 0x1bc   :  { %v744_v41 = vpop.permute.xlu0 %743  ;;  %2524 = vrot.lane.b32.xlu1 %v2370_v39, %s5009_s8 }
 0x1bd   :  { %v776_v33 = vpop.permute.xlu1 %775  ;;  %v749_v2 = vsel %vm747_vm2, %v744_v41, %v746_v19  ;;  %2142 = vmatmul.mubr.bf16.vlgmr.msra.gmra.mrb[0].mxu0 %v4934_v34 }
 0x1be   :  { %2162 = vmatprep.subr.bf16.mxu0 %v749_v2  ;;  %2151 = vmatprep.mubr.bf16.mxu0 %v4937_v22 }
 0x1bf   :  { %2377 = vrot.lane.b32.xlu0 %v2374_v1, %s5007_s17 }
 0x1c0   :  { %v1667_v26 = vpop.permute.xlu0 %1666  ;;  %2584 = vrot.lane.b32.xlu1 %v2467_v31, %s5010_s19 }
 0x1c1   :  { %v1698_v40 = vpop.permute.xlu1 %1697  ;;  %v1671_v52 = vsel %vm153_vm11, %v1667_v26, %v1669_v57  ;;  %v1670_v58 = vsel %vm153_vm11, %v1665_v4, %v1667_v26  ;;  %vm7884_vm11 = vcmask 965632  }
 0x1c2   :  { %2268 = vmatprep.subr.bf16.mxu1 %v1671_v52  ;;  %2258 = vmatmul.mubr.bf16.gmra.mrb[4].mxu1 %v4939_v37 }
 0x1c3   :  { %2269 = vmatpush1.bf16.msra.mxu1 %v1670_v58  ;;  %4604 = vmatprep.mubr.msk.bf16.mxu1 %vm2102_vm0, %v4942_v45 }
 0x1c4   :  { %v742_v5 = vpop.permute.xlu0 %741  ;;  %2474 = vrot.lane.b32.xlu0 %v2471_v42, %s5008_s22  ;;  %2634 = vrot.lane.b32.xlu1 %v2370_v39, %s5011_s15 }
 0x1c5   :  { %v1694_v49 = vpop.permute.xlu1 %1693  ;;  %v748_v36 = vsel %vm747_vm2, %v742_v5, %v744_v41  ;;  %2152 = vmatmul.mubr.bf16.gmra.mrb[4].mxu0 %v4939_v37 }
 0x1c6   :  { %2163 = vmatpush1.bf16.msra.mxu0 %v748_v36  ;;  %4602 = vmatprep.mubr.msk.bf16.mxu0 %vm2102_vm0, %v4942_v45 }
 0x1c8   :  { %v774_v59 = vpop.permute.xlu0 %773  ;;  %2526 = vrot.lane.b32.xlu0 %v2374_v1, %s5009_s8  ;;  %4753 = vrot.lane.b32.xlu1 %v7883_v38, %s5012_s24 }
 0x1c9   :  { %v817_v62 = vpop.permute.xlu1 %816  ;;  %v779_v11 = vsel %vm777_vm15, %v774_v59, %v776_v33 }
 0x1ca   :  { %2164 = vmatprep.subr.bf16.mxu0 %v779_v11 }
 0x1cc   :  { %v1696_v63 = vpop.permute.xlu0 %1695  ;;  %2586 = vrot.lane.b32.xlu0 %v2471_v42, %s5010_s19  ;;  %4763 = vrot.lane.b32.xlu1 %v7883_v38, %s5013_s30 }
 0x1cd   :  { %v1731_v60 = vpop.permute.xlu1 %1730  ;;  %v1700_v13 = vsel %vm183_vm1, %v1696_v63, %v1698_v40  ;;  %v1699_v7 = vsel %vm183_vm1, %v1694_v49, %v1696_v63  ;;  %vm7886_vm1 = vcmask 867328  }
 0x1ce   :  { %2270 = vmatprep.subr.bf16.mxu1 %v1700_v13 }
 0x1cf   :  { %2271 = vmatpush1.bf16.msra.mxu1 %v1699_v7 }
 0x1d0   :  { %v772_v16 = vpop.permute.xlu0 %771  ;;  %2636 = vrot.lane.b32.xlu0 %v2374_v1, %s5011_s15  ;;  %2723 = vrot.lane.b32.xlu1 %v2471_v42, %s5012_s24 }
 0x1d1   :  { %v1727_v18 = vpop.permute.xlu1 %1726  ;;  %v778_v3 = vsel %vm777_vm15, %v772_v16, %v774_v59 }
 0x1d2   :  { %2165 = vmatpush1.bf16.msra.mxu0 %v778_v3 }
 0x1d4   :  { %v815_v32 = vpop.permute.xlu0 %814  ;;  %4758 = vrot.lane.b32.xlu0 %v7883_v38, %s5012_s24  ;;  %4773 = vrot.lane.b32.xlu1 %v7883_v38, %s5011_s15 }
 0x1d5   :  { %v858_v10 = vpop.permute.xlu1 %857  ;;  %v820_v12 = vsel %vm818_vm8, %v815_v32, %v817_v62 }
 0x1d6   :  { %2166 = vmatprep.subr.bf16.mxu0 %v820_v12  ;;  %v4940_v12 = vld [vmem:[%s7657_s1 + $0x8] ss:$16 sps:$4 sm:$0xff]  }
 0x1d8   :  { %v1729_v25 = vpop.permute.xlu0 %1728  ;;  %2721 = vrot.lane.b32.xlu0 %v2467_v31, %s5012_s24  ;;  %4783 = vrot.lane.b32.xlu1 %v7883_v38, %s5010_s19 }
 0x1d9   :  { %v1764_v43 = vpop.permute.xlu1 %1763  ;;  %v1733_v46 = vsel %vm230_vm9, %v1729_v25, %v1731_v60  ;;  %v1732_v14 = vsel %vm230_vm9, %v1727_v18, %v1729_v25  ;;  %vm7885_vm9 = vmmov %vm7884_vm11  ;;  %v4943_v25 = vld [vmem:[%s7657_s1 + $0x2c] ss:$16 sps:$4 sm:$0xff]  }
 0x1da   :  { %2272 = vmatprep.subr.bf16.mxu1 %v1733_v46 }
 0x1db   :  { %2273 = vmatpush1.bf16.msra.mxu1 %v1732_v14  ;;  %v4945_v14 = vld [vmem:[%s7657_s1 + $0x28] ss:$16 sps:$4 sm:$0xff]   ;;  %s5014_s1 = smov 112  }
 0x1dc   :  { %v813_v23 = vpop.permute.xlu0 %812  ;;  %4768 = vrot.lane.b32.xlu0 %v7883_v38, %s5013_s30  ;;  %4798 = vrot.lane.b32.xlu1 %v7883_v38, %s5009_s8 }
 0x1dd   :  { %v1760_v44 = vpop.permute.xlu1 %1759  ;;  %v819_v17 = vsel %vm818_vm8, %v813_v23, %v815_v32  ;;  %vm7887_vm8 = vmmov %vm7886_vm1 }
 0x1de   :  { %2167 = vmatpush1.bf16.msra.mxu0 %v819_v17 }
 0x1e0   :  { %v856_v48 = vpop.permute.xlu0 %855  ;;  %4778 = vrot.lane.b32.xlu0 %v7883_v38, %s5011_s15 }
 0x1e1   :  { %v898_v53 = vpop.permute.xlu1 %897  ;;  %v861_v30 = vsel %vm859_vm3, %v856_v48, %v858_v10 }
 0x1e2   :  { %2168 = vmatprep.subr.bf16.mxu0 %v861_v30 }
 0x1e4   :  { %v1762_v28 = vpop.permute.xlu0 %1761  ;;  %4788 = vrot.lane.b32.xlu0 %v7883_v38, %s5010_s19 }
 0x1e5   :  { %v1797_v29 = vpop.permute.xlu1 %1796  ;;  %v1766_v27 = vsel %vm7884_vm11, %v1762_v28, %v1764_v43  ;;  %v1765_v19 = vsel %vm7885_vm9, %v1760_v44, %v1762_v28  ;;  %vm7744_vm9 = vcmask 924672  }
 0x1e6   :  { %2274 = vmatprep.subr.bf16.mxu1 %v1766_v27 }
 0x1e7   :  { %2275 = vmatpush1.bf16.msra.mxu1 %v1765_v19 }
 0x1e8   :  { %v854_v54 = vpop.permute.xlu0 %853  ;;  %4793 = vrot.lane.b32.xlu0 %v7883_v38, %s5009_s8 }
 0x1e9   :  { %v1793_v47 = vpop.permute.xlu1 %1792  ;;  %v860_v8 = vsel %vm859_vm3, %v854_v54, %v856_v48  ;;  %vm7888_vm3 = vcmask 859136  }
 0x1ea   :  { %2169 = vmatpush1.bf16.msra.mxu0 %v860_v8  ;;  %vm7889_vm2 = vmmov %vm7888_vm3 }
 0x1ec   :  { %v896_v9 = vpop.permute.xlu0 %895 }
 0x1ed   :  { %v937_v24 = vpop.permute.xlu1 %936  ;;  %v900_v21 = vsel %vm832_vm10, %v896_v9, %v898_v53 }
 0x1ee   :  { %2170 = vmatprep.subr.bf16.mxu0 %v900_v21 }
 0x1f0   :  { %v1795_v55 = vpop.permute.xlu0 %1794 }
 0x1f1   :  { %v1830_v51 = vpop.permute.xlu1 %1829  ;;  %v1799_v57 = vsel %vm7886_vm1, %v1795_v55, %v1797_v29  ;;  %v1798_v15 = vsel %vm7887_vm8, %v1793_v47, %v1795_v55 }
 0x1f2   :  { %2276 = vmatprep.subr.bf16.mxu1 %v1799_v57 }
 0x1f3   :  { %2277 = vmatpush1.bf16.msra.mxu1 %v1798_v15 }
 0x1f4   :  { %v894_v61 = vpop.permute.xlu0 %893 }
 0x1f5   :  { %v1826_v34 = vpop.permute.xlu1 %1825  ;;  %v899_v22 = vsel %vm832_vm10, %v894_v61, %v896_v9  ;;  %vm967_vm10 = vcmask 457728  }
 0x1f6   :  { %2171 = vmatpush1.bf16.msra.mxu0 %v899_v22 }
 0x1f8   :  { %v935_v50 = vpop.permute.xlu0 %934 }
 0x1f9   :  { %v966_v6 = vpop.permute.xlu1 %965  ;;  %v939_v20 = vsel %vm791_vm6, %v935_v50, %v937_v24 }
 0x1fa   :  { %2172 = vmatprep.subr.bf16.mxu0 %v939_v20 }
 0x1fc   :  { %v1828_v35 = vpop.permute.xlu0 %1827 }
 0x1fd   :  { %v1859_v39 = vpop.permute.xlu1 %1858  ;;  %v1832_v4 = vsel %vm7888_vm3, %v1828_v35, %v1830_v51  ;;  %v1831_v56 = vsel %vm7889_vm2, %v1826_v34, %v1828_v35  ;;  %vm2528_vm3 = vcmask 1039360  }
 0x1fe   :  { %2278 = vmatprep.subr.bf16.mxu1 %v1832_v4 }
 0x1ff   :  { %2279 = vmatpush1.bf16.msra.mxu1 %v1831_v56 }
 0x200   :  { %v933_v1 = vpop.permute.xlu0 %932 }
 0x201   :  { %v1855_v41 = vpop.permute.xlu1 %1854  ;;  %v938_v0 = vsel %vm791_vm6, %v933_v1, %v935_v50  ;;  %vm7890_vm6 = vcmask 842752  }
 0x202   :  { %2173 = vmatpush1.bf16.msra.mxu0 %v938_v0  ;;  %vm7891_vm7 = vmmov %vm7890_vm6 }
 0x204   :  { %v964_v31 = vpop.permute.xlu0 %963 }
 0x205   :  { %v1006_v33 = vpop.permute.xlu1 %1005  ;;  %v969_v2 = vsel %vm967_vm10, %v964_v31, %v966_v6 }
 0x206   :  { %2174 = vmatprep.subr.bf16.mxu0 %v969_v2 }
 0x208   :  { %v1857_v37 = vpop.permute.xlu0 %1856 }
 0x209   :  { %v1892_v45 = vpop.permute.xlu1 %1891  ;;  %v1861_v26 = vsel %vm389_vm14, %v1857_v37, %v1859_v39  ;;  %v1860_v42 = vsel %vm389_vm14, %v1855_v41, %v1857_v37  ;;  %vm7892_vm14 = vcmask 441344  }
 0x20a   :  { %2280 = vmatprep.subr.bf16.mxu1 %v1861_v26 }
 0x20b   :  { %2281 = vmatpush1.bf16.msra.mxu1 %v1860_v42 }
 0x20c   :  { %v962_v40 = vpop.permute.xlu0 %961 }
 0x20d   :  { %v968_v52 = vsel %vm967_vm10, %v962_v40, %v964_v31  ;;  %v1888_v58 = vpop.permute.xlu1 %1887 }
 0x20e   :  { %2175 = vmatpush1.bf16.msra.mxu0 %v968_v52 }
 0x210   :  { %v1004_v5 = vpop.permute.xlu0 %1003 }
 0x211   :  { %v1008_v49 = vsel %vm720_vm5, %v1004_v5, %v1006_v33  ;;  %v1045_v36 = vpop.permute.xlu1 %1044 }
 0x212   :  { %2176 = vmatprep.subr.bf16.mxu0 %v1008_v49 }
 0x214   :  { %v1890_v59 = vpop.permute.xlu0 %1889 }
 0x215   :  { %v1894_v62 = vsel %vm7890_vm6, %v1890_v59, %v1892_v45  ;;  %v1893_v11 = vsel %vm7891_vm7, %v1888_v58, %v1890_v59  ;;  %v1925_v13 = vpop.permute.xlu1 %1924  ;;  %vm7740_vm7 = vcmask 7168  }
 0x216   :  { %2282 = vmatprep.subr.bf16.mxu1 %v1894_v62 }
 0x217   :  { %2283 = vmatpush1.bf16.msra.mxu1 %v1893_v11 }
 0x218   :  { %v1002_v63 = vpop.permute.xlu0 %1001 }
 0x219   :  { %v1007_v60 = vsel %vm720_vm5, %v1002_v63, %v1004_v5  ;;  %v1921_v18 = vpop.permute.xlu1 %1920  ;;  %vm7895_vm5 = vmmov %vm7892_vm14 }
 0x21a   :  { %2177 = vmatpush1.bf16.msra.mxu0 %v1007_v60 }
 0x21c   :  { %v1043_v7 = vpop.permute.xlu0 %1042 }
 0x21d   :  { %v1047_v16 = vsel %vm7892_vm14, %v1043_v7, %v1045_v36 }
 0x21e   :  { %2178 = vmatprep.subr.bf16.mxu0 %v1047_v16 }
 0x220   :  { %v1923_v3 = vpop.permute.xlu0 %1922 }
 0x221   :  { %v1927_v32 = vsel %vm7893_vm13, %v1923_v3, %v1925_v13  ;;  %v1926_v10 = vsel %vm7894_vm4, %v1921_v18, %v1923_v3  ;;  %vm2505_vm13 = vcmask 121856  }
 0x222   :  { %2284 = vmatprep.subr.bf16.mxu1 %v1927_v32 }
 0x223   :  { %2285 = vmatpush1.bf16.msra.mxu1 %v1926_v10 }
 0x224   :  { %v1041_v43 = vpop.permute.xlu0 %1040 }
 0x225   :  { %v1046_v46 = vsel %vm7895_vm5, %v1041_v43, %v1043_v7 }
 0x226   :  { %2179 = vmatpush1.bf16.msra.mxu0 %v1046_v46  ;;  %2301 = vmatmul.mubr.bf16.vlgmr.msra.gmra.mrb[0].mxu1 %v4940_v12 }
 0x227   :  { %4605 = vmatprep.mubr.msk.bf16.mxu1 %vm2102_vm0, %v4943_v25 }
 0x229   :  { %2195 = vmatmul.mubr.bf16.vlgmr.msra.gmra.mrb[0].mxu0 %v4940_v12 }
 0x22a   :  { %4603 = vmatprep.mubr.msk.bf16.mxu0 %vm2102_vm0, %v4943_v25  ;;  %v2052_v23 = vpop.permute.xlu1 %2051 }
 0x22e   :  { %2311 = vmatmul.mubr.bf16.gmra.mrb[4].mxu1 %v4945_v14  ;;  %v2057_v44 = vpop.permute.xlu1 %2056 }
 0x231   :  { %2205 = vmatmul.mubr.bf16.gmra.mrb[4].mxu0 %v4945_v14 }
 0x232   :  { %v2376_v48 = vpop.permute.xlu1 %2375 }
 0x235   :  { %v2047_v17 = vpop.permute.xlu0 %2046 }
 0x236   :  { %v2473_v15 = vpop.permute.xlu1 %2472 }
 0x23a   :  { %v2062_v35 = vpop.permute.xlu0 %2061  ;;  %v2525_v58 = vpop.permute.xlu1 %2524 }
 0x23e   :  { %v6593_v60 = vpop.permute.xlu0 %2377 }
 0x23f   :  { %v6597_v3 = vsel %vm7743_vm12, %v2376_v48, %v6593_v60  ;;  %vm2383_vm1 = vcmp.ne.s16.totalorder %v6593_v60, 0 }
 0x240   :  { %vm2382_vm15 = vcmp.ne.s16.totalorder %v6597_v3, 0 }
 0x2f9   :  { %v2302_v53 = vpop.f32.mrb[0].mxu1 }
 0x2fa   :  { %v4629_v30 = vadd.f32 %v2302_v53, %v2047_v17  ;;  %v2304_v28 = vpop.f32.mrb[1].mxu1 }
 0x2fb   :  { %v4630_v29 = vadd.f32 %v2304_v28, %v2047_v17  ;;  %v2306_v27 = vpop.f32.mrb[2].mxu1 }
 0x2fc   :  { %v4631_v19 = vadd.f32 %v2306_v27, %v2052_v23  ;;  %v2196_v54 = vpop.f32.mrb[0].mxu0  ;;  %v2308_v47 = vpop.f32.mrb[3].mxu1  ;;  %v2323_v21 = vmax.f32 %v4629_v30, 0.0 }
 0x2fd   :  { %v4621_v8 = vadd.f32 %v2196_v54, %v2047_v17  ;;  %v4632_v9 = vadd.f32 %v2308_v47, %v2052_v23  ;;  %v2198_v24 = vpop.f32.mrb[1].mxu0  ;;  %v2324_v61 = vmax.f32 %v4630_v29, 0.0  ;;  %v6623_v30 = vpop.permute.xlu0 %2474 }
 0x2fe   :  { %v2327_v55 = vmax.f32 %v4631_v19, 0.0  ;;  %v4622_v51 = vadd.f32 %v2198_v24, %v2047_v17  ;;  %v2200_v57 = vpop.f32.mrb[2].mxu0  ;;  %v6628_v28 = vsel %vm7744_vm9, %v2473_v15, %v6623_v30  ;;  %vm2480_vm2 = vcmp.ne.s16.totalorder %v6623_v30, 0 }
 0x2ff   :  { %v2328_v34 = vmax.f32 %v4632_v9, 0.0  ;;  %v4623_v22 = vadd.f32 %v2200_v57, %v2052_v23  ;;  %v2202_v50 = vpop.f32.mrb[3].mxu0  ;;  %v2321_v39 = vmax.f32 %v4621_v8, 0.0  ;;  %vm2479_vm8 = vcmp.ne.s16.totalorder %v6628_v28, 0 }
 0x300   :  { %v6581_v6 = vpack.c.bf16 %v2327_v55, %v2323_v21  ;;  %v4624_v20 = vadd.f32 %v2202_v50, %v2052_v23  ;;  %v2322_v41 = vmax.f32 %v4622_v51, 0.0  ;;  %v6608_v23 = vpop.permute.xlu1 %2584 }
 0x301   :  { %v6583_v4 = vpack.c.bf16 %v2328_v34, %v2324_v61  ;;  %v2325_v56 = vmax.f32 %v4623_v22, 0.0  ;;  %v2312_v1 = vpop.f32.mrb[4].mxu1  ;;  %vm2589_vm11 = vcmp.ne.s16.totalorder %v6608_v23, 0  ;;  %v6647_v47 = vpop.permute.xlu0 %2526 }
 0x302   :  { %v2326_v0 = vmax.f32 %v4624_v20, 0.0  ;;  %v4633_v31 = vadd.f32 %v2312_v1, %v2057_v44  ;;  %v2314_v33 = vpop.f32.mrb[5].mxu1  ;;  %v2772_v29 = vsel %vm2382_vm15, %v6581_v6, 0  ;;  %v6652_v8 = vsel %vm2528_vm3, %v2525_v58, %v6647_v47 }
 0x303   :  { %v6585_v2 = vpack.c.bf16 %v2325_v56, %v2321_v39  ;;  %v4634_v37 = vadd.f32 %v2314_v33, %v2057_v44  ;;  %v2316_v45 = vpop.f32.mrb[6].mxu1  ;;  %v2773_v54 = vsel %vm2383_vm1, %v6583_v4, 0  ;;  %v2850_v9 = vsel %vm2479_vm8, %v6581_v6, 0 }
 0x304   :  { %v6587_v26 = vpack.c.bf16 %v2326_v0, %v2322_v41  ;;  %v4635_v42 = vadd.f32 %v2316_v45, %v2062_v35  ;;  %v2206_v40 = vpop.f32.mrb[4].mxu0  ;;  %v2318_v52 = vpop.f32.mrb[7].mxu1  ;;  %v2331_v59 = vmax.f32 %v4633_v31, 0.0  ;;  %vm2531_vm10 = vcmp.ne.s16.totalorder %v6652_v8, 0 }
 0x305   :  { %v4625_v5 = vadd.f32 %v2206_v40, %v2057_v44  ;;  %v4636_v49 = vadd.f32 %v2318_v52, %v2062_v35  ;;  %v2208_v36 = vpop.f32.mrb[5].mxu0  ;;  %2435 = vrot.lane.b32.xlu1 %v6585_v2, %s5013_s30  ;;  %v2332_v13 = vmax.f32 %v4634_v37, 0.0  ;;  %v2385_v48 = vsel %vm2382_vm15, %v6585_v2, 0  ;;  %v2587_v15 = vpop.permute.xlu0 %2586 }
 0x306   :  { %v2335_v62 = vmax.f32 %v4635_v42, 0.0  ;;  %v4626_v11 = vadd.f32 %v2208_v36, %v2057_v44  ;;  %v2210_v63 = vpop.f32.mrb[6].mxu0  ;;  %2437 = vrot.lane.b32.xlu0 %v6587_v26, %s5013_s30  ;;  %v2592_v53 = vsel %vm2589_vm11, %v6585_v2, 0  ;;  %v2386_v27 = vsel %vm2383_vm1, %v6587_v26, 0  ;;  %v6733_v31 = vpop.permute.xlu1 %2634 }
 0x307   :  { %v2336_v7 = vmax.f32 %v4636_v49, 0.0  ;;  %v4627_v16 = vadd.f32 %v2210_v63, %v2062_v35  ;;  %v2212_v18 = vpop.f32.mrb[7].mxu0  ;;  %v2329_v12 = vmax.f32 %v4625_v5, 0.0  ;;  %v2482_v19 = vsel %vm2479_vm8, %v6585_v2, 0 }
 0x308   :  { %v6599_v32 = vpack.c.bf16 %v2335_v62, %v2331_v59  ;;  %v4628_v10 = vadd.f32 %v2212_v18, %v2062_v35  ;;  %v2330_v46 = vmax.f32 %v4626_v11, 0.0  ;;  %v2483_v24 = vsel %vm2480_vm2, %v6587_v26, 0 }
 0x309   :  { %v6601_v25 = vpack.c.bf16 %v2336_v7, %v2332_v13  ;;  %v2333_v43 = vmax.f32 %v4627_v16, 0.0  ;;  %2821 = vrot.lane.b32.xlu1 %v6581_v6, %s5013_s30  ;;  %v2534_v21 = vsel %vm2531_vm10, %v6585_v2, 0  ;;  %v2851_v55 = vsel %vm2480_vm2, %v6583_v4, 0  ;;  %v2637_v33 = vpop.permute.xlu0 %2636 }
 0x30a   :  { %v2334_v14 = vmax.f32 %v4628_v10, 0.0  ;;  %2823 = vrot.lane.b32.xlu0 %v6583_v4, %s5013_s30  ;;  %vm2532_vm6 = vcmp.ne.s16.totalorder %v6647_v47, 0  ;;  %v2892_v51 = vsel %vm2531_vm10, %v6581_v6, 0  ;;  %v6682_v61 = vsel %vm7740_vm7, %v6608_v23, %v2587_v15  ;;  %v6782_v11 = vpop.permute.xlu1 %4753 }
 0x30b   :  { %v6610_v44 = vpack.c.bf16 %v2333_v43, %v2329_v12  ;;  %v2535_v57 = vsel %vm2532_vm6, %v6587_v26, 0  ;;  %v2941_v34 = vsel %vm2589_vm11, %v6581_v6, 0  ;;  %v2893_v22 = vsel %vm2532_vm6, %v6583_v4, 0 }
 0x30c   :  { %v6613_v17 = vpack.c.bf16 %v2334_v14, %v2330_v46  ;;  %vm7737_vm14 = vcmp.ne.s16.totalorder %v6682_v61, 0  ;;  %v2775_v39 = vsel %vm2382_vm15, %v6599_v32, 0  ;;  %v2853_v0 = vsel %vm2479_vm8, %v6599_v32, 0 }
 0x30d   :  { %2398 = vrot.lane.b32.xlu1 %v2385_v48, %s5012_s24  ;;  %v2593_v50 = vsel %vm7737_vm14, %v6587_v26, 0  ;;  %v2942_v20 = vsel %vm7737_vm14, %v6583_v4, 0  ;;  %v2388_v35 = vsel %vm2382_vm15, %v6610_v44, 0  ;;  %v2595_v56 = vsel %vm2589_vm11, %v6610_v44, 0  ;;  %v6788_v13 = vpop.permute.xlu0 %4758 }
 0x30e   :  { %2604 = vrot.lane.b32.xlu0 %v2592_v53, %s5009_s8  ;;  %v2485_v1 = vsel %vm2479_vm8, %v6610_v44, 0  ;;  %v2389_v41 = vsel %vm2383_vm1, %v6613_v17, 0  ;;  %v6737_v37 = vsel %vm2505_vm13, %v6733_v31, %v2637_v33  ;;  %v2776_v45 = vsel %vm2383_vm1, %v6601_v25, 0  ;;  %v6797_v16 = vpop.permute.xlu1 %4763 }
 0x30f   :  { %v2537_v42 = vsel %vm2531_vm10, %v6610_v44, 0  ;;  %vm7736_vm4 = vcmp.ne.s16.totalorder %v6737_v37, 0  ;;  %v2895_v52 = vsel %vm2531_vm10, %v6599_v32, 0  ;;  %v2944_v5 = vsel %vm2589_vm11, %v6599_v32, 0 }
 0x310   :  { %v2643_v40 = vsel %vm7736_vm4, %v6587_v26, 0  ;;  %v2984_v58 = vsel %vm7736_vm4, %v6583_v4, 0  ;;  %v2486_v49 = vsel %vm2480_vm2, %v6613_v17, 0  ;;  %vm7735_vm5 = vcmp.ne.s16.totalorder %v6733_v31, 0 }
 0x311   :  { %2785 = vrot.lane.b32.xlu1 %v2772_v29, %s5012_s24  ;;  %v2854_v36 = vsel %vm2480_vm2, %v6601_v25, 0  ;;  %v2642_v59 = vsel %vm7735_vm5, %v6585_v2, 0  ;;  %v2538_v62 = vsel %vm2532_vm6, %v6613_v17, 0  ;;  %v2986_v63 = vsel %vm7735_vm5, %v6599_v32, 0  ;;  %v6799_v18 = vpop.permute.xlu0 %2721 }
 0x312   :  { %2400 = vrot.lane.b32.xlu0 %v2386_v27, %s5012_s24  ;;  %v2896_v7 = vsel %vm2532_vm6, %v6601_v25, 0  ;;  %7896 = vst [vmem:[#allocation11_spill] sm:$0xff] %v6799_v18  ;;  %v2983_v10 = vsel %vm7735_vm5, %v6581_v6, 0  ;;  %v2724_v43 = vpop.permute.xlu1 %2723  ;;  %v2645_v46 = vsel %vm7735_vm5, %v6610_v44, 0  ;;  %v2596_v14 = vsel %vm7737_vm14, %v6613_v17, 0 }
 0x313   :  { %v2945_v29 = vsel %vm7737_vm14, %v6601_v25, 0  ;;  %vm2408_vm5 = vcmask 138240   ;;  %vm2726_vm14 = vcmp.ne.s16.totalorder %v6799_v18, 0 }
 0x314   :  { %v3061_v33 = vsel %vm2726_vm14, %v6581_v6, 0 }
 0x315   :  { %2495 = vrot.lane.b32.xlu1 %v2482_v19, %s5011_s15  ;;  %v6807_v12 = vpop.permute.xlu0 %4768 }
 0x316   :  { %2787 = vrot.lane.b32.xlu0 %v2773_v54, %s5012_s24  ;;  %v6820_v48 = vpop.permute.xlu1 %4773  ;;  %v2646_v54 = vsel %vm7736_vm4, %v6613_v17, 0 }
 0x319   :  { %2863 = vrot.lane.b32.xlu1 %v2850_v9, %s5011_s15  ;;  %v6823_v53 = vpop.permute.xlu0 %4778  ;;  %v2987_v9 = vsel %vm7736_vm4, %v6601_v25, 0 }
 0x31a   :  { %2497 = vrot.lane.b32.xlu0 %v2483_v24, %s5011_s15  ;;  %v6831_v27 = vpop.permute.xlu1 %4783 }
 0x31d   :  { %2547 = vrot.lane.b32.xlu1 %v2534_v21, %s5010_s19  ;;  %v6833_v19 = vpop.permute.xlu0 %4788 }
 0x31e   :  { %2865 = vrot.lane.b32.xlu0 %v2851_v55, %s5011_s15  ;;  %v6846_v24 = vpop.permute.xlu1 %4798  ;;  %v4948_v55 = vld [vmem:[%s7659_s3 + $0x4] ss:$12 sps:$4 sm:$0xff]  }
 0x31f   :  { %3270 = vmatprep.mubr.bf16.mxu0 %v4948_v55  ;;  %3376 = vmatprep.mubr.bf16.mxu1 %v4948_v55 }
 0x321   :  { %2905 = vrot.lane.b32.xlu1 %v2892_v51, %s5010_s19  ;;  %v6849_v21 = vpop.permute.xlu0 %4793 }
 0x322   :  { %2549 = vrot.lane.b32.xlu0 %v2535_v57, %s5010_s19  ;;  %v6862_v57 = vsel %vm2408_vm5, %v6799_v18, %v2724_v43 }
 0x323   :  { %vm2727_vm4 = vcmp.ne.s16.totalorder %v6862_v57, 0 }
 0x325   :  { %2953 = vrot.lane.b32.xlu1 %v2941_v34, %s5009_s8 }
 0x326   :  { %2907 = vrot.lane.b32.xlu0 %v2893_v22, %s5010_s19 }
 0x329   :  { %2606 = vrot.lane.b32.xlu1 %v2593_v50, %s5009_s8  ;;  %v2730_v50 = vsel %vm2727_vm4, %v6587_v26, 0 }
 0x32a   :  { %2441 = vrot.lane.b32.xlu0 %v6610_v44, %s5013_s30 }
 0x32d   :  { %2955 = vrot.lane.b32.xlu1 %v2942_v20, %s5009_s8 }
 0x32e   :  { %2827 = vrot.lane.b32.xlu0 %v6599_v32, %s5013_s30 }
 0x331   :  { %2443 = vrot.lane.b32.xlu1 %v6613_v17, %s5013_s30 }
 0x332   :  { %2404 = vrot.lane.b32.xlu0 %v2388_v35, %s5012_s24 }
 0x335   :  { %2829 = vrot.lane.b32.xlu1 %v6601_v25, %s5013_s30 }
 0x336   :  { %2791 = vrot.lane.b32.xlu0 %v2775_v39, %s5012_s24  ;;  %v3062_v39 = vsel %vm2727_vm4, %v6583_v4, 0 }
 0x339   :  { %2610 = vrot.lane.b32.xlu1 %v2595_v56, %s5009_s8  ;;  %v2729_v56 = vsel %vm2726_vm14, %v6585_v2, 0 }
 0x33a   :  { %2501 = vrot.lane.b32.xlu0 %v2485_v1, %s5011_s15 }
 0x33d   :  { %2406 = vrot.lane.b32.xlu1 %v2389_v41, %s5012_s24  ;;  %v4755_v41 = vunpack.i.l.bf16 %v6782_v11 }
 0x33e   :  { %2869 = vrot.lane.b32.xlu0 %v2853_v0, %s5011_s15 }
 0x341   :  { %2793 = vrot.lane.b32.xlu1 %v2776_v45, %s5012_s24  ;;  %v2733_v45 = vsel %vm2727_vm4, %v6613_v17, 0 }
 0x342   :  { %2553 = vrot.lane.b32.xlu0 %v2537_v42, %s5010_s19 }
 0x345   :  { %2656 = vrot.lane.b32.xlu1 %v2643_v40, %s5008_s22 }
 0x346   :  { %2911 = vrot.lane.b32.xlu0 %v2895_v52, %s5010_s19 }
 0x349   :  { %2997 = vrot.lane.b32.xlu1 %v2984_v58, %s5008_s22  ;;  %v4756_v58 = vunpack.i.h.bf16 %v6782_v11  ;;  %v2732_v11 = vsel %vm2726_vm14, %v6610_v44, 0 }
 0x34a   :  { %2959 = vrot.lane.b32.xlu0 %v2944_v5, %s5009_s8 }
 0x34d   :  { %2503 = vrot.lane.b32.xlu1 %v2486_v49, %s5011_s15  ;;  %v3065_v49 = vsel %vm2727_vm4, %v6601_v25, 0 }
 0x34e   :  { %4803 = vrot.lane.b32.xlu0 %v7883_v38, %s5008_s22 }
 0x351   :  { %2871 = vrot.lane.b32.xlu1 %v2854_v36, %s5011_s15 }
 0x352   :  { %2654 = vrot.lane.b32.xlu0 %v2642_v59, %s5008_s22 }
 0x355   :  { %2555 = vrot.lane.b32.xlu1 %v2538_v62, %s5010_s19 }
 0x356   :  { %3001 = vrot.lane.b32.xlu0 %v2986_v63, %s5008_s22 }
 0x359   :  { %2913 = vrot.lane.b32.xlu1 %v2896_v7, %s5010_s19  ;;  %v3064_v7 = vsel %vm2726_vm14, %v6599_v32, 0 }
 0x35a   :  { %4813 = vrot.lane.b32.xlu0 %v7883_v38, %s5014_s1 }
 0x35d   :  { %2995 = vrot.lane.b32.xlu1 %v2983_v10, %s5008_s22  ;;  %v3177_v10 = vld [vmem:[%s7660_s4] sm:$0xff] }
 0x35e   :  { %2690 = vrot.lane.b32.xlu0 %v6585_v2, %s5014_s1 }
 0x361   :  { %4808 = vrot.lane.b32.xlu1 %v7883_v38, %s5008_s22 }
 0x362   :  { %2698 = vrot.lane.b32.xlu0 %v6613_v17, %s5014_s1 }
 0x365   :  { %2660 = vrot.lane.b32.xlu1 %v2645_v46, %s5008_s22  ;;  %v3178_v46 = vld [vmem:[%s7660_s4 + $0x8] sm:$0xff] }
 0x366   :  { %2612 = vrot.lane.b32.xlu0 %v2596_v14, %s5009_s8 }
 0x369   :  { %2692 = vrot.lane.b32.xlu1 %v6587_v26, %s5014_s1 }
 0x36a   :  { %2961 = vrot.lane.b32.xlu0 %v2945_v29, %s5009_s8  ;;  %v3179_v29 = vld [vmem:[%s7660_s4 + $0x10] sm:$0xff] }
 0x36d   :  { %3033 = vrot.lane.b32.xlu1 %v6583_v4, %s5014_s1 }
 0x36e   :  { %2662 = vrot.lane.b32.xlu0 %v2646_v54, %s5008_s22 }
 0x371   :  { %3031 = vrot.lane.b32.xlu1 %v6581_v6, %s5014_s1 }
 0x372   :  { %3003 = vrot.lane.b32.xlu0 %v2987_v9, %s5008_s22  ;;  %v3180_v9 = vld [vmem:[%s7660_s4 + $0x18] sm:$0xff] }
 0x375   :  { %4818 = vrot.lane.b32.xlu1 %v7883_v38, %s5014_s1 }
 0x376   :  { %3039 = vrot.lane.b32.xlu0 %v6601_v25, %s5014_s1 }
 0x377   :  { %v6858_v51 = vpop.permute.xlu1 %2435 }
 0x378   :  { %v6864_v15 = vpop.permute.xlu0 %2437 }
 0x379   :  { %2696 = vrot.lane.b32.xlu1 %v6610_v44, %s5014_s1 }
 0x37a   :  { %3037 = vrot.lane.b32.xlu0 %v6599_v32, %s5014_s1 }
 0x37b   :  { %v6871_v34 = vpop.permute.xlu1 %2821 }
 0x37c   :  { %v6873_v22 = vpop.permute.xlu0 %2823 }
 0x37d   :  { %2743 = vrot.lane.b32.xlu1 %v2730_v50, %s5007_s17 }
 0x37e   :  { %4823 = vrot.lane.b32.xlu0 %v7883_v38, %s5007_s17 }
 0x37f   :  { %v2399_v20 = vpop.permute.xlu1 %2398 }
 0x380   :  { %v6882_v35 = vpop.permute.xlu0 %2604  ;;  %v2409_v40 = vsel %vm2408_vm5, %v4755_v41, %v2399_v20 }
 0x381   :  { %3075 = vrot.lane.b32.xlu1 %v3062_v39, %s5007_s17 }
 0x382   :  { %2741 = vrot.lane.b32.xlu0 %v2729_v56, %s5007_s17 }
 0x383   :  { %v2786_v1 = vpop.permute.xlu1 %2785 }
 0x384   :  { %v2401_v0 = vpop.permute.xlu0 %2400  ;;  %v2795_v59 = vsel %vm2408_vm5, %v4756_v58, %v2786_v1 }
 0x385   :  { %3073 = vrot.lane.b32.xlu1 %v3061_v33, %s5007_s17  ;;  %v2410_v42 = vsel %vm2408_vm5, %v2399_v20, %v2401_v0 }
 0x386   :  { %2749 = vrot.lane.b32.xlu0 %v2733_v45, %s5007_s17  ;;  %3238 = vmatprep.subr.bf16.mxu0 %v2410_v42 }
 0x387   :  { %v6903_v52 = vpop.permute.xlu1 %2495  ;;  %3239 = vmatpush1.bf16.msra.mxu0 %v2409_v40 }
 0x388   :  { %v2788_v5 = vpop.permute.xlu0 %2787 }
 0x389   :  { %4828 = vrot.lane.b32.xlu1 %v7883_v38, %s5007_s17  ;;  %v2796_v36 = vsel %vm2408_vm5, %v2786_v1, %v2788_v5  ;;  %v4760_v5 = vunpack.i.l.bf16 %v6788_v13 }
 0x38a   :  { %3081 = vrot.lane.b32.xlu0 %v3065_v49, %s5007_s17  ;;  %3344 = vmatprep.subr.bf16.mxu1 %v2796_v36 }
 0x38b   :  { %v6914_v62 = vpop.permute.xlu1 %2863  ;;  %3345 = vmatpush1.bf16.msra.mxu1 %v2795_v59 }
 0x38c   :  { %v6916_v63 = vpop.permute.xlu0 %2497 }
 0x38d   :  { %2747 = vrot.lane.b32.xlu1 %v2732_v11, %s5007_s17 }
 0x38e   :  { %3079 = vrot.lane.b32.xlu0 %v3064_v7, %s5007_s17  ;;  %v2447_v7 = vsel %vm2102_vm0, %v6858_v51, %v6864_v15 }
 0x38f   :  { %v6929_v43 = vpop.permute.xlu1 %2547 }
 0x390   :  { %v6934_v14 = vpop.permute.xlu0 %2865 }
 0x391   :  { %3183 = vperm.xlu1 %4751, %v3177_v10   ;;  %v4765_v10 = vunpack.i.l.bf16 %v6797_v16 }
 0x392   :  { %3188 = vperm.xlu0 %4750, %v3178_v46   ;;  %v4761_v46 = vunpack.i.h.bf16 %v6788_v13  ;;  %v2832_v13 = vsel %vm2102_vm0, %v6871_v34, %v6873_v22  ;;  %v2507_v22 = vsel %vm2505_vm13, %v6903_v52, %v6916_v63  ;;  %v2874_v63 = vsel %vm2505_vm13, %v6914_v62, %v6934_v14 }
 0x393   :  { %v6939_v54 = vpop.permute.xlu1 %2905  ;;  %v4781_v14 = vunpack.i.h.bf16 %v6823_v53 }
 0x394   :  { %v6944_v55 = vpop.permute.xlu0 %2549 }
 0x395   :  { %3193 = vperm.xlu1 %4751, %v3179_v29  }
 0x396   :  { %3198 = vperm.xlu0 %4750, %v3180_v9  }
 0x397   :  { %v6946_v50 = vpop.permute.xlu1 %2953 }
 0x398   :  { %v6948_v20 = vpop.permute.xlu0 %2907 }
 0x399   :  { %4833 = vrot.lane.b32.xlu1 %v7883_v38, %s5012_s24 }
 0x39a   :  { %4838 = vrot.lane.b32.xlu0 %v7883_v38, %s5012_s24 }
 0x39b   :  { %v6954_v39 = vpop.permute.xlu1 %2606 }
 0x39c   :  { %v2442_v56 = vpop.permute.xlu0 %2441 }
 0x39d   :  { %4843 = vrot.lane.b32.xlu1 %v7883_v38, %s5013_s30 }
 0x39e   :  { %4848 = vrot.lane.b32.xlu0 %v7883_v38, %s5013_s30 }
 0x39f   :  { %v6960_v1 = vpop.permute.xlu1 %2955 }
 0x3a0   :  { %v2828_v41 = vpop.permute.xlu0 %2827 }
 0x3a1   :  { %4853 = vrot.lane.b32.xlu1 %v7883_v38, %s5011_s15 }
 0x3a2   :  { %4858 = vrot.lane.b32.xlu0 %v7883_v38, %s5011_s15 }
 0x3a3   :  { %v2444_v0 = vpop.permute.xlu1 %2443 }
 0x3a4   :  { %v2405_v33 = vpop.permute.xlu0 %2404  ;;  %v2449_v15 = vsel %vm2102_vm0, %v2442_v56, %v2444_v0  ;;  %v4771_v0 = vunpack.i.h.bf16 %v6807_v12 }
 0x3a5   :  { %v2411_v11 = vsel %vm2408_vm5, %v4760_v5, %v2405_v33  ;;  %v4766_v5 = vunpack.i.h.bf16 %v6797_v16  ;;  %4863 = vrot.lane.b32.xlu1 %v7883_v38, %s5010_s19 }
 0x3a6   :  { %4868 = vrot.lane.b32.xlu0 %v7883_v38, %s5010_s19 }
 0x3a7   :  { %v2830_v45 = vpop.permute.xlu1 %2829 }
 0x3a8   :  { %v2792_v42 = vpop.permute.xlu0 %2791  ;;  %v2834_v16 = vsel %vm2102_vm0, %v2828_v41, %v2830_v45  ;;  %v4780_v45 = vunpack.i.l.bf16 %v6823_v53  ;;  %v2916_v53 = vsel %vm7740_vm7, %v6939_v54, %v6948_v20 }
 0x3a9   :  { %4878 = vrot.lane.b32.xlu1 %v7883_v38, %s5009_s8 }
 0x3aa   :  { %4873 = vrot.lane.b32.xlu0 %v7883_v38, %s5009_s8 }
 0x3ab   :  { %v6968_v40 = vpop.permute.xlu1 %2610 }
 0x3ac   :  { %v2502_v58 = vpop.permute.xlu0 %2501 }
 0x3ae   :  { %4883 = vrot.lane.b32.xlu0 %v7883_v38, %s5008_s22 }
 0x3af   :  { %v2407_v49 = vpop.permute.xlu1 %2406 }
 0x3b0   :  { %v6971_v36 = vpop.permute.xlu0 %2869  ;;  %v2412_v59 = vsel %vm2408_vm5, %v2405_v33, %v2407_v49  ;;  %v2446_v49 = vsel %vm2102_vm0, %v4765_v10, %v6858_v51  ;;  %v2797_v33 = vsel %vm2408_vm5, %v4761_v46, %v2792_v42  ;;  %v2833_v46 = vsel %vm2102_vm0, %v4771_v0, %v2828_v41 }
 0x3b1   :  { %3240 = vmatprep.subr.bf16.mxu0 %v2412_v59  ;;  %v4770_v59 = vunpack.i.l.bf16 %v6807_v12  ;;  %v4776_v12 = vunpack.i.h.bf16 %v6820_v48 }
 0x3b2   :  { %3241 = vmatpush1.bf16.msra.mxu0 %v2411_v11 }
 0x3b3   :  { %v2794_v29 = vpop.permute.xlu1 %2793  ;;  %3242 = vmatprep.subr.bf16.mxu0 %v2447_v7  ;;  %v2448_v51 = vsel %vm2102_vm0, %v4770_v59, %v2442_v56  ;;  %v4775_v7 = vunpack.i.l.bf16 %v6820_v48  ;;  %v2873_v41 = vsel %vm2505_vm13, %v4776_v12, %v6914_v62  ;;  %v2559_v48 = vsel %vm7740_vm7, %v6929_v43, %v6944_v55 }
 0x3b4   :  { %v6980_v9 = vpop.permute.xlu0 %2553  ;;  %v2798_v18 = vsel %vm2408_vm5, %v2792_v42, %v2794_v29  ;;  %v2831_v42 = vsel %vm2102_vm0, %v4766_v5, %v6871_v34  ;;  %v2875_v59 = vsel %vm2505_vm13, %v4781_v14, %v6971_v36  ;;  %v4786_v55 = vunpack.i.h.bf16 %v6831_v27 }
 0x3b5   :  { %3346 = vmatprep.subr.bf16.mxu1 %v2798_v18  ;;  %v2506_v34 = vsel %vm2505_vm13, %v4775_v7, %v6903_v52  ;;  %v2508_v52 = vsel %vm2505_vm13, %v4780_v45, %v2502_v58  ;;  %v2965_v12 = vsel %vm2528_vm3, %v6946_v50, %v6960_v1 }
 0x3b6   :  { %3243 = vmatpush1.bf16.msra.mxu0 %v2446_v49  ;;  %3347 = vmatpush1.bf16.msra.mxu1 %v2797_v33 }
 0x3b7   :  { %v6992_v11 = vpop.permute.xlu1 %2656  ;;  %3244 = vmatprep.subr.bf16.mxu0 %v2449_v15  ;;  %3348 = vmatprep.subr.bf16.mxu1 %v2832_v13  ;;  %v4785_v15 = vunpack.i.l.bf16 %v6831_v27  ;;  %v4791_v27 = vunpack.i.h.bf16 %v6833_v19 }
 0x3b8   :  { %v2912_v18 = vpop.permute.xlu0 %2911 }
 0x3b9   :  { %v2558_v62 = vsel %vm7740_vm7, %v4785_v15, %v6929_v43 }
 0x3ba   :  { %3245 = vmatpush1.bf16.msra.mxu0 %v2448_v51  ;;  %3349 = vmatpush1.bf16.msra.mxu1 %v2831_v42  ;;  %v4790_v51 = vunpack.i.l.bf16 %v6833_v19  ;;  %v4795_v19 = vunpack.i.l.bf16 %v6849_v21 }
 0x3bb   :  { %v7003_v10 = vpop.permute.xlu1 %2997  ;;  %3246 = vmatprep.subr.bf16.mxu0 %v2507_v22  ;;  %3350 = vmatprep.subr.bf16.mxu1 %v2834_v16  ;;  %v2915_v16 = vsel %vm7740_vm7, %v4786_v55, %v6939_v54 }
 0x3bc   :  { %v7005_v56 = vpop.permute.xlu0 %2959 }
 0x3be   :  { %3247 = vmatpush1.bf16.msra.mxu0 %v2506_v34  ;;  %3351 = vmatpush1.bf16.msra.mxu1 %v2833_v46  ;;  %v2917_v34 = vsel %vm7740_vm7, %v4791_v27, %v2912_v18 }
 0x3bf   :  { %v2504_v29 = vpop.permute.xlu1 %2503  ;;  %3352 = vmatprep.subr.bf16.mxu1 %v2874_v63 }
 0x3c0   :  { %v7015_v49 = vpop.permute.xlu0 %4803  ;;  %v2509_v33 = vsel %vm2505_vm13, %v2502_v58, %v2504_v29 }
 0x3c1   :  { %3248 = vmatprep.subr.bf16.mxu0 %v2509_v33 }
 0x3c2   :  { %3249 = vmatpush1.bf16.msra.mxu0 %v2508_v52  ;;  %3353 = vmatpush1.bf16.msra.mxu1 %v2873_v41 }
 0x3c3   :  { %v2872_v13 = vpop.permute.xlu1 %2871  ;;  %3250 = vmatprep.subr.bf16.mxu0 %v2559_v48 }
 0x3c4   :  { %v7026_v5 = vpop.permute.xlu0 %2654  ;;  %v2876_v58 = vsel %vm2505_vm13, %v6971_v36, %v2872_v13  ;;  %v2560_v36 = vsel %vm7740_vm7, %v4790_v51, %v6980_v9 }
 0x3c5   :  { %3354 = vmatprep.subr.bf16.mxu1 %v2876_v58 }
 0x3c6   :  { %3251 = vmatpush1.bf16.msra.mxu0 %v2558_v62  ;;  %3355 = vmatpush1.bf16.msra.mxu1 %v2875_v59 }
 0x3c7   :  { %v2556_v42 = vpop.permute.xlu1 %2555  ;;  %3356 = vmatprep.subr.bf16.mxu1 %v2916_v53 }
 0x3c8   :  { %v7039_v22 = vpop.permute.xlu0 %3001  ;;  %v2561_v43 = vsel %vm7740_vm7, %v6980_v9, %v2556_v42 }
 0x3c9   :  { %3252 = vmatprep.subr.bf16.mxu0 %v2561_v43 }
 0x3ca   :  { %3253 = vmatpush1.bf16.msra.mxu0 %v2560_v36  ;;  %3357 = vmatpush1.bf16.msra.mxu1 %v2915_v16 }
 0x3cb   :  { %v2914_v20 = vpop.permute.xlu1 %2913  ;;  %3254 = vmatprep.subr.bf16.mxu0 %v6587_v26  ;;  %v2617_v26 = vsel %vm2528_vm3, %v6954_v39, %v4795_v19  ;;  %v4949_v19 = vld [vmem:[%s7659_s3 + $0x1c] ss:$12 sps:$4 sm:$0xff]  }
 0x3cc   :  { %v7049_v0 = vpop.permute.xlu0 %4813  ;;  %v2918_v7 = vsel %vm7740_vm7, %v2912_v18, %v2914_v20  ;;  %vm7741_vm7 = vcmask 916480  }
 0x3cd   :  { %3358 = vmatprep.subr.bf16.mxu1 %v2918_v7  ;;  %v4815_v48 = vunpack.i.l.bf16 %v7049_v0  ;;  %v4816_v62 = vunpack.i.h.bf16 %v7049_v0 }
 0x3ce   :  { %3255 = vmatpush1.bf16.msra.mxu0 %v6585_v2  ;;  %3359 = vmatpush1.bf16.msra.mxu1 %v2917_v34  ;;  %v4796_v2 = vunpack.i.h.bf16 %v6849_v21  ;;  %v4946_v34 = vld [vmem:[%s7659_s3] ss:$12 sps:$4 sm:$0xff]  }
 0x3cf   :  { %v2996_v9 = vpop.permute.xlu1 %2995  ;;  %3256 = vmatprep.subr.bf16.mxu0 %v6613_v17  ;;  %3360 = vmatprep.subr.bf16.mxu1 %v6583_v4  ;;  %v2616_v4 = vsel %vm2528_vm3, %v6882_v35, %v6954_v39  ;;  %v4805_v17 = vunpack.i.l.bf16 %v7015_v49  ;;  %v4806_v39 = vunpack.i.h.bf16 %v7015_v49 }
 0x3d0   :  { %v2691_v54 = vpop.permute.xlu0 %2690 }
 0x3d1   :  { %v2667_v29 = vsel %vm7744_vm9, %v6992_v11, %v4805_v17  ;;  %v3008_v49 = vsel %vm7744_vm9, %v7003_v10, %v4806_v39  ;;  %v4951_v17 = vld [vmem:[%s7659_s3 + $0x18] ss:$12 sps:$4 sm:$0xff]  }
 0x3d2   :  { %3257 = vmatpush1.bf16.msra.mxu0 %v6610_v44  ;;  %3361 = vmatpush1.bf16.msra.mxu1 %v6581_v6  ;;  %v2966_v6 = vsel %vm2528_vm3, %v6960_v1, %v4796_v2  ;;  %v4800_v44 = vunpack.i.l.bf16 %v6846_v24  ;;  %v2666_v1 = vsel %vm7744_vm9, %v7026_v5, %v6992_v11  ;;  %v3007_v11 = vsel %vm7744_vm9, %v2996_v9, %v7003_v10 }
 0x3d3   :  { %v4809_v46 = vpop.permute.xlu1 %4808  ;;  %3258 = vmatprep.subr.bf16.mxu0 %v2617_v26  ;;  %3362 = vmatprep.subr.bf16.mxu1 %v6601_v25 }
 0x3d4   :  { %v7063_v18 = vpop.permute.xlu0 %2698  ;;  %v4811_v15 = vunpack.i.h.bf16 %v4809_v46 }
 0x3d6   :  { %3259 = vmatpush1.bf16.msra.mxu0 %v2616_v4  ;;  %3363 = vmatpush1.bf16.msra.mxu1 %v6599_v32  ;;  %v4801_v32 = vunpack.i.h.bf16 %v6846_v24  ;;  %v4810_v24 = vunpack.i.l.bf16 %v4809_v46 }
 0x3d7   :  { %v2661_v63 = vpop.permute.xlu1 %2660  ;;  %3364 = vmatprep.subr.bf16.mxu1 %v2966_v6 }
 0x3d8   :  { %v2613_v25 = vpop.permute.xlu0 %2612 }
 0x3d9   :  { %v2619_v21 = vsel %vm2528_vm3, %v2613_v25, %v4800_v44  ;;  %v2618_v35 = vsel %vm2528_vm3, %v6968_v40, %v2613_v25 }
 0x3da   :  { %3260 = vmatprep.subr.bf16.mxu0 %v2619_v21  ;;  %3365 = vmatpush1.bf16.msra.mxu1 %v2965_v12 }
 0x3db   :  { %v2693_v45 = vpop.permute.xlu1 %2692  ;;  %3261 = vmatpush1.bf16.msra.mxu0 %v2618_v35 }
 0x3dc   :  { %v2962_v33 = vpop.permute.xlu0 %2961  ;;  %3262 = vmatprep.subr.bf16.mxu0 %v2667_v29  ;;  %v2704_v5 = vsel %vm7741_vm7, %v2693_v45, %v4815_v48  ;;  %v2703_v55 = vsel %vm7741_vm7, %v2691_v54, %v2693_v45 }
 0x3dd   :  { %v2968_v52 = vsel %vm2528_vm3, %v2962_v33, %v4801_v32  ;;  %v2967_v50 = vsel %vm2528_vm3, %v7005_v56, %v2962_v33 }
 0x3de   :  { %3366 = vmatprep.subr.bf16.mxu1 %v2968_v52 }
 0x3df   :  { %v3034_v40 = vpop.permute.xlu1 %3033  ;;  %3263 = vmatpush1.bf16.msra.mxu0 %v2666_v1  ;;  %3367 = vmatpush1.bf16.msra.mxu1 %v2967_v50 }
 0x3e0   :  { %v2663_v41 = vpop.permute.xlu0 %2662  ;;  %3368 = vmatprep.subr.bf16.mxu1 %v3008_v49  ;;  %v3044_v51 = vsel %vm7741_vm7, %v3034_v40, %v4816_v62  ;;  %v4953_v49 = vld [vmem:[%s7659_s3 + $0x20] ss:$12 sps:$4 sm:$0xff]  }
 0x3e1   :  { %v2669_v14 = vsel %vm7744_vm9, %v2663_v41, %v4810_v24  ;;  %v2668_v56 = vsel %vm7744_vm9, %v2661_v63, %v2663_v41  ;;  %v4952_v24 = vld [vmem:[%s7659_s3 + $0x8] ss:$12 sps:$4 sm:$0xff]  }
 0x3e2   :  { %3264 = vmatprep.subr.bf16.mxu0 %v2669_v14 }
 0x3e3   :  { %v3032_v13 = vpop.permute.xlu1 %3031  ;;  %3265 = vmatpush1.bf16.msra.mxu0 %v2668_v56  ;;  %3369 = vmatpush1.bf16.msra.mxu1 %v3007_v11 }
 0x3e4   :  { %v3004_v58 = vpop.permute.xlu0 %3003  ;;  %3266 = vmatprep.subr.bf16.mxu0 %v2704_v5  ;;  %v3043_v16 = vsel %vm7741_vm7, %v3032_v13, %v3034_v40 }
 0x3e5   :  { %v3010_v59 = vsel %vm7744_vm9, %v3004_v58, %v4811_v15  ;;  %v3009_v53 = vsel %vm7744_vm9, %v7039_v22, %v3004_v58  ;;  %vm7899_vm9 = vcmp.ne.s16.totalorder %v6737_v37, 0 }
 0x3e6   :  { %3370 = vmatprep.subr.bf16.mxu1 %v3010_v59 }
 0x3e7   :  { %v4819_v10 = vpop.permute.xlu1 %4818  ;;  %3267 = vmatpush1.bf16.msra.mxu0 %v2703_v55  ;;  %3371 = vmatpush1.bf16.msra.mxu1 %v3009_v53 }
 0x3e8   :  { %v4821_v42 = vunpack.i.h.bf16 %v4819_v10  ;;  %v4820_v43 = vunpack.i.l.bf16 %v4819_v10  ;;  %v3040_v36 = vpop.permute.xlu0 %3039  ;;  %3372 = vmatprep.subr.bf16.mxu1 %v3044_v51 }
 0x3ea   :  { %v2706_v27 = vsel %vm7741_vm7, %v7063_v18, %v4820_v43  ;;  %v3046_v20 = vsel %vm7741_vm7, %v3040_v36, %v4821_v42 }
 0x3eb   :  { %v2697_v22 = vpop.permute.xlu1 %2696  ;;  %3268 = vmatprep.subr.bf16.mxu0 %v2706_v27  ;;  %3373 = vmatpush1.bf16.msra.mxu1 %v3043_v16 }
 0x3ec   :  { %v2705_v0 = vsel %vm7741_vm7, %v2697_v22, %v7063_v18  ;;  %v3038_v7 = vpop.permute.xlu0 %3037  ;;  %3374 = vmatprep.subr.bf16.mxu1 %v3046_v20 }
 0x3ed   :  { %v3045_v9 = vsel %vm7741_vm7, %v3038_v7, %v3040_v36  ;;  %3269 = vmatpush1.bf16.msra.mxu0 %v2705_v0  ;;  %vm7742_vm7 = vcmask 261120  }
 0x3ef   :  { %v2744_v54 = vpop.permute.xlu1 %2743  ;;  %3375 = vmatpush1.bf16.msra.mxu1 %v3045_v9 }
 0x3f0   :  { %v4824_v26 = vpop.permute.xlu0 %4823  ;;  %3271 = vmatmul.mubr.bf16.vlgmr.msra.gmra.mrb[8].mxu0 %v4946_v34 }
 0x3f1   :  { %v4826_v46 = vunpack.i.h.bf16 %v4824_v26  ;;  %v4825_v2 = vunpack.i.l.bf16 %v4824_v26  ;;  %3280 = vmatprep.mubr.bf16.mxu0 %v4949_v19 }
 0x3f2   :  { %3377 = vmatmul.mubr.bf16.vlgmr.msra.gmra.mrb[8].mxu1 %v4946_v34 }
 0x3f3   :  { %v3076_v18 = vpop.permute.xlu1 %3075  ;;  %v2754_v4 = vsel %vm7743_vm12, %v2744_v54, %v4825_v2  ;;  %3386 = vmatprep.mubr.bf16.mxu1 %v4949_v19 }
 0x3f4   :  { %v2742_v6 = vpop.permute.xlu0 %2741  ;;  %3291 = vmatprep.subr.bf16.mxu0 %v2754_v4  ;;  %v3086_v44 = vsel %vm7743_vm12, %v3076_v18, %v4826_v46 }
 0x3f5   :  { %v2753_v63 = vsel %vm7743_vm12, %v2742_v6, %v2744_v54  ;;  %3397 = vmatprep.subr.bf16.mxu1 %v3086_v44 }
 0x3f6   :  { %3292 = vmatpush1.bf16.msra.mxu0 %v2753_v63 }
 0x3f7   :  { %v3074_v25 = vpop.permute.xlu1 %3073 }
 0x3f8   :  { %v3085_v21 = vsel %vm7743_vm12, %v3074_v25, %v3076_v18  ;;  %v2750_v12 = vpop.permute.xlu0 %2749  ;;  %3281 = vmatmul.mubr.bf16.gmra.mrb[12].mxu0 %v4951_v17 }
 0x3f9   :  { %3398 = vmatpush1.bf16.msra.mxu1 %v3085_v21  ;;  %3323 = vmatprep.mubr.bf16.mxu0 %v7883_v38 }
 0x3fa   :  { %3387 = vmatmul.mubr.bf16.gmra.mrb[12].mxu1 %v4951_v17 }
 0x3fb   :  { %v4829_v35 = vpop.permute.xlu1 %4828  ;;  %3429 = vmatprep.mubr.bf16.mxu1 %v7883_v38 }
 0x3fc   :  { %v4831_v32 = vunpack.i.h.bf16 %v4829_v35  ;;  %v4830_v39 = vunpack.i.l.bf16 %v4829_v35  ;;  %v3082_v45 = vpop.permute.xlu0 %3081 }
 0x3fe   :  { %v2756_v29 = vsel %vm7743_vm12, %v2750_v12, %v4830_v39  ;;  %v3088_v33 = vsel %vm7743_vm12, %v3082_v45, %v4831_v32 }
 0x3ff   :  { %v2748_v52 = vpop.permute.xlu1 %2747  ;;  %3293 = vmatprep.subr.bf16.mxu0 %v2756_v29  ;;  %3399 = vmatprep.subr.bf16.mxu1 %v3088_v33 }
 0x400   :  { %v2755_v50 = vsel %vm7743_vm12, %v2748_v52, %v2750_v12  ;;  %v3080_v1 = vpop.permute.xlu0 %3079 }
 0x401   :  { %v3087_v40 = vsel %vm7743_vm12, %v3080_v1, %v3082_v45  ;;  %3294 = vmatpush1.bf16.msra.mxu0 %v2755_v50 }
 0x402   :  { %3400 = vmatpush1.bf16.msra.mxu1 %v3087_v40 }
 0x404   :  { %4612 = vmatmul.mubr.msk.bf16.vlgmr.msra.gmra.mrb[8].mxu0 %vm7742_vm7, %v4952_v24 }
 0x405   :  { %4614 = vmatmul.mubr.msk.bf16.vlgmr.msra.gmra.mrb[8].mxu1 %vm7742_vm7, %v4952_v24  ;;  %3333 = vmatprep.mubr.bf16.mxu0 %v7883_v38 }
 0x406   :  { %3439 = vmatprep.mubr.bf16.mxu1 %v7883_v38 }
 0x40c   :  { %4613 = vmatmul.mubr.msk.bf16.gmra.mrb[12].mxu0 %vm7742_vm7, %v4953_v49 }
 0x40d   :  { %4615 = vmatmul.mubr.msk.bf16.gmra.mrb[12].mxu1 %vm7742_vm7, %v4953_v49  ;;  %vm7897_vm7 = vcmp.ne.s16.totalorder %v6682_v61, 0 }
 0x40e   :  { %vm7898_vm12 = vmmov %vm7897_vm7 }
 0x410   :  { %v3184_v41 = vpop.permute.xlu1 %3183 }
 0x411   :  { %v3189_v48 = vpop.permute.xlu0 %3188 }
 0x414   :  { %v3194_v34 = vpop.permute.xlu1 %3193 }
 0x415   :  { %v3199_v26 = vpop.permute.xlu0 %3198 }
 0x4d7   :  { %v3325_v14 = vpop.f32.mrb[8].mxu0 }
 0x4d8   :  { %v4637_v56 = vadd.f32 %v3325_v14, %v3184_v41  ;;  %v3327_v11 = vpop.f32.mrb[9].mxu0  ;;  %v3431_v15 = vpop.f32.mrb[8].mxu1 }
 0x4d9   :  { %v4638_v13 = vadd.f32 %v3327_v11, %v3184_v41  ;;  %v4645_v5 = vadd.f32 %v3431_v15, %v3184_v41  ;;  %v3329_v58 = vpop.f32.mrb[10].mxu0  ;;  %v3433_v62 = vpop.f32.mrb[9].mxu1 }
 0x4da   :  { %v4639_v59 = vadd.f32 %v3329_v58, %v3189_v48  ;;  %v4646_v53 = vadd.f32 %v3433_v62, %v3184_v41  ;;  %v3331_v55 = vpop.f32.mrb[11].mxu0  ;;  %v3435_v10 = vpop.f32.mrb[10].mxu1  ;;  %v3450_v36 = vmax.f32 %v4637_v56, 0.0 }
 0x4db   :  { %v4640_v51 = vadd.f32 %v3331_v55, %v3189_v48  ;;  %v4647_v42 = vadd.f32 %v3435_v10, %v3189_v48  ;;  %v3437_v43 = vpop.f32.mrb[11].mxu1  ;;  %v3451_v20 = vmax.f32 %v4638_v13, 0.0  ;;  %v3452_v22 = vmax.f32 %v4645_v5, 0.0 }
 0x4dc   :  { %v3454_v16 = vmax.f32 %v4639_v59, 0.0  ;;  %v4648_v27 = vadd.f32 %v3437_v43, %v3189_v48  ;;  %v3453_v19 = vmax.f32 %v4646_v53, 0.0 }
 0x4dd   :  { %v3455_v0 = vmax.f32 %v4640_v51, 0.0  ;;  %v3456_v7 = vmax.f32 %v4647_v42, 0.0 }
 0x4de   :  { %v7149_v9 = vpack.c.bf16 %v3454_v16, %v3450_v36  ;;  %v3457_v54 = vmax.f32 %v4648_v27, 0.0 }
 0x4df   :  { %v7151_v46 = vpack.c.bf16 %v3455_v0, %v3451_v20  ;;  %v7153_v2 = vpack.c.bf16 %v3456_v7, %v3452_v22  ;;  %v3335_v18 = vpop.f32.mrb[12].mxu0 }
 0x4e0   :  { %v7155_v4 = vpack.c.bf16 %v3457_v54, %v3453_v19  ;;  %v4641_v6 = vadd.f32 %v3335_v18, %v3194_v34  ;;  %v3337_v44 = vpop.f32.mrb[13].mxu0  ;;  %v3441_v17 = vpop.f32.mrb[12].mxu1  ;;  %3546 = vrot.lane.b32.xlu1 %v7149_v9, %s5013_s30  ;;  %v3497_v5 = vsel %vm2382_vm15, %v7149_v9, 0  ;;  %v3666_v62 = vsel %vm2589_vm11, %v7149_v9, 0 }
 0x4e1   :  { %v4642_v63 = vadd.f32 %v3337_v44, %v3194_v34  ;;  %v4649_v25 = vadd.f32 %v3441_v17, %v3194_v34  ;;  %v3339_v21 = vpop.f32.mrb[14].mxu0  ;;  %v3443_v12 = vpop.f32.mrb[13].mxu1  ;;  %3548 = vrot.lane.b32.xlu0 %v7151_v46, %s5013_s30  ;;  %v3829_v59 = vsel %vm2382_vm15, %v7153_v2, 0  ;;  %v3498_v53 = vsel %vm2383_vm1, %v7151_v46, 0 }
 0x4e2   :  { %v4643_v35 = vadd.f32 %v3339_v21, %v3199_v26  ;;  %v4650_v32 = vadd.f32 %v3443_v12, %v3194_v34  ;;  %v3341_v39 = vpop.f32.mrb[15].mxu0  ;;  %v3445_v45 = vpop.f32.mrb[14].mxu1  ;;  %v3458_v50 = vmax.f32 %v4641_v6, 0.0  ;;  %v3575_v55 = vsel %vm2479_vm8, %v7149_v9, 0 }
 0x4e3   :  { %v4644_v29 = vadd.f32 %v3341_v39, %v3199_v26  ;;  %v4651_v33 = vadd.f32 %v3445_v45, %v3199_v26  ;;  %v3447_v52 = vpop.f32.mrb[15].mxu1  ;;  %v3459_v40 = vmax.f32 %v4642_v63, 0.0  ;;  %v3460_v49 = vmax.f32 %v4649_v25, 0.0  ;;  %v7321_v39 = vpop.permute.xlu1 %4833 }
 0x4e4   :  { %v3462_v1 = vmax.f32 %v4643_v35, 0.0  ;;  %v4652_v24 = vadd.f32 %v3447_v52, %v3199_v26  ;;  %3878 = vrot.lane.b32.xlu1 %v7153_v2, %s5013_s30  ;;  %v3461_v56 = vmax.f32 %v4650_v32, 0.0  ;;  %v3830_v10 = vsel %vm2383_vm1, %v7155_v4, 0  ;;  %v7312_v35 = vpop.permute.xlu0 %4838 }
 0x4e5   :  { %v3463_v41 = vmax.f32 %v4644_v29, 0.0  ;;  %v3464_v48 = vmax.f32 %v4651_v33, 0.0  ;;  %3880 = vrot.lane.b32.xlu0 %v7155_v4, %s5013_s30  ;;  %v3907_v51 = vsel %vm2479_vm8, %v7153_v2, 0  ;;  %v3576_v42 = vsel %vm2480_vm2, %v7151_v46, 0 }
 0x4e6   :  { %v7165_v14 = vpack.c.bf16 %v3462_v1, %v3458_v50  ;;  %v3465_v11 = vmax.f32 %v4652_v24, 0.0  ;;  %v3617_v43 = vsel %vm2531_vm10, %v7149_v9, 0  ;;  %v3908_v36 = vsel %vm2480_vm2, %v7155_v4, 0 }
 0x4e7   :  { %v7167_v15 = vpack.c.bf16 %v3463_v41, %v3459_v40  ;;  %v7169_v13 = vpack.c.bf16 %v3464_v48, %v3460_v49  ;;  %v3949_v16 = vsel %vm2531_vm10, %v7153_v2, 0  ;;  %v3618_v27 = vsel %vm2532_vm6, %v7151_v46, 0  ;;  %v4844_v29 = vpop.permute.xlu1 %4843 }
 0x4e8   :  { %v7174_v58 = vpack.c.bf16 %v3465_v11, %v3461_v56  ;;  %3510 = vrot.lane.b32.xlu1 %v3497_v5, %s5012_s24  ;;  %v3998_v20 = vsel %vm2589_vm11, %v7153_v2, 0  ;;  %v3950_v22 = vsel %vm2532_vm6, %v7155_v4, 0  ;;  %v3667_v0 = vsel %vm7897_vm7, %v7151_v46, 0  ;;  %v7325_v30 = vpop.permute.xlu0 %4848  ;;  %v4956_v56 = vld [vmem:[%s7661_s5 + $0x4] ss:$12 sps:$4 sm:$0xff]  }
 0x4e9   :  { %3678 = vrot.lane.b32.xlu0 %v3666_v62, %s5009_s8  ;;  %v3999_v7 = vsel %vm7898_vm12, %v7155_v4, 0  ;;  %v3709_v34 = vsel %vm7899_vm9, %v7151_v46, 0  ;;  %v3500_v19 = vsel %vm2382_vm15, %v7165_v14, 0  ;;  %v3832_v54 = vsel %vm2382_vm15, %v7169_v13, 0  ;;  %vm7900_vm12 = vmmov %vm7899_vm9  ;;  %4292 = vmatprep.mubr.bf16.mxu0 %v4956_v56 }
 0x4ea   :  { %v3578_v26 = vsel %vm2479_vm8, %v7165_v14, 0  ;;  %v3669_v18 = vsel %vm2589_vm11, %v7165_v14, 0  ;;  %v3910_v3 = vsel %vm2479_vm8, %v7169_v13, 0  ;;  %v3501_v6 = vsel %vm2383_vm1, %v7167_v15, 0  ;;  %vm7905_vm8 = vmmov %vm7897_vm7  ;;  %4378 = vmatprep.mubr.bf16.mxu1 %v4956_v56 }
 0x4eb   :  { %v3620_v44 = vsel %vm2531_vm10, %v7165_v14, 0  ;;  %v3833_v17 = vsel %vm2383_vm1, %v7174_v58, 0  ;;  %v3952_v28 = vsel %vm2531_vm10, %v7169_v13, 0  ;;  %v4041_v63 = vsel %vm7900_vm12, %v7155_v4, 0  ;;  %v7346_v50 = vpop.permute.xlu1 %4853  ;;  %vm7907_vm10 = vmmov %vm7900_vm12 }
 0x4ec   :  { %3842 = vrot.lane.b32.xlu1 %v3829_v59, %s5012_s24  ;;  %v4001_v25 = vsel %vm2589_vm11, %v7169_v13, 0  ;;  %vm7901_vm15 = vcmp.ne.s16.totalorder %v6733_v31, 0  ;;  %v3579_v21 = vsel %vm2480_vm2, %v7167_v15, 0  ;;  %v3911_v12 = vsel %vm2480_vm2, %v7174_v58, 0  ;;  %v7333_v33 = vpop.permute.xlu0 %4858  ;;  %vm7906_vm2 = vmmov %vm7897_vm7 }
 0x4ed   :  { %3512 = vrot.lane.b32.xlu0 %v3498_v53, %s5012_s24  ;;  %v4040_v60 = vsel %vm7901_vm15, %v7153_v2, 0  ;;  %vm7902_vm9 = vmmov %vm7901_vm15  ;;  %v3621_v32 = vsel %vm2532_vm6, %v7167_v15, 0  ;;  %v3953_v45 = vsel %vm2532_vm6, %v7174_v58, 0  ;;  %v3670_v47 = vsel %vm7905_vm8, %v7167_v15, 0 }
 0x4ee   :  { %v3708_v8 = vsel %vm7902_vm9, %v7149_v9, 0  ;;  %vm7903_vm11 = vmmov %vm7902_vm9  ;;  %v4002_v31 = vsel %vm7906_vm2, %v7174_v58, 0  ;;  %v3712_v49 = vsel %vm7907_vm10, %v7167_v15, 0  ;;  %v4845_v11 = vunpack.i.l.bf16 %v4844_v29 }
 0x4ef   :  { %v4043_v23 = vsel %vm7903_vm11, %v7169_v13, 0  ;;  %vm7904_vm1 = vmmov %vm7902_vm9  ;;  %v7357_v24 = vpop.permute.xlu1 %4863  ;;  %v4846_v59 = vunpack.i.h.bf16 %v4844_v29  ;;  %v4121_v57 = vsel %vm2726_vm14, %v7169_v13, 0  ;;  %vm7918_vm9 = vcmask 924672  }
 0x4f0   :  { %3588 = vrot.lane.b32.xlu1 %v3575_v55, %s5011_s15  ;;  %v3711_v52 = vsel %vm7904_vm1, %v7165_v14, 0  ;;  %v7349_v1 = vpop.permute.xlu0 %4868  ;;  %vm7908_vm6 = vmmov %vm7907_vm10 }
 0x4f1   :  { %3844 = vrot.lane.b32.xlu0 %v3830_v10, %s5012_s24  ;;  %v4044_v61 = vsel %vm7908_vm6, %v7174_v58, 0  ;;  %vm7919_vm11 = vmmov %vm7918_vm9  ;;  %vm7925_vm6 = vcmask 916480  }
 0x4f2   :  { %vm7920_vm1 = vmmov %vm7918_vm9 }
 0x4f3   :  { %v7372_v41 = vpop.permute.xlu1 %4878  ;;  %vm7921_vm8 = vmmov %vm7920_vm1 }
 0x4f4   :  { %3920 = vrot.lane.b32.xlu1 %v3907_v51, %s5011_s15  ;;  %v7359_v40 = vpop.permute.xlu0 %4873  ;;  %v3787_v51 = vsel %vm2727_vm4, %v7151_v46, 0  ;;  %vm7922_vm2 = vmmov %vm7920_vm1 }
 0x4f5   :  { %3590 = vrot.lane.b32.xlu0 %v3576_v42, %s5011_s15  ;;  %vm7923_vm10 = vmmov %vm7920_vm1 }
 0x4f8   :  { %3630 = vrot.lane.b32.xlu1 %v3617_v43, %s5010_s19  ;;  %v7375_v48 = vpop.permute.xlu0 %4883  ;;  %v3786_v43 = vsel %vm2726_vm14, %v7149_v9, 0 }
 0x4f9   :  { %3922 = vrot.lane.b32.xlu0 %v3908_v36, %s5011_s15 }
 0x4fc   :  { %3962 = vrot.lane.b32.xlu1 %v3949_v16, %s5010_s19 }
 0x4fd   :  { %3632 = vrot.lane.b32.xlu0 %v3618_v27, %s5010_s19  ;;  %v4119_v27 = vsel %vm2727_vm4, %v7155_v4, 0 }
 0x500   :  { %4010 = vrot.lane.b32.xlu1 %v3998_v20, %s5009_s8  ;;  %v3790_v20 = vsel %vm2727_vm4, %v7167_v15, 0 }
 0x501   :  { %3964 = vrot.lane.b32.xlu0 %v3950_v22, %s5010_s19 }
 0x504   :  { %3680 = vrot.lane.b32.xlu1 %v3667_v0, %s5009_s8  ;;  %v4835_v0 = vunpack.i.l.bf16 %v7321_v39 }
 0x505   :  { %3552 = vrot.lane.b32.xlu0 %v7165_v14, %s5013_s30 }
 0x508   :  { %4012 = vrot.lane.b32.xlu1 %v3999_v7, %s5009_s8 }
 0x509   :  { %3884 = vrot.lane.b32.xlu0 %v7169_v13, %s5013_s30 }
 0x50c   :  { %3722 = vrot.lane.b32.xlu1 %v3709_v34, %s5008_s22  ;;  %v4118_v34 = vsel %vm2726_vm14, %v7153_v2, 0 }
 0x50d   :  { %3516 = vrot.lane.b32.xlu0 %v3500_v19, %s5012_s24  ;;  %v4122_v19 = vsel %vm2727_vm4, %v7174_v58, 0 }
 0x510   :  { %3554 = vrot.lane.b32.xlu1 %v7167_v15, %s5013_s30 }
 0x511   :  { %3848 = vrot.lane.b32.xlu0 %v3832_v54, %s5012_s24 }
 0x514   :  { %3886 = vrot.lane.b32.xlu1 %v7174_v58, %s5013_s30 }
 0x515   :  { %3594 = vrot.lane.b32.xlu0 %v3578_v26, %s5011_s15 }
 0x518   :  { %3684 = vrot.lane.b32.xlu1 %v3669_v18, %s5009_s8 }
 0x519   :  { %3926 = vrot.lane.b32.xlu0 %v3910_v3, %s5011_s15  ;;  %v4836_v3 = vunpack.i.h.bf16 %v7321_v39 }
 0x51c   :  { %3518 = vrot.lane.b32.xlu1 %v3501_v6, %s5012_s24 }
 0x51d   :  { %3636 = vrot.lane.b32.xlu0 %v3620_v44, %s5010_s19 }
 0x520   :  { %3850 = vrot.lane.b32.xlu1 %v3833_v17, %s5012_s24 }
 0x521   :  { %3968 = vrot.lane.b32.xlu0 %v3952_v28, %s5010_s19 }
 0x524   :  { %4054 = vrot.lane.b32.xlu1 %v4041_v63, %s5008_s22  ;;  %v4231_v63 = vld [vmem:[%s7662_s6 + $0x8] sm:$0xff] }
 0x525   :  { %4016 = vrot.lane.b32.xlu0 %v4001_v25, %s5009_s8 }
 0x528   :  { %4052 = vrot.lane.b32.xlu1 %v4040_v60, %s5008_s22  ;;  %v3789_v60 = vsel %vm2726_vm14, %v7165_v14, 0 }
 0x529   :  { %3720 = vrot.lane.b32.xlu0 %v3708_v8, %s5008_s22  ;;  %v4230_v8 = vld [vmem:[%s7662_s6] sm:$0xff] }
 0x52c   :  { %3596 = vrot.lane.b32.xlu1 %v3579_v21, %s5011_s15 }
 0x52d   :  { %4058 = vrot.lane.b32.xlu0 %v4043_v23, %s5008_s22 }
 0x530   :  { %3928 = vrot.lane.b32.xlu1 %v3911_v12, %s5011_s15 }
 0x531   :  { %4893 = vrot.lane.b32.xlu0 %v7883_v38, %s5014_s1 }
 0x534   :  { %3638 = vrot.lane.b32.xlu1 %v3621_v32, %s5010_s19 }
 0x535   :  { %3756 = vrot.lane.b32.xlu0 %v7149_v9, %s5014_s1 }
 0x538   :  { %3970 = vrot.lane.b32.xlu1 %v3953_v45, %s5010_s19 }
 0x539   :  { %3764 = vrot.lane.b32.xlu0 %v7167_v15, %s5014_s1 }
 0x53c   :  { %4888 = vrot.lane.b32.xlu1 %v7883_v38, %s5008_s22 }
 0x53d   :  { %4096 = vrot.lane.b32.xlu0 %v7174_v58, %s5014_s1 }
 0x540   :  { %3726 = vrot.lane.b32.xlu1 %v3711_v52, %s5008_s22 }
 0x541   :  { %3686 = vrot.lane.b32.xlu0 %v3670_v47, %s5009_s8 }
 0x544   :  { %3758 = vrot.lane.b32.xlu1 %v7151_v46, %s5014_s1 }
 0x545   :  { %4018 = vrot.lane.b32.xlu0 %v4002_v31, %s5009_s8 }
 0x548   :  { %4090 = vrot.lane.b32.xlu1 %v7155_v4, %s5014_s1 }
 0x549   :  { %3728 = vrot.lane.b32.xlu0 %v3712_v49, %s5008_s22 }
 0x54c   :  { %4088 = vrot.lane.b32.xlu1 %v7153_v2, %s5014_s1 }
 0x54d   :  { %4060 = vrot.lane.b32.xlu0 %v4044_v61, %s5008_s22 }
 0x550   :  { %4898 = vrot.lane.b32.xlu1 %v7883_v38, %s5014_s1 }
 0x551   :  { %4094 = vrot.lane.b32.xlu0 %v7169_v13, %s5014_s1 }
 0x552   :  { %v7384_v37 = vpop.permute.xlu1 %3546 }
 0x553   :  { %v7388_v5 = vsel %vm2102_vm0, %v4845_v11, %v7384_v37  ;;  %v7390_v62 = vpop.permute.xlu0 %3548 }
 0x554   :  { %3762 = vrot.lane.b32.xlu1 %v7165_v14, %s5014_s1 }
 0x555   :  { %4903 = vrot.lane.b32.xlu0 %v7883_v38, %s5007_s17 }
 0x556   :  { %v7396_v53 = vpop.permute.xlu1 %3878 }
 0x557   :  { %v7400_v55 = vsel %vm2102_vm0, %v4846_v59, %v7396_v53  ;;  %v7402_v10 = vpop.permute.xlu0 %3880 }
 0x558   :  { %3800 = vrot.lane.b32.xlu1 %v3787_v51, %s5007_s17 }
 0x559   :  { %3798 = vrot.lane.b32.xlu0 %v3786_v43, %s5007_s17 }
 0x55a   :  { %v3511_v36 = vpop.permute.xlu1 %3510 }
 0x55b   :  { %v7412_v16 = vpop.permute.xlu0 %3678  ;;  %v3520_v26 = vsel %vm2408_vm5, %v4835_v0, %v3511_v36 }
 0x55c   :  { %4132 = vrot.lane.b32.xlu1 %v4119_v27, %s5007_s17 }
 0x55d   :  { %3806 = vrot.lane.b32.xlu0 %v3790_v20, %s5007_s17 }
 0x55e   :  { %v3843_v22 = vpop.permute.xlu1 %3842 }
 0x55f   :  { %v3513_v7 = vpop.permute.xlu0 %3512  ;;  %v3852_v17 = vsel %vm2408_vm5, %v4836_v3, %v3843_v22 }
 0x560   :  { %4130 = vrot.lane.b32.xlu1 %v4118_v34, %s5007_s17  ;;  %v3521_v54 = vsel %vm2408_vm5, %v3511_v36, %v3513_v7  ;;  %v4840_v36 = vunpack.i.l.bf16 %v7312_v35  ;;  %v3557_v7 = vsel %vm2102_vm0, %v7384_v37, %v7390_v62  ;;  %v4841_v34 = vunpack.i.h.bf16 %v7312_v35 }
 0x561   :  { %4138 = vrot.lane.b32.xlu0 %v4122_v19, %s5007_s17  ;;  %4260 = vmatprep.subr.bf16.mxu0 %v3521_v54  ;;  %v3889_v37 = vsel %vm2102_vm0, %v7396_v53, %v7402_v10  ;;  %v4850_v35 = vunpack.i.l.bf16 %v7325_v30  ;;  %v4851_v53 = vunpack.i.h.bf16 %v7325_v30  ;;  %v4855_v10 = vunpack.i.l.bf16 %v7346_v50 }
 0x562   :  { %4261 = vmatpush1.bf16.msra.mxu0 %v3520_v26  ;;  %v7433_v18 = vpop.permute.xlu1 %3588  ;;  %v4860_v30 = vunpack.i.l.bf16 %v7333_v33 }
 0x563   :  { %v3845_v6 = vpop.permute.xlu0 %3844 }
 0x564   :  { %4908 = vrot.lane.b32.xlu1 %v7883_v38, %s5007_s17  ;;  %v3853_v44 = vsel %vm2408_vm5, %v3843_v22, %v3845_v6 }
 0x565   :  { %4136 = vrot.lane.b32.xlu0 %v4121_v57, %s5007_s17  ;;  %4346 = vmatprep.subr.bf16.mxu1 %v3853_v44 }
 0x566   :  { %4347 = vmatpush1.bf16.msra.mxu1 %v3852_v17  ;;  %v7444_v28 = vpop.permute.xlu1 %3920 }
 0x567   :  { %v3591_v25 = vpop.permute.xlu0 %3590 }
 0x568   :  { %3804 = vrot.lane.b32.xlu1 %v3789_v60, %s5007_s17 }
 0x569   :  { %4239 = vperm.xlu0 %4750, %v4231_v63  }
 0x56a   :  { %v7456_v21 = vpop.permute.xlu1 %3630 }
 0x56b   :  { %v3923_v23 = vpop.permute.xlu0 %3922 }
 0x56c   :  { %4234 = vperm.xlu1 %4751, %v4230_v8   ;;  %v3598_v8 = vsel %vm2505_vm13, %v4855_v10, %v7433_v18 }
 0x56e   :  { %v7458_v12 = vpop.permute.xlu1 %3962 }
 0x56f   :  { %v7460_v32 = vpop.permute.xlu0 %3632 }
 0x572   :  { %v7462_v39 = vpop.permute.xlu1 %4010 }
 0x573   :  { %v7464_v45 = vpop.permute.xlu0 %3964 }
 0x576   :  { %v7466_v29 = vpop.permute.xlu1 %3680 }
 0x577   :  { %v3553_v52 = vpop.permute.xlu0 %3552 }
 0x578   :  { %v3558_v44 = vsel %vm2102_vm0, %v4850_v35, %v3553_v52  ;;  %v4881_v35 = vunpack.i.h.bf16 %v7372_v41 }
 0x57a   :  { %v7468_v47 = vpop.permute.xlu1 %4012 }
 0x57b   :  { %v3885_v31 = vpop.permute.xlu0 %3884 }
 0x57e   :  { %v7470_v49 = vpop.permute.xlu1 %3722 }
 0x57f   :  { %v3517_v61 = vpop.permute.xlu0 %3516 }
 0x580   :  { %v3522_v0 = vsel %vm2408_vm5, %v4840_v36, %v3517_v61 }
 0x582   :  { %v3555_v56 = vpop.permute.xlu1 %3554 }
 0x583   :  { %v3849_v11 = vpop.permute.xlu0 %3848  ;;  %v3559_v6 = vsel %vm2102_vm0, %v3553_v52, %v3555_v56  ;;  %v4856_v52 = vunpack.i.h.bf16 %v7346_v50  ;;  %v4861_v50 = vunpack.i.h.bf16 %v7333_v33 }
 0x584   :  { %v3854_v3 = vsel %vm2408_vm5, %v4841_v34, %v3849_v11 }
 0x586   :  { %v3887_v59 = vpop.permute.xlu1 %3886 }
 0x587   :  { %v3595_v51 = vpop.permute.xlu0 %3594  ;;  %v3891_v17 = vsel %vm2102_vm0, %v3885_v31, %v3887_v59  ;;  %v4865_v59 = vunpack.i.l.bf16 %v7357_v24 }
 0x58a   :  { %v7472_v42 = vpop.permute.xlu1 %3684 }
 0x58b   :  { %v3927_v43 = vpop.permute.xlu0 %3926 }
 0x58e   :  { %v3519_v27 = vpop.permute.xlu1 %3518 }
 0x58f   :  { %v7475_v20 = vpop.permute.xlu0 %3636  ;;  %v3523_v22 = vsel %vm2408_vm5, %v3517_v61, %v3519_v27 }
 0x590   :  { %4262 = vmatprep.subr.bf16.mxu0 %v3523_v22 }
 0x591   :  { %4263 = vmatpush1.bf16.msra.mxu0 %v3522_v0  ;;  %v4866_v0 = vunpack.i.h.bf16 %v7357_v24 }
 0x592   :  { %4264 = vmatprep.subr.bf16.mxu0 %v3557_v7  ;;  %v3851_v19 = vpop.permute.xlu1 %3850 }
 0x593   :  { %v7483_v54 = vpop.permute.xlu0 %3968  ;;  %v3855_v26 = vsel %vm2408_vm5, %v3849_v11, %v3851_v19 }
 0x594   :  { %4348 = vmatprep.subr.bf16.mxu1 %v3855_v26 }
 0x595   :  { %4265 = vmatpush1.bf16.msra.mxu0 %v7388_v5  ;;  %4349 = vmatpush1.bf16.msra.mxu1 %v3854_v3  ;;  %v3599_v5 = vsel %vm2505_vm13, %v7433_v18, %v3591_v25  ;;  %v3931_v25 = vsel %vm2505_vm13, %v7444_v28, %v3923_v23  ;;  %v3930_v18 = vsel %vm2505_vm13, %v4856_v52, %v7444_v28 }
 0x596   :  { %4266 = vmatprep.subr.bf16.mxu0 %v3559_v6  ;;  %4350 = vmatprep.subr.bf16.mxu1 %v3889_v37  ;;  %v7493_v62 = vpop.permute.xlu1 %4054  ;;  %v3690_v37 = vsel %vm2528_vm3, %v7412_v16, %v7466_v29  ;;  %v4022_v16 = vsel %vm2528_vm3, %v7462_v39, %v7468_v47 }
 0x597   :  { %v7495_v57 = vpop.permute.xlu0 %4016 }
 0x599   :  { %4267 = vmatpush1.bf16.msra.mxu0 %v3558_v44  ;;  %4351 = vmatpush1.bf16.msra.mxu1 %v7400_v55  ;;  %v3890_v55 = vsel %vm2102_vm0, %v4851_v53, %v3885_v31  ;;  %v3600_v31 = vsel %vm2505_vm13, %v4860_v30, %v3595_v51  ;;  %vm7910_vm0 = vcmask 7168   ;;  %v4886_v53 = vunpack.i.h.bf16 %v7375_v48 }
 0x59a   :  { %4268 = vmatprep.subr.bf16.mxu0 %v3599_v5  ;;  %4352 = vmatprep.subr.bf16.mxu1 %v3891_v17  ;;  %v7504_v63 = vpop.permute.xlu1 %4052  ;;  %v3641_v23 = vsel %vm7910_vm0, %v7456_v21, %v7460_v32  ;;  %vm7911_vm7 = vmmov %vm7910_vm0  ;;  %v4870_v32 = vunpack.i.l.bf16 %v7349_v1 }
 0x59b   :  { %v7506_v60 = vpop.permute.xlu0 %3720  ;;  %v3640_v28 = vsel %vm7911_vm7, %v4865_v59, %v7456_v21  ;;  %vm7912_vm14 = vmmov %vm7910_vm0 }
 0x59c   :  { %v3973_v33 = vsel %vm7912_vm14, %v7458_v12, %v7464_v45  ;;  %vm7913_vm4 = vmmov %vm7910_vm0  ;;  %v4871_v45 = vunpack.i.h.bf16 %v7349_v1  ;;  %v3732_v39 = vsel %vm7919_vm11, %v7506_v60, %v7470_v49 }
 0x59d   :  { %4269 = vmatpush1.bf16.msra.mxu0 %v3598_v8  ;;  %4353 = vmatpush1.bf16.msra.mxu1 %v3890_v55  ;;  %vm7915_vm5 = vmmov %vm7910_vm0  ;;  %v4065_v8 = vsel %vm7921_vm8, %v7493_v62, %v4886_v53 }
 0x59e   :  { %4354 = vmatprep.subr.bf16.mxu1 %v3931_v25  ;;  %v3597_v61 = vpop.permute.xlu1 %3596  ;;  %v3642_v19 = vsel %vm7915_vm5, %v4870_v32, %v7475_v20  ;;  %vm7916_vm12 = vmmov %vm7910_vm0 }
 0x59f   :  { %v7515_v56 = vpop.permute.xlu0 %4058  ;;  %v3601_v11 = vsel %vm2505_vm13, %v3595_v51, %v3597_v61  ;;  %v3932_v51 = vsel %vm2505_vm13, %v4861_v50, %v3927_v43  ;;  %vm7917_vm15 = vmmov %vm7910_vm0 }
 0x5a0   :  { %4270 = vmatprep.subr.bf16.mxu0 %v3601_v11  ;;  %v3974_v6 = vsel %vm7917_vm15, %v4871_v45, %v7483_v54  ;;  %vm7927_vm7 = vmmov %vm7920_vm1  ;;  %vm7933_vm15 = vcmask 908288  }
 0x5a1   :  { %4271 = vmatpush1.bf16.msra.mxu0 %v3600_v31  ;;  %4355 = vmatpush1.bf16.msra.mxu1 %v3930_v18  ;;  %vm7935_vm11 = vmmov %vm7933_vm15 }
 0x5a2   :  { %4272 = vmatprep.subr.bf16.mxu0 %v3641_v23  ;;  %v3929_v36 = vpop.permute.xlu1 %3928 }
 0x5a3   :  { %v7526_v27 = vpop.permute.xlu0 %4893  ;;  %v3933_v22 = vsel %vm2505_vm13, %v3927_v43, %v3929_v36  ;;  %vm7914_vm13 = vmmov %vm7910_vm0 }
 0x5a4   :  { %4356 = vmatprep.subr.bf16.mxu1 %v3933_v22  ;;  %v3972_v43 = vsel %vm7914_vm13, %v4866_v0, %v7458_v12  ;;  %v4896_v11 = vunpack.i.h.bf16 %v7526_v27  ;;  %vm7926_vm0 = vmmov %vm7925_vm6 }
 0x5a5   :  { %4273 = vmatpush1.bf16.msra.mxu0 %v3640_v28  ;;  %4357 = vmatpush1.bf16.msra.mxu1 %v3932_v51  ;;  %vm7928_vm14 = vmmov %vm7926_vm0 }
 0x5a6   :  { %4358 = vmatprep.subr.bf16.mxu1 %v3973_v33  ;;  %v3639_v7 = vpop.permute.xlu1 %3638  ;;  %vm7930_vm13 = vmmov %vm7926_vm0 }
 0x5a7   :  { %v7537_v34 = vpop.permute.xlu0 %3756  ;;  %v3643_v21 = vsel %vm7913_vm4, %v7475_v20, %v3639_v7  ;;  %vm7929_vm4 = vmmov %vm7926_vm0 }
 0x5a8   :  { %4274 = vmatprep.subr.bf16.mxu0 %v3643_v21  ;;  %vm7931_vm5 = vmmov %vm7926_vm0 }
 0x5a9   :  { %4275 = vmatpush1.bf16.msra.mxu0 %v3642_v19  ;;  %4359 = vmatpush1.bf16.msra.mxu1 %v3972_v43 }
 0x5aa   :  { %4276 = vmatprep.subr.bf16.mxu0 %v7151_v46  ;;  %v3971_v24 = vpop.permute.xlu1 %3970  ;;  %v4875_v46 = vunpack.i.l.bf16 %v7359_v40 }
 0x5ab   :  { %v7547_v26 = vpop.permute.xlu0 %3764  ;;  %v3975_v3 = vsel %vm7916_vm12, %v7483_v54, %v3971_v24  ;;  %v4880_v54 = vunpack.i.l.bf16 %v7372_v41  ;;  %vm7932_vm12 = vmmov %vm7926_vm0 }
 0x5ac   :  { %4360 = vmatprep.subr.bf16.mxu1 %v3975_v3  ;;  %v3691_v20 = vsel %vm2528_vm3, %v7466_v29, %v4875_v46 }
 0x5ad   :  { %4277 = vmatpush1.bf16.msra.mxu0 %v7149_v9  ;;  %4361 = vmatpush1.bf16.msra.mxu1 %v3974_v6 }
 0x5ae   :  { %4278 = vmatprep.subr.bf16.mxu0 %v7167_v15  ;;  %4362 = vmatprep.subr.bf16.mxu1 %v7155_v4  ;;  %v4889_v1 = vpop.permute.xlu1 %4888  ;;  %v4876_v4 = vunpack.i.h.bf16 %v7359_v40  ;;  %v4885_v40 = vunpack.i.l.bf16 %v7375_v48  ;;  %v4895_v48 = vunpack.i.l.bf16 %v7526_v27 }
 0x5af   :  { %v7557_v12 = vpop.permute.xlu0 %4096  ;;  %v4890_v5 = vunpack.i.l.bf16 %v4889_v1  ;;  %v4891_v55 = vunpack.i.h.bf16 %v4889_v1 }
 0x5b0   :  { %v3733_v41 = vsel %vm7918_vm9, %v7470_v49, %v4885_v40  ;;  %v4064_v49 = vsel %vm7922_vm2, %v7504_v63, %v7493_v62  ;;  %vm7934_vm9 = vmmov %vm7926_vm0 }
 0x5b1   :  { %4279 = vmatpush1.bf16.msra.mxu0 %v7165_v14  ;;  %4363 = vmatpush1.bf16.msra.mxu1 %v7153_v2  ;;  %v4023_v2 = vsel %vm2528_vm3, %v7468_v47, %v4876_v4 }
 0x5b2   :  { %4280 = vmatprep.subr.bf16.mxu0 %v3691_v20  ;;  %4364 = vmatprep.subr.bf16.mxu1 %v7174_v58  ;;  %v3727_v9 = vpop.permute.xlu1 %3726 }
 0x5b3   :  { %v3687_v15 = vpop.permute.xlu0 %3686 }
 0x5b4   :  { %v3693_v14 = vsel %vm2528_vm3, %v3687_v15, %v4880_v54  ;;  %v3692_v29 = vsel %vm2528_vm3, %v7472_v42, %v3687_v15 }
 0x5b5   :  { %4281 = vmatpush1.bf16.msra.mxu0 %v3690_v37  ;;  %4365 = vmatpush1.bf16.msra.mxu1 %v7169_v13 }
 0x5b6   :  { %4282 = vmatprep.subr.bf16.mxu0 %v3693_v14  ;;  %4366 = vmatprep.subr.bf16.mxu1 %v4023_v2  ;;  %v3759_v58 = vpop.permute.xlu1 %3758 }
 0x5b7   :  { %v4019_v44 = vpop.permute.xlu0 %4018  ;;  %v3769_v52 = vsel %vm7925_vm6, %v3759_v58, %v4895_v48  ;;  %v3768_v23 = vsel %vm7926_vm0, %v7537_v34, %v3759_v58  ;;  %vm7942_vm0 = vcmask 261120  }
 0x5b8   :  { %v4025_v13 = vsel %vm2528_vm3, %v4019_v44, %v4881_v35  ;;  %v4024_v47 = vsel %vm2528_vm3, %v7495_v57, %v4019_v44  ;;  %vm7924_vm3 = vmmov %vm7920_vm1 }
 0x5b9   :  { %4283 = vmatpush1.bf16.msra.mxu0 %v3692_v29  ;;  %4367 = vmatpush1.bf16.msra.mxu1 %v4022_v16 }
 0x5ba   :  { %4284 = vmatprep.subr.bf16.mxu0 %v3733_v41  ;;  %4368 = vmatprep.subr.bf16.mxu1 %v4025_v13  ;;  %v4091_v17 = vpop.permute.xlu1 %4090 }
 0x5bb   :  { %v3729_v10 = vpop.permute.xlu0 %3728  ;;  %v4101_v59 = vsel %vm7929_vm4, %v4091_v17, %v4896_v11 }
 0x5bc   :  { %v3735_v42 = vsel %vm7920_vm1, %v3729_v10, %v4890_v5  ;;  %v3734_v57 = vsel %vm7923_vm10, %v3727_v9, %v3729_v10  ;;  %vm7936_vm1 = vmmov %vm7935_vm11 }
 0x5bd   :  { %4285 = vmatpush1.bf16.msra.mxu0 %v3732_v39  ;;  %4369 = vmatpush1.bf16.msra.mxu1 %v4024_v47  ;;  %vm7937_vm8 = vmmov %vm7936_vm1 }
 0x5be   :  { %4370 = vmatprep.subr.bf16.mxu1 %v4065_v8  ;;  %v4089_v25 = vpop.permute.xlu1 %4088  ;;  %4286 = vmatprep.subr.bf16.mxu0 %v3735_v42  ;;  %vm7938_vm2 = vmmov %vm7936_vm1 }
 0x5bf   :  { %v4061_v30 = vpop.permute.xlu0 %4060  ;;  %v4100_v28 = vsel %vm7931_vm5, %v4089_v25, %v4091_v17  ;;  %vm7939_vm10 = vmmov %vm7936_vm1 }
 0x5c0   :  { %v4067_v60 = vsel %vm7924_vm3, %v4061_v30, %v4891_v55  ;;  %v4066_v62 = vsel %vm7927_vm7, %v7515_v56, %v4061_v30  ;;  %v4954_v56 = vld [vmem:[%s7661_s5] ss:$12 sps:$4 sm:$0xff]   ;;  %vm7940_vm3 = vmmov %vm7936_vm1 }
 0x5c1   :  { %4287 = vmatpush1.bf16.msra.mxu0 %v3734_v57  ;;  %4371 = vmatpush1.bf16.msra.mxu1 %v4064_v49  ;;  %vm7941_vm6 = vmmov %vm7936_vm1 }
 0x5c2   :  { %v4899_v61 = vpop.permute.xlu1 %4898  ;;  %4288 = vmatprep.subr.bf16.mxu0 %v3769_v52  ;;  %4372 = vmatprep.subr.bf16.mxu1 %v4067_v60  ;;  %vm7943_vm7 = vmmov %vm7942_vm0 }
 0x5c3   :  { %v4900_v18 = vunpack.i.l.bf16 %v4899_v61  ;;  %v4095_v31 = vpop.permute.xlu0 %4094  ;;  %v4901_v63 = vunpack.i.h.bf16 %v4899_v61 }
 0x5c4   :  { %v4102_v34 = vsel %vm7934_vm9, %v4095_v31, %v7557_v12 }
 0x5c5   :  { %4289 = vmatpush1.bf16.msra.mxu0 %v3768_v23  ;;  %4373 = vmatpush1.bf16.msra.mxu1 %v4066_v62  ;;  %v3771_v50 = vsel %vm7928_vm14, %v7547_v26, %v4900_v18  ;;  %v4103_v33 = vsel %vm7932_vm12, %v7557_v12, %v4901_v63 }
 0x5c6   :  { %v3763_v36 = vpop.permute.xlu1 %3762  ;;  %4290 = vmatprep.subr.bf16.mxu0 %v3771_v50  ;;  %4374 = vmatprep.subr.bf16.mxu1 %v4101_v59 }
 0x5c7   :  { %v3770_v27 = vsel %vm7930_vm13, %v3763_v36, %v7547_v26  ;;  %v4904_v22 = vpop.permute.xlu0 %4903 }
 0x5c8   :  { %v4905_v51 = vunpack.i.l.bf16 %v4904_v22  ;;  %v4906_v43 = vunpack.i.h.bf16 %v4904_v22 }
 0x5c9   :  { %4291 = vmatpush1.bf16.msra.mxu0 %v3770_v27  ;;  %4375 = vmatpush1.bf16.msra.mxu1 %v4100_v28 }
 0x5ca   :  { %v3801_v32 = vpop.permute.xlu1 %3800  ;;  %4376 = vmatprep.subr.bf16.mxu1 %v4103_v33 }
 0x5cb   :  { %v3799_v0 = vpop.permute.xlu0 %3798  ;;  %v3811_v7 = vsel %vm7933_vm15, %v3801_v32, %v4905_v51 }
 0x5cc   :  { %v3810_v21 = vsel %vm7935_vm11, %v3799_v0, %v3801_v32  ;;  %4303 = vmatprep.subr.bf16.mxu0 %v3811_v7  ;;  %4293 = vmatmul.mubr.bf16.vlgmr.msra.gmra.mrb[16].mxu0 %v4954_v56 }
 0x5cd   :  { %4304 = vmatpush1.bf16.msra.mxu0 %v3810_v21  ;;  %4377 = vmatpush1.bf16.msra.mxu1 %v4102_v34 }
 0x5ce   :  { %v4133_v19 = vpop.permute.xlu1 %4132  ;;  %4335 = vmatprep.mubr.bf16.mxu0 %v7883_v38 }
 0x5cf   :  { %v3807_v45 = vpop.permute.xlu0 %3806  ;;  %v4143_v24 = vsel %vm7936_vm1, %v4133_v19, %v4906_v43 }
 0x5d0   :  { %4389 = vmatprep.subr.bf16.mxu1 %v4143_v24  ;;  %4379 = vmatmul.mubr.bf16.vlgmr.msra.gmra.mrb[16].mxu1 %v4954_v56 }
 0x5d1   :  { %4421 = vmatprep.mubr.bf16.mxu1 %v7883_v38  ;;  %v4957_v38 = vld [vmem:[%s7661_s5 + $0x8] ss:$12 sps:$4 sm:$0xff]  }
 0x5d2   :  { %v4131_v26 = vpop.permute.xlu1 %4130 }
 0x5d3   :  { %v4142_v3 = vsel %vm7937_vm8, %v4131_v26, %v4133_v19  ;;  %v4139_v6 = vpop.permute.xlu0 %4138 }
 0x5d4   :  { %4390 = vmatpush1.bf16.msra.mxu1 %v4142_v3 }
 0x5d6   :  { %v4909_v1 = vpop.permute.xlu1 %4908 }
 0x5d7   :  { %v4911_v46 = vunpack.i.h.bf16 %v4909_v1  ;;  %v4910_v12 = vunpack.i.l.bf16 %v4909_v1  ;;  %v4137_v20 = vpop.permute.xlu0 %4136 }
 0x5d8   :  { %v4144_v4 = vsel %vm7940_vm3, %v4137_v20, %v4139_v6 }
 0x5d9   :  { %v3813_v54 = vsel %vm7938_vm2, %v3807_v45, %v4910_v12  ;;  %v4145_v9 = vsel %vm7939_vm10, %v4139_v6, %v4911_v46 }
 0x5da   :  { %v3805_v15 = vpop.permute.xlu1 %3804  ;;  %4305 = vmatprep.subr.bf16.mxu0 %v3813_v54  ;;  %4391 = vmatprep.subr.bf16.mxu1 %v4145_v9 }
 0x5db   :  { %v3812_v37 = vsel %vm7941_vm6, %v3805_v15, %v3807_v45  ;;  %4392 = vmatpush1.bf16.msra.mxu1 %v4144_v4 }
 0x5dc   :  { %4306 = vmatpush1.bf16.msra.mxu0 %v3812_v37 }
 0x5de   :  { %4620 = vmatmul.mubr.msk.bf16.vlgmr.msra.gmra.mrb[16].mxu1 %vm7942_vm0, %v4957_v38 }
 0x5df   :  { %4619 = vmatmul.mubr.msk.bf16.vlgmr.msra.gmra.mrb[16].mxu0 %vm7943_vm7, %v4957_v38 }
 0x5e8   :  { %v4240_v14 = vpop.permute.xlu0 %4239 }
 0x5eb   :  { %v4235_v2 = vpop.permute.xlu1 %4234 }
 0x6b1   :  { %v4423_v35 = vpop.f32.mrb[16].mxu1 }
 0x6b2   :  { %v4657_v58 = vadd.f32 %v4423_v35, %v4235_v2  ;;  %v4337_v40 = vpop.f32.mrb[16].mxu0  ;;  %v4425_v44 = vpop.f32.mrb[17].mxu1 }
 0x6b3   :  { %v4653_v16 = vadd.f32 %v4337_v40, %v4235_v2  ;;  %v4658_v29 = vadd.f32 %v4425_v44, %v4235_v2  ;;  %v4339_v13 = vpop.f32.mrb[17].mxu0  ;;  %v4427_v41 = vpop.f32.mrb[18].mxu1 }
 0x6b4   :  { %4434 = vst [vmem:[%s7663_s7 + $0x10] sm:$0xff] %v4657_v58  ;;  %v4654_v5 = vadd.f32 %v4339_v13, %v4235_v2  ;;  %v4659_v17 = vadd.f32 %v4427_v41, %v4240_v14  ;;  %v4341_v53 = vpop.f32.mrb[18].mxu0  ;;  %v4429_v10 = vpop.f32.mrb[19].mxu1 }
 0x6b5   :  { %4432 = vst [vmem:[%s7663_s7] sm:$0xff] %v4653_v16  ;;  %4435 = vst [vmem:[%s7663_s7 + $0x18] sm:$0xff] %v4658_v29  ;;  %v4655_v39 = vadd.f32 %v4341_v53, %v4240_v14  ;;  %v4660_v47 = vadd.f32 %v4429_v10, %v4240_v14  ;;  %v4343_v42 = vpop.f32.mrb[19].mxu0 }
 0x6b6   :  { %4433 = vst [vmem:[%s7663_s7 + $0x8] sm:$0xff] %v4654_v5  ;;  %4438 = vst [vmem:[%s7663_s7 + $0x30] sm:$0xff] %v4659_v17  ;;  %v4656_v8 = vadd.f32 %v4343_v42, %v4240_v14 }
 0x6b7   :  { %4436 = vst [vmem:[%s7663_s7 + $0x20] sm:$0xff] %v4655_v39  ;;  %4439 = vst [vmem:[%s7663_s7 + $0x38] sm:$0xff] %v4660_v47 }
 0x6b8   :  { %4437 = vst [vmem:[%s7663_s7 + $0x28] sm:$0xff] %v4656_v8 }

</bundles_post_ra>
